<compile_context>
chip_gen: v7x
topology: tpu7x:2x2x1
jax: 0.10.0
libtpu: 0.0.40
codegen_flags: <defaults>
</compile_context>

<pallas_src>
import functools
import numpy as np
import jax
import jax.numpy as jnp
from jax.experimental import pallas as pl
from jax.experimental.pallas import tpu as pltpu


# ----------------------------- kernel helpers -------------------------------

def _layernorm(x, eps):
    mu = jnp.mean(x, axis=-1, keepdims=True)
    var = jnp.mean((x - mu) ** 2, axis=-1, keepdims=True)     # biased, like torch
    return (x - mu) * jax.lax.rsqrt(var + eps)


def _mha_out(q, kv, wo, bo, residual, heads, dim_head, scale):
    # Multi-head attention + to_out linear + bias + residual, heads packed in the lane dim.
    # concat_h(out_h) @ Wo == sum_h out_h @ Wo[h*d:(h+1)*d, :]  -> accumulate head-by-head.
    D = heads * dim_head
    acc = residual + bo                                        # f32
    for hh in range(heads):
        s = hh * dim_head
        q_h = q[:, s:s + dim_head]
        k_h = kv[:, s:s + dim_head]
        v_h = kv[:, D + s:D + s + dim_head]
        sim = jax.lax.dot_general(q_h, k_h, (((1,), (1,)), ((), ())),
                                  preferred_element_type=jnp.float32) * scale
        sim = sim - jnp.max(sim, axis=-1, keepdims=True)
        p = jnp.exp(sim)
        attn = p * pl.reciprocal(jnp.sum(p, axis=-1, keepdims=True), approx=True)
        o_h = jnp.dot(attn, v_h, preferred_element_type=jnp.float32)          # (n, dh)
        acc = acc + jnp.dot(o_h.astype(jnp.bfloat16), wo[s:s + dim_head, :],
                            preferred_element_type=jnp.float32)
    # TODO(synk): for large n*m add flash-style online-softmax tiling over the KV length.
    return acc


# ----------------------------- Pallas kernels -------------------------------

def _gn_proj_attn1_kernel(x_ref, agg_ref, gng_ref, gnb_ref, win_ref, bin_ref, pos_ref,
                          g1_ref, b1_ref, wq_ref, wkv_ref, wo_ref, bo_ref, o_ref,
                          *, gn_eps, ln_eps, heads, dim_head, scale):
    # GroupNorm (token layout) + affine + proj_in 1x1-conv + bias + pos-embed,
    # then LN1 + fused QKV projection + self-attention + to_out + residual.
    x = x_ref[0]                                              # (hw, c) f32
    m1 = jnp.mean(x, axis=0, keepdims=True)                   # per-channel mean  (1, c)
    mu = jnp.dot(m1, agg_ref[...], preferred_element_type=jnp.float32)   # group mean / channel
    xc = x - mu
    v1 = jnp.mean(xc * xc, axis=0, keepdims=True)             # per-channel var about group mean
    var = jnp.dot(v1, agg_ref[...], preferred_element_type=jnp.float32)  # group var / channel
    xn = xc * jax.lax.rsqrt(var + gn_eps) * gng_ref[...] + gnb_ref[...]
    t = jnp.dot(xn.astype(jnp.bfloat16), win_ref[...],
                preferred_element_type=jnp.float32)           # (hw, inner)
    t = t + bin_ref[...] + pos_ref[...]
    # --- self-attention block ---
    tn = _layernorm(t, ln_eps) * g1_ref[...] + b1_ref[...]
    tb = tn.astype(jnp.bfloat16)
    q = jnp.dot(tb, wq_ref[...], preferred_element_type=jnp.float32)
    kv = jnp.dot(tb, wkv_ref[...], preferred_element_type=jnp.float32)
    o_ref[0] = _mha_out(q, kv, wo_ref[...], bo_ref[...], t, heads, dim_head, scale)


def _cross_attn_kernel(x_ref, g2_ref, b2_ref, wq_ref, ctx_ref, wkv_ref, wo_ref, bo_ref,
                       o_ref, *, ln_eps, heads, dim_head, scale):
    # LN2 + Q projection, context -> fused K|V projection, cross-attention + to_out + residual.
    x = x_ref[0]                                              # (n, D)  f32
    xn = _layernorm(x, ln_eps) * g2_ref[...] + b2_ref[...]
    q = jnp.dot(xn.astype(jnp.bfloat16), wq_ref[...], preferred_element_type=jnp.float32)
    kv = jnp.dot(ctx_ref[0].astype(jnp.bfloat16), wkv_ref[...],
                 preferred_element_type=jnp.float32)          # (m, 2D)
    o_ref[0] = _mha_out(q, kv, wo_ref[...], bo_ref[...], x, heads, dim_head, scale)


def _ln_ff_proj_out_kernel(x_ref, g_ref, b_ref, w1_ref, b1_ref, w2_ref, b2_ref,
                           wf_ref, bf_ref, wpo_ref, bpo_ref, xin_ref, o_ref, *, eps):
    # LN3 + GEGLU + FF output linear + residual, then proj_out 1x1-conv (zero-init)
    # + bias + residual with the original input.
    x = x_ref[...]                                            # (tm, D) f32
    xn = (_layernorm(x, eps) * g_ref[...] + b_ref[...]).astype(jnp.bfloat16)
    h = jnp.dot(xn, w1_ref[...], preferred_element_type=jnp.float32) + b1_ref[...]
    g = jnp.dot(xn, w2_ref[...], preferred_element_type=jnp.float32) + b2_ref[...]
    gelu_g = 0.5 * g * (1.0 + jax.lax.erf(g * 0.7071067811865476))   # exact erf GELU
    hg = (h * gelu_g).astype(jnp.bfloat16)
    y = jnp.dot(hg, wf_ref[...], preferred_element_type=jnp.float32) + bf_ref[...] + x
    out = jnp.dot(y.astype(jnp.bfloat16), wpo_ref[...], preferred_element_type=jnp.float32)
    o_ref[...] = out + bpo_ref[...] + xin_ref[...]


# ----------------------------- pallas_call wrappers -------------------------

def _row_tile(m):
    # The grid is a serial loop on v5e/v6e; prefer big row tiles to amortize the ~0.35 us
    # per-step overhead.
    for t in (1024, 512, 256, 128, 64, 32, 16, 8):
        if m % t == 0:
            return t
    return m


_PP = pltpu.CompilerParams(dimension_semantics=("parallel",))


def gn_attn1(x_tok, agg, gn_g, gn_b, w_in, b_in, pos,
             ln1_g, ln1_b, wq, wkv, wo, bo, heads, dim_head,
             gn_eps=1e-6, ln_eps=1e-5):
    b, hw, c = x_tok.shape
    inner = heads * dim_head
    kern = functools.partial(_gn_proj_attn1_kernel, gn_eps=gn_eps, ln_eps=ln_eps,
                             heads=heads, dim_head=dim_head, scale=dim_head ** (-0.5))
    return pl.pallas_call(
        kern,
        out_shape=jax.ShapeDtypeStruct((b, hw, inner), jnp.float32),
        grid=(b,),
        in_specs=[pl.BlockSpec((1, hw, c), lambda i: (i, 0, 0)),
                  pl.BlockSpec((c, c), lambda i: (0, 0)),
                  pl.BlockSpec((1, c), lambda i: (0, 0)),
                  pl.BlockSpec((1, c), lambda i: (0, 0)),
                  pl.BlockSpec((c, inner), lambda i: (0, 0)),
                  pl.BlockSpec((1, inner), lambda i: (0, 0)),
                  pl.BlockSpec((hw, inner), lambda i: (0, 0)),
                  pl.BlockSpec((1, inner), lambda i: (0, 0)),
                  pl.BlockSpec((1, inner), lambda i: (0, 0)),
                  pl.BlockSpec((inner, inner), lambda i: (0, 0)),
                  pl.BlockSpec((inner, 2 * inner), lambda i: (0, 0)),
                  pl.BlockSpec((inner, inner), lambda i: (0, 0)),
                  pl.BlockSpec((1, inner), lambda i: (0, 0))],
        out_specs=pl.BlockSpec((1, hw, inner), lambda i: (i, 0, 0)),
        compiler_params=_PP,
    )(x_tok, agg, gn_g.reshape(1, c), gn_b.reshape(1, c),
      w_in, b_in.reshape(1, inner), pos,
      ln1_g.reshape(1, inner), ln1_b.reshape(1, inner), wq, wkv, wo,
      bo.reshape(1, inner))


def cross_attn(tok, ln2_g, ln2_b, wq, context, wkv, wo, bo, heads, dim_head, ln_eps=1e-5):
    b, n, D = tok.shape
    m, cdim = context.shape[1], context.shape[2]
    kern = functools.partial(_cross_attn_kernel, ln_eps=ln_eps, heads=heads,
                             dim_head=dim_head, scale=dim_head ** (-0.5))
    return pl.pallas_call(
        kern,
        out_shape=jax.ShapeDtypeStruct((b, n, D), jnp.float32),
        grid=(b,),
        in_specs=[pl.BlockSpec((1, n, D), lambda i: (i, 0, 0)),
                  pl.BlockSpec((1, D), lambda i: (0, 0)),
                  pl.BlockSpec((1, D), lambda i: (0, 0)),
                  pl.BlockSpec((D, D), lambda i: (0, 0)),
                  pl.BlockSpec((1, m, cdim), lambda i: (i, 0, 0)),
                  pl.BlockSpec((cdim, 2 * D), lambda i: (0, 0)),
                  pl.BlockSpec((D, D), lambda i: (0, 0)),
                  pl.BlockSpec((1, D), lambda i: (0, 0))],
        out_specs=pl.BlockSpec((1, n, D), lambda i: (i, 0, 0)),
        compiler_params=_PP,
    )(tok, ln2_g.reshape(1, D), ln2_b.reshape(1, D), wq, context, wkv, wo,
      bo.reshape(1, D))


def ln_ff_proj_out(x2d, gamma, beta, w1, b1, w2, b2, w_ff, b_ff,
                   w_po, b_po, xin2d, eps=1e-5):
    M, D = x2d.shape
    F = w1.shape[1]
    C = w_po.shape[1]
    tm = _row_tile(M)
    kern = functools.partial(_ln_ff_proj_out_kernel, eps=eps)
    # TODO(synk): for production dims on v7x (64 MiB VMEM) add N/K weight tiling with a VMEM
    # accumulator and single-buffered (pl.Buffered(1)) weight specs.
    return pl.pallas_call(
        kern,
        out_shape=jax.ShapeDtypeStruct((M, C), jnp.float32),
        grid=(M // tm,),
        in_specs=[pl.BlockSpec((tm, D), lambda i: (i, 0)),
                  pl.BlockSpec((1, D), lambda i: (0, 0)),
                  pl.BlockSpec((1, D), lambda i: (0, 0)),
                  pl.BlockSpec((D, F), lambda i: (0, 0)),
                  pl.BlockSpec((1, F), lambda i: (0, 0)),
                  pl.BlockSpec((D, F), lambda i: (0, 0)),
                  pl.BlockSpec((1, F), lambda i: (0, 0)),
                  pl.BlockSpec((F, D), lambda i: (0, 0)),
                  pl.BlockSpec((1, D), lambda i: (0, 0)),
                  pl.BlockSpec((D, C), lambda i: (0, 0)),
                  pl.BlockSpec((1, C), lambda i: (0, 0)),
                  pl.BlockSpec((tm, C), lambda i: (i, 0))],
        out_specs=pl.BlockSpec((tm, C), lambda i: (i, 0)),
        compiler_params=_PP,
    )(x2d, gamma.reshape(1, D), beta.reshape(1, D),
      w1, b1.reshape(1, F), w2, b2.reshape(1, F),
      w_ff, b_ff.reshape(1, D), w_po, b_po.reshape(1, C), xin2d)


# ----------------------------- model (JAX glue) -----------------------------

def sincos_pos_embed(embed_dim, n_pos):
    omega = np.arange(embed_dim // 2, dtype=np.float64)
    omega /= embed_dim / 2.0
    omega = 1.0 / 10000 ** omega
    pos = np.arange(n_pos, dtype=np.float64).reshape(-1)
    out = np.einsum('m,d->md', pos, omega)
    emb = np.concatenate([np.sin(out), np.cos(out)], axis=1)
    return jnp.asarray(emb, dtype=jnp.float32)


def group_avg_matrix(channels, num_groups):
    # Block-diagonal averaging matrix: (per-channel stats) @ A = per-group stats
    # broadcast back to channels.
    gs = channels // num_groups
    a = np.zeros((channels, channels), np.float32)
    for g in range(num_groups):
        a[g * gs:(g + 1) * gs, g * gs:(g + 1) * gs] = 1.0 / gs
    return jnp.asarray(a)


def context_transformer_forward(x, context, params, n_heads, d_head):
    # image path (isimage(x) == True), use_linear=False, depth=1
    b, c, h, w = x.shape
    inner = n_heads * d_head
    hw = h * w
    # single layout transpose to token layout (b, hw, c); reused as the final residual
    x_tok = x.reshape(b, c, hw).transpose(0, 2, 1)
    pos = sincos_pos_embed(inner, hw)          # trace-time constant
    agg = group_avg_matrix(c, 32)              # trace-time constant
    blk = params['block']
    # Kernel A: GN + proj_in + pos-embed + LN1 + QKV + self-attention + to_out + residual
    tok = gn_attn1(x_tok, agg, params['norm_g'], params['norm_b'],
                   params['proj_in_w'], params['proj_in_b'], pos,
                   blk['ln1_g'], blk['ln1_b'],
                   blk['attn1']['wq'], blk['attn1']['wkv'],
                   blk['attn1']['wo'], blk['attn1']['bo'], n_heads, d_head)
    # Kernel B: LN2 + Q, context K|V, cross-attention + to_out + residual
    tok = cross_attn(tok, blk['ln2_g'], blk['ln2_b'], blk['attn2']['wq'],
                     context, blk['attn2']['wkv'], blk['attn2']['wo'],
                     blk['attn2']['bo'], n_heads, d_head)
    # Kernel C: LN3 + GEGLU + FF out + residual + proj_out + bias + input residual
    out_tok = ln_ff_proj_out(tok.reshape(b * hw, inner), blk['ln3_g'], blk['ln3_b'],
                             blk['ff']['w1'], blk['ff']['b1'],
                             blk['ff']['w2'], blk['ff']['b2'],
                             blk['ff']['w_out'], blk['ff']['b_out'],
                             params['proj_out_w'], params['proj_out_b'],
                             x_tok.reshape(b * hw, c))
    # TODO(synk): nn.Dropout(p=0.0) in to_out / FF is identity (not implemented).
    return out_tok.reshape(b, hw, c).transpose(0, 2, 1).reshape(b, c, h, w)


# ----------------------------- parameter init -------------------------------

def init_params(key, in_channels, n_heads, d_head, context_dim):
    inner = n_heads * d_head
    ff_inner = inner * 4
    ks = jax.random.split(key, 16)

    def W(k, shape, scale=0.02, dtype=jnp.bfloat16):     # matmul weights stored bf16
        return (scale * jax.random.normal(k, shape)).astype(dtype)

    zeros = lambda *s: jnp.zeros(s, jnp.float32)
    ones = lambda *s: jnp.ones(s, jnp.float32)

    return {
        'norm_g': ones(in_channels), 'norm_b': zeros(in_channels),
        'proj_in_w': W(ks[0], (in_channels, inner)),
        'proj_in_b': W(ks[1], (inner,), dtype=jnp.float32),
        # zero_module(proj_out): zero weights and bias
        'proj_out_w': jnp.zeros((inner, in_channels), jnp.bfloat16),
        'proj_out_b': zeros(in_channels),
        'block': {
            'ln1_g': ones(inner), 'ln1_b': zeros(inner),
            'ln2_g': ones(inner), 'ln2_b': zeros(inner),
            'ln3_g': ones(inner), 'ln3_b': zeros(inner),
            'attn1': {  # self-attention; to_q/k/v bias-free, K|V concatenated
                'wq': W(ks[2], (inner, inner)),
                'wkv': W(ks[3], (inner, 2 * inner)),
                'wo': W(ks[4], (inner, inner)),
                'bo': W(ks[5], (inner,), dtype=jnp.float32),
            },
            'attn2': {  # cross-attention over context_dim
                'wq': W(ks[6], (inner, inner)),
                'wkv': W(ks[7], (context_dim, 2 * inner)),
                'wo': W(ks[8], (inner, inner)),
                'bo': W(ks[9], (inner,), dtype=jnp.float32),
            },
            'ff': {  # GEGLU(dim, 4*dim) then Linear(4*dim, dim)
                'w1': W(ks[10], (inner, ff_inner)),
                'b1': W(ks[11], (ff_inner,), dtype=jnp.float32),
                'w2': W(ks[12], (inner, ff_inner)),
                'b2': W(ks[13], (ff_inner,), dtype=jnp.float32),
                'w_out': W(ks[14], (ff_inner, inner)),
                'b_out': W(ks[15], (inner,), dtype=jnp.float32),
            },
        },
    }


# ----------------------------- main ------------------------------------------

if __name__ == "__main__":
    key = jax.random.PRNGKey(0)
    in_channels = 64            # GroupNorm(num_groups=32) requires channels % 32 == 0
    n_heads, d_head = 2, 64     # inner_dim = 128 (lane-dense)
    context_dim = 64
    b, h, w = 2, 8, 8
    ctx_len = 8

    k1, k2, k3 = jax.random.split(key, 3)
    x = jax.random.normal(k1, (b, in_channels, h, w), jnp.float32)
    context = jax.random.normal(k2, (b, ctx_len, context_dim), jnp.float32)
    params = init_params(k3, in_channels, n_heads, d_head, context_dim)

    fwd = jax.jit(functools.partial(context_transformer_forward,
                                    n_heads=n_heads, d_head=d_head))
    out = fwd(x, context, params)
    jax.block_until_ready(out)
    assert out.shape == x.shape and out.dtype == jnp.float32
    print("KERNEL_OK")
</pallas_src>

<mosaic_0001>
module attributes {stable_mosaic.version = 11 : i64} {
  func.func @_cross_attn_kernel(%arg0: i32, %arg1: memref<1x64x128xf32, #tpu.memory_space<vmem>>, %arg2: memref<1x128xf32, #tpu.memory_space<vmem>>, %arg3: memref<1x128xf32, #tpu.memory_space<vmem>>, %arg4: memref<128x128xbf16, #tpu.memory_space<vmem>>, %arg5: memref<1x8x64xf32, #tpu.memory_space<vmem>>, %arg6: memref<64x256xbf16, #tpu.memory_space<vmem>>, %arg7: memref<128x128xbf16, #tpu.memory_space<vmem>>, %arg8: memref<1x128xf32, #tpu.memory_space<vmem>>, %arg9: memref<1x64x128xf32, #tpu.memory_space<vmem>>) attributes {dimension_semantics = [#tpu.dimension_semantics<parallel>], iteration_bounds = array<i64: 2>, scalar_prefetch = 0 : i64, scratch_operands = 0 : i64, tpu.core_type = #tpu.core_type<tc>, window_params = [{transform_indices = @transform_0, window_bounds = array<i64: 1, 64, 128>}, {pipeline_mode = #tpu.pipeline_mode<synchronous>, transform_indices = @transform_1, window_bounds = array<i64: 1, 128>}, {pipeline_mode = #tpu.pipeline_mode<synchronous>, transform_indices = @transform_2, window_bounds = array<i64: 1, 128>}, {pipeline_mode = #tpu.pipeline_mode<synchronous>, transform_indices = @transform_3, window_bounds = array<i64: 128, 128>}, {transform_indices = @transform_4, window_bounds = array<i64: 1, 8, 64>}, {pipeline_mode = #tpu.pipeline_mode<synchronous>, transform_indices = @transform_5, window_bounds = array<i64: 64, 256>}, {pipeline_mode = #tpu.pipeline_mode<synchronous>, transform_indices = @transform_6, window_bounds = array<i64: 128, 128>}, {pipeline_mode = #tpu.pipeline_mode<synchronous>, transform_indices = @transform_7, window_bounds = array<i64: 1, 128>}, {transform_indices = @transform_8, window_bounds = array<i64: 1, 64, 128>}]} {
    %c0 = arith.constant 0 : index
    %c0_0 = arith.constant 0 : index
    %c0_1 = arith.constant 0 : index
    %0 = vector.load %arg1[%c0, %c0_0, %c0_1] : memref<1x64x128xf32, #tpu.memory_space<vmem>>, vector<1x64x128xf32>
    %1 = vector.shape_cast %0 : vector<1x64x128xf32> to vector<64x128xf32>
    %cst = arith.constant dense<0.000000e+00> : vector<64xf32>
    %2 = vector.multi_reduction <add>, %1, %cst [1] : vector<64x128xf32> to vector<64xf32>
    %3 = vector.shape_cast %2 : vector<64xf32> to vector<64x1xf32>
    %cst_2 = arith.constant 1.280000e+02 : f32
    %4 = vector.broadcast %cst_2 : f32 to vector<64x1xf32>
    %5 = arith.divf %3, %4 : vector<64x1xf32>
    %6 = vector.broadcast %5 : vector<64x1xf32> to vector<64x128xf32>
    %7 = arith.subf %1, %6 : vector<64x128xf32>
    %8 = arith.mulf %7, %7 : vector<64x128xf32>
    %cst_3 = arith.constant dense<0.000000e+00> : vector<64xf32>
    %9 = vector.multi_reduction <add>, %8, %cst_3 [1] : vector<64x128xf32> to vector<64xf32>
    %10 = vector.shape_cast %9 : vector<64xf32> to vector<64x1xf32>
    %cst_4 = arith.constant 1.280000e+02 : f32
    %11 = vector.broadcast %cst_4 : f32 to vector<64x1xf32>
    %12 = arith.divf %10, %11 : vector<64x1xf32>
    %13 = vector.broadcast %5 : vector<64x1xf32> to vector<64x128xf32>
    %14 = arith.subf %1, %13 : vector<64x128xf32>
    %cst_5 = arith.constant 9.99999974E-6 : f32
    %15 = vector.broadcast %cst_5 : f32 to vector<64x1xf32>
    %16 = arith.addf %12, %15 : vector<64x1xf32>
    %17 = math.rsqrt %16 : vector<64x1xf32>
    %18 = vector.broadcast %17 : vector<64x1xf32> to vector<64x128xf32>
    %19 = arith.mulf %14, %18 : vector<64x128xf32>
    %c0_6 = arith.constant 0 : index
    %c0_7 = arith.constant 0 : index
    %20 = vector.load %arg2[%c0_6, %c0_7] : memref<1x128xf32, #tpu.memory_space<vmem>>, vector<1x128xf32>
    %21 = vector.broadcast %20 : vector<1x128xf32> to vector<64x128xf32>
    %22 = arith.mulf %19, %21 : vector<64x128xf32>
    %c0_8 = arith.constant 0 : index
    %c0_9 = arith.constant 0 : index
    %23 = vector.load %arg3[%c0_8, %c0_9] : memref<1x128xf32, #tpu.memory_space<vmem>>, vector<1x128xf32>
    %24 = vector.broadcast %23 : vector<1x128xf32> to vector<64x128xf32>
    %25 = arith.addf %22, %24 : vector<64x128xf32>
    %26 = arith.truncf %25 : vector<64x128xf32> to vector<64x128xbf16>
    %c0_10 = arith.constant 0 : index
    %c0_11 = arith.constant 0 : index
    %27 = vector.load %arg4[%c0_10, %c0_11] : memref<128x128xbf16, #tpu.memory_space<vmem>>, vector<128x128xbf16>
    %cst_12 = arith.constant dense<0.000000e+00> : vector<64x128xf32>
    %28 = tpu.matmul %26, %27, %cst_12 {dimension_numbers = #tpu.dot_dimension_numbers<[1], [0], [0], [1], [0, 0, 1, 1], [], []>} : vector<64x128xbf16>, vector<128x128xbf16>, vector<64x128xf32> -> vector<64x128xf32>
    %c0_13 = arith.constant 0 : index
    %c0_14 = arith.constant 0 : index
    %c0_15 = arith.constant 0 : index
    %29 = vector.load %arg5[%c0_13, %c0_14, %c0_15] : memref<1x8x64xf32, #tpu.memory_space<vmem>>, vector<1x8x64xf32>
    %30 = vector.shape_cast %29 : vector<1x8x64xf32> to vector<8x64xf32>
    %31 = arith.truncf %30 : vector<8x64xf32> to vector<8x64xbf16>
    %c0_16 = arith.constant 0 : index
    %c0_17 = arith.constant 0 : index
    %32 = vector.load %arg6[%c0_16, %c0_17] : memref<64x256xbf16, #tpu.memory_space<vmem>>, vector<64x256xbf16>
    %cst_18 = arith.constant dense<0.000000e+00> : vector<8x256xf32>
    %33 = tpu.matmul %31, %32, %cst_18 {dimension_numbers = #tpu.dot_dimension_numbers<[1], [0], [0], [1], [0, 0, 1, 1], [], []>} : vector<8x64xbf16>, vector<64x256xbf16>, vector<8x256xf32> -> vector<8x256xf32>
    %c0_19 = arith.constant 0 : index
    %c0_20 = arith.constant 0 : index
    %34 = vector.load %arg7[%c0_19, %c0_20] : memref<128x128xbf16, #tpu.memory_space<vmem>>, vector<128x128xbf16>
    %c0_21 = arith.constant 0 : index
    %c0_22 = arith.constant 0 : index
    %35 = vector.load %arg8[%c0_21, %c0_22] : memref<1x128xf32, #tpu.memory_space<vmem>>, vector<1x128xf32>
    %36 = vector.broadcast %35 : vector<1x128xf32> to vector<64x128xf32>
    %37 = arith.addf %1, %36 : vector<64x128xf32>
    %38 = vector.extract_strided_slice %28 {offsets = [0, 0], sizes = [64, 64], strides = [1, 1]} : vector<64x128xf32> to vector<64x64xf32>
    %39 = vector.extract_strided_slice %33 {offsets = [0, 0], sizes = [8, 64], strides = [1, 1]} : vector<8x256xf32> to vector<8x64xf32>
    %40 = vector.extract_strided_slice %33 {offsets = [0, 128], sizes = [8, 64], strides = [1, 1]} : vector<8x256xf32> to vector<8x64xf32>
    %cst_23 = arith.constant dense<0.000000e+00> : vector<64x8xf32>
    %41 = tpu.matmul %38, %39, %cst_23 {dimension_numbers = #tpu.dot_dimension_numbers<[1], [1], [0], [0], [0, 0, 1, 0], [], []>} : vector<64x64xf32>, vector<8x64xf32>, vector<64x8xf32> -> vector<64x8xf32>
    %cst_24 = arith.constant 1.250000e-01 : f32
    %42 = vector.broadcast %cst_24 : f32 to vector<64x8xf32>
    %43 = arith.mulf %41, %42 : vector<64x8xf32>
    %cst_25 = arith.constant dense<0xFF800000> : vector<64xf32>
    %44 = vector.multi_reduction <maximumf>, %43, %cst_25 [1] : vector<64x8xf32> to vector<64xf32>
    %45 = vector.shape_cast %44 : vector<64xf32> to vector<64x1xf32>
    %46 = vector.broadcast %45 : vector<64x1xf32> to vector<64x8xf32>
    %47 = arith.subf %43, %46 : vector<64x8xf32>
    %48 = math.exp %47 : vector<64x8xf32>
    %cst_26 = arith.constant dense<0.000000e+00> : vector<64xf32>
    %49 = vector.multi_reduction <add>, %48, %cst_26 [1] : vector<64x8xf32> to vector<64xf32>
    %50 = vector.shape_cast %49 : vector<64xf32> to vector<64x1xf32>
    %51 = tpu.reciprocal %50 {approx = true} : vector<64x1xf32> -> vector<64x1xf32>
    %52 = vector.broadcast %51 : vector<64x1xf32> to vector<64x8xf32>
    %53 = arith.mulf %48, %52 : vector<64x8xf32>
    %cst_27 = arith.constant dense<0.000000e+00> : vector<64x64xf32>
    %54 = tpu.matmul %53, %40, %cst_27 {dimension_numbers = #tpu.dot_dimension_numbers<[1], [0], [0], [1], [0, 0, 1, 1], [], []>} : vector<64x8xf32>, vector<8x64xf32>, vector<64x64xf32> -> vector<64x64xf32>
    %55 = arith.truncf %54 : vector<64x64xf32> to vector<64x64xbf16>
    %56 = vector.extract_strided_slice %34 {offsets = [0, 0], sizes = [64, 128], strides = [1, 1]} : vector<128x128xbf16> to vector<64x128xbf16>
    %cst_28 = arith.constant dense<0.000000e+00> : vector<64x128xf32>
    %57 = tpu.matmul %55, %56, %cst_28 {dimension_numbers = #tpu.dot_dimension_numbers<[1], [0], [0], [1], [0, 0, 1, 1], [], []>} : vector<64x64xbf16>, vector<64x128xbf16>, vector<64x128xf32> -> vector<64x128xf32>
    %58 = arith.addf %37, %57 : vector<64x128xf32>
    %59 = vector.extract_strided_slice %28 {offsets = [0, 64], sizes = [64, 64], strides = [1, 1]} : vector<64x128xf32> to vector<64x64xf32>
    %60 = vector.extract_strided_slice %33 {offsets = [0, 64], sizes = [8, 64], strides = [1, 1]} : vector<8x256xf32> to vector<8x64xf32>
    %61 = vector.extract_strided_slice %33 {offsets = [0, 192], sizes = [8, 64], strides = [1, 1]} : vector<8x256xf32> to vector<8x64xf32>
    %cst_29 = arith.constant dense<0.000000e+00> : vector<64x8xf32>
    %62 = tpu.matmul %59, %60, %cst_29 {dimension_numbers = #tpu.dot_dimension_numbers<[1], [1], [0], [0], [0, 0, 1, 0], [], []>} : vector<64x64xf32>, vector<8x64xf32>, vector<64x8xf32> -> vector<64x8xf32>
    %cst_30 = arith.constant 1.250000e-01 : f32
    %63 = vector.broadcast %cst_30 : f32 to vector<64x8xf32>
    %64 = arith.mulf %62, %63 : vector<64x8xf32>
    %cst_31 = arith.constant dense<0xFF800000> : vector<64xf32>
    %65 = vector.multi_reduction <maximumf>, %64, %cst_31 [1] : vector<64x8xf32> to vector<64xf32>
    %66 = vector.shape_cast %65 : vector<64xf32> to vector<64x1xf32>
    %67 = vector.broadcast %66 : vector<64x1xf32> to vector<64x8xf32>
    %68 = arith.subf %64, %67 : vector<64x8xf32>
    %69 = math.exp %68 : vector<64x8xf32>
    %cst_32 = arith.constant dense<0.000000e+00> : vector<64xf32>
    %70 = vector.multi_reduction <add>, %69, %cst_32 [1] : vector<64x8xf32> to vector<64xf32>
    %71 = vector.shape_cast %70 : vector<64xf32> to vector<64x1xf32>
    %72 = tpu.reciprocal %71 {approx = true} : vector<64x1xf32> -> vector<64x1xf32>
    %73 = vector.broadcast %72 : vector<64x1xf32> to vector<64x8xf32>
    %74 = arith.mulf %69, %73 : vector<64x8xf32>
    %cst_33 = arith.constant dense<0.000000e+00> : vector<64x64xf32>
    %75 = tpu.matmul %74, %61, %cst_33 {dimension_numbers = #tpu.dot_dimension_numbers<[1], [0], [0], [1], [0, 0, 1, 1], [], []>} : vector<64x8xf32>, vector<8x64xf32>, vector<64x64xf32> -> vector<64x64xf32>
    %76 = arith.truncf %75 : vector<64x64xf32> to vector<64x64xbf16>
    %77 = vector.extract_strided_slice %34 {offsets = [64, 0], sizes = [64, 128], strides = [1, 1]} : vector<128x128xbf16> to vector<64x128xbf16>
    %cst_34 = arith.constant dense<0.000000e+00> : vector<64x128xf32>
    %78 = tpu.matmul %76, %77, %cst_34 {dimension_numbers = #tpu.dot_dimension_numbers<[1], [0], [0], [1], [0, 0, 1, 1], [], []>} : vector<64x64xbf16>, vector<64x128xbf16>, vector<64x128xf32> -> vector<64x128xf32>
    %79 = arith.addf %58, %78 : vector<64x128xf32>
    %c0_35 = arith.constant 0 : index
    %c0_36 = arith.constant 0 : index
    %c0_37 = arith.constant 0 : index
    %80 = vector.load %arg9[%c0_35, %c0_36, %c0_37] : memref<1x64x128xf32, #tpu.memory_space<vmem>>, vector<1x64x128xf32>
    %81 = vector.shape_cast %80 : vector<1x64x128xf32> to vector<64x128xf32>
    %82 = vector.shape_cast %79 : vector<64x128xf32> to vector<1x64x128xf32>
    tpu.vector_store %arg9[%c0_35, %c0_36, %c0_37], %82 {strides = array<i32>} : memref<1x64x128xf32, #tpu.memory_space<vmem>>, vector<1x64x128xf32>,
    return
  }
  func.func @transform_0(%arg0: i32) -> (i32, i32, i32) {
    %c0_i32 = arith.constant 0 : i32
    %c0_i32_0 = arith.constant 0 : i32
    %c0_i32_1 = arith.constant 0 : i32
    return %arg0, %c0_i32, %c0_i32_0 : i32, i32, i32
  }
  func.func @transform_1(%arg0: i32) -> (i32, i32) {
    %c0_i32 = arith.constant 0 : i32
    %c0_i32_0 = arith.constant 0 : i32
    %c0_i32_1 = arith.constant 0 : i32
    return %c0_i32, %c0_i32_0 : i32, i32
  }
  func.func @transform_2(%arg0: i32) -> (i32, i32) {
    %c0_i32 = arith.constant 0 : i32
    %c0_i32_0 = arith.constant 0 : i32
    %c0_i32_1 = arith.constant 0 : i32
    return %c0_i32, %c0_i32_0 : i32, i32
  }
  func.func @transform_3(%arg0: i32) -> (i32, i32) {
    %c0_i32 = arith.constant 0 : i32
    %c0_i32_0 = arith.constant 0 : i32
    %c0_i32_1 = arith.constant 0 : i32
    return %c0_i32, %c0_i32_0 : i32, i32
  }
  func.func @transform_4(%arg0: i32) -> (i32, i32, i32) {
    %c0_i32 = arith.constant 0 : i32
    %c0_i32_0 = arith.constant 0 : i32
    %c0_i32_1 = arith.constant 0 : i32
    return %arg0, %c0_i32, %c0_i32_0 : i32, i32, i32
  }
  func.func @transform_5(%arg0: i32) -> (i32, i32) {
    %c0_i32 = arith.constant 0 : i32
    %c0_i32_0 = arith.constant 0 : i32
    %c0_i32_1 = arith.constant 0 : i32
    return %c0_i32, %c0_i32_0 : i32, i32
  }
  func.func @transform_6(%arg0: i32) -> (i32, i32) {
    %c0_i32 = arith.constant 0 : i32
    %c0_i32_0 = arith.constant 0 : i32
    %c0_i32_1 = arith.constant 0 : i32
    return %c0_i32, %c0_i32_0 : i32, i32
  }
  func.func @transform_7(%arg0: i32) -> (i32, i32) {
    %c0_i32 = arith.constant 0 : i32
    %c0_i32_0 = arith.constant 0 : i32
    %c0_i32_1 = arith.constant 0 : i32
    return %c0_i32, %c0_i32_0 : i32, i32
  }
  func.func @transform_8(%arg0: i32) -> (i32, i32, i32) {
    %c0_i32 = arith.constant 0 : i32
    %c0_i32_0 = arith.constant 0 : i32
    %c0_i32_1 = arith.constant 0 : i32
    return %arg0, %c0_i32, %c0_i32_0 : i32, i32, i32
  }
}

module attributes {stable_mosaic.version = 11 : i64} {
  func.func @_ln_ff_proj_out_kernel(%arg0: i32, %arg1: memref<128x128xf32, #tpu.memory_space<vmem>>, %arg2: memref<1x128xf32, #tpu.memory_space<vmem>>, %arg3: memref<1x128xf32, #tpu.memory_space<vmem>>, %arg4: memref<128x512xbf16, #tpu.memory_space<vmem>>, %arg5: memref<1x512xf32, #tpu.memory_space<vmem>>, %arg6: memref<128x512xbf16, #tpu.memory_space<vmem>>, %arg7: memref<1x512xf32, #tpu.memory_space<vmem>>, %arg8: memref<512x128xbf16, #tpu.memory_space<vmem>>, %arg9: memref<1x128xf32, #tpu.memory_space<vmem>>, %arg10: memref<128x64xbf16, #tpu.memory_space<vmem>>, %arg11: memref<1x64xf32, #tpu.memory_space<vmem>>, %arg12: memref<128x64xf32, #tpu.memory_space<vmem>>, %arg13: memref<128x64xf32, #tpu.memory_space<vmem>>) attributes {dimension_semantics = [#tpu.dimension_semantics<parallel>], iteration_bounds = array<i64: 1>, scalar_prefetch = 0 : i64, scratch_operands = 0 : i64, tpu.core_type = #tpu.core_type<tc>, window_params = [{transform_indices = @transform_0, window_bounds = array<i64: 128, 128>}, {pipeline_mode = #tpu.pipeline_mode<synchronous>, transform_indices = @transform_1, window_bounds = array<i64: 1, 128>}, {pipeline_mode = #tpu.pipeline_mode<synchronous>, transform_indices = @transform_2, window_bounds = array<i64: 1, 128>}, {pipeline_mode = #tpu.pipeline_mode<synchronous>, transform_indices = @transform_3, window_bounds = array<i64: 128, 512>}, {pipeline_mode = #tpu.pipeline_mode<synchronous>, transform_indices = @transform_4, window_bounds = array<i64: 1, 512>}, {pipeline_mode = #tpu.pipeline_mode<synchronous>, transform_indices = @transform_5, window_bounds = array<i64: 128, 512>}, {pipeline_mode = #tpu.pipeline_mode<synchronous>, transform_indices = @transform_6, window_bounds = array<i64: 1, 512>}, {pipeline_mode = #tpu.pipeline_mode<synchronous>, transform_indices = @transform_7, window_bounds = array<i64: 512, 128>}, {pipeline_mode = #tpu.pipeline_mode<synchronous>, transform_indices = @transform_8, window_bounds = array<i64: 1, 128>}, {pipeline_mode = #tpu.pipeline_mode<synchronous>, transform_indices = @transform_9, window_bounds = array<i64: 128, 64>}, {pipeline_mode = #tpu.pipeline_mode<synchronous>, transform_indices = @transform_10, window_bounds = array<i64: 1, 64>}, {transform_indices = @transform_11, window_bounds = array<i64: 128, 64>}, {transform_indices = @transform_12, window_bounds = array<i64: 128, 64>}]} {
    %c0 = arith.constant 0 : index
    %c0_0 = arith.constant 0 : index
    %0 = vector.load %arg1[%c0, %c0_0] : memref<128x128xf32, #tpu.memory_space<vmem>>, vector<128x128xf32>
    %cst = arith.constant dense<0.000000e+00> : vector<128xf32>
    %1 = vector.multi_reduction <add>, %0, %cst [1] : vector<128x128xf32> to vector<128xf32>
    %2 = vector.shape_cast %1 : vector<128xf32> to vector<128x1xf32>
    %cst_1 = arith.constant 1.280000e+02 : f32
    %3 = vector.broadcast %cst_1 : f32 to vector<128x1xf32>
    %4 = arith.divf %2, %3 : vector<128x1xf32>
    %5 = vector.broadcast %4 : vector<128x1xf32> to vector<128x128xf32>
    %6 = arith.subf %0, %5 : vector<128x128xf32>
    %7 = arith.mulf %6, %6 : vector<128x128xf32>
    %cst_2 = arith.constant dense<0.000000e+00> : vector<128xf32>
    %8 = vector.multi_reduction <add>, %7, %cst_2 [1] : vector<128x128xf32> to vector<128xf32>
    %9 = vector.shape_cast %8 : vector<128xf32> to vector<128x1xf32>
    %cst_3 = arith.constant 1.280000e+02 : f32
    %10 = vector.broadcast %cst_3 : f32 to vector<128x1xf32>
    %11 = arith.divf %9, %10 : vector<128x1xf32>
    %12 = vector.broadcast %4 : vector<128x1xf32> to vector<128x128xf32>
    %13 = arith.subf %0, %12 : vector<128x128xf32>
    %cst_4 = arith.constant 9.99999974E-6 : f32
    %14 = vector.broadcast %cst_4 : f32 to vector<128x1xf32>
    %15 = arith.addf %11, %14 : vector<128x1xf32>
    %16 = math.rsqrt %15 : vector<128x1xf32>
    %17 = vector.broadcast %16 : vector<128x1xf32> to vector<128x128xf32>
    %18 = arith.mulf %13, %17 : vector<128x128xf32>
    %c0_5 = arith.constant 0 : index
    %c0_6 = arith.constant 0 : index
    %19 = vector.load %arg2[%c0_5, %c0_6] : memref<1x128xf32, #tpu.memory_space<vmem>>, vector<1x128xf32>
    %20 = vector.broadcast %19 : vector<1x128xf32> to vector<128x128xf32>
    %21 = arith.mulf %18, %20 : vector<128x128xf32>
    %c0_7 = arith.constant 0 : index
    %c0_8 = arith.constant 0 : index
    %22 = vector.load %arg3[%c0_7, %c0_8] : memref<1x128xf32, #tpu.memory_space<vmem>>, vector<1x128xf32>
    %23 = vector.broadcast %22 : vector<1x128xf32> to vector<128x128xf32>
    %24 = arith.addf %21, %23 : vector<128x128xf32>
    %25 = arith.truncf %24 : vector<128x128xf32> to vector<128x128xbf16>
    %c0_9 = arith.constant 0 : index
    %c0_10 = arith.constant 0 : index
    %26 = vector.load %arg4[%c0_9, %c0_10] : memref<128x512xbf16, #tpu.memory_space<vmem>>, vector<128x512xbf16>
    %cst_11 = arith.constant dense<0.000000e+00> : vector<128x512xf32>
    %27 = tpu.matmul %25, %26, %cst_11 {dimension_numbers = #tpu.dot_dimension_numbers<[1], [0], [0], [1], [0, 0, 1, 1], [], []>} : vector<128x128xbf16>, vector<128x512xbf16>, vector<128x512xf32> -> vector<128x512xf32>
    %c0_12 = arith.constant 0 : index
    %c0_13 = arith.constant 0 : index
    %28 = vector.load %arg5[%c0_12, %c0_13] : memref<1x512xf32, #tpu.memory_space<vmem>>, vector<1x512xf32>
    %29 = vector.broadcast %28 : vector<1x512xf32> to vector<128x512xf32>
    %30 = arith.addf %27, %29 : vector<128x512xf32>
    %c0_14 = arith.constant 0 : index
    %c0_15 = arith.constant 0 : index
    %31 = vector.load %arg6[%c0_14, %c0_15] : memref<128x512xbf16, #tpu.memory_space<vmem>>, vector<128x512xbf16>
    %cst_16 = arith.constant dense<0.000000e+00> : vector<128x512xf32>
    %32 = tpu.matmul %25, %31, %cst_16 {dimension_numbers = #tpu.dot_dimension_numbers<[1], [0], [0], [1], [0, 0, 1, 1], [], []>} : vector<128x128xbf16>, vector<128x512xbf16>, vector<128x512xf32> -> vector<128x512xf32>
    %c0_17 = arith.constant 0 : index
    %c0_18 = arith.constant 0 : index
    %33 = vector.load %arg7[%c0_17, %c0_18] : memref<1x512xf32, #tpu.memory_space<vmem>>, vector<1x512xf32>
    %34 = vector.broadcast %33 : vector<1x512xf32> to vector<128x512xf32>
    %35 = arith.addf %32, %34 : vector<128x512xf32>
    %cst_19 = arith.constant 5.000000e-01 : f32
    %36 = vector.broadcast %cst_19 : f32 to vector<128x512xf32>
    %37 = arith.mulf %36, %35 : vector<128x512xf32>
    %cst_20 = arith.constant 0.707106769 : f32
    %38 = vector.broadcast %cst_20 : f32 to vector<128x512xf32>
    %39 = arith.mulf %35, %38 : vector<128x512xf32>
    %40 = math.erf %39 : vector<128x512xf32>
    %cst_21 = arith.constant 1.000000e+00 : f32
    %41 = vector.broadcast %cst_21 : f32 to vector<128x512xf32>
    %42 = arith.addf %41, %40 : vector<128x512xf32>
    %43 = arith.mulf %37, %42 : vector<128x512xf32>
    %44 = arith.mulf %30, %43 : vector<128x512xf32>
    %45 = arith.truncf %44 : vector<128x512xf32> to vector<128x512xbf16>
    %c0_22 = arith.constant 0 : index
    %c0_23 = arith.constant 0 : index
    %46 = vector.load %arg8[%c0_22, %c0_23] : memref<512x128xbf16, #tpu.memory_space<vmem>>, vector<512x128xbf16>
    %cst_24 = arith.constant dense<0.000000e+00> : vector<128x128xf32>
    %47 = tpu.matmul %45, %46, %cst_24 {dimension_numbers = #tpu.dot_dimension_numbers<[1], [0], [0], [1], [0, 0, 1, 1], [], []>} : vector<128x512xbf16>, vector<512x128xbf16>, vector<128x128xf32> -> vector<128x128xf32>
    %c0_25 = arith.constant 0 : index
    %c0_26 = arith.constant 0 : index
    %48 = vector.load %arg9[%c0_25, %c0_26] : memref<1x128xf32, #tpu.memory_space<vmem>>, vector<1x128xf32>
    %49 = vector.broadcast %48 : vector<1x128xf32> to vector<128x128xf32>
    %50 = arith.addf %47, %49 : vector<128x128xf32>
    %51 = arith.addf %50, %0 : vector<128x128xf32>
    %52 = arith.truncf %51 : vector<128x128xf32> to vector<128x128xbf16>
    %c0_27 = arith.constant 0 : index
    %c0_28 = arith.constant 0 : index
    %53 = vector.load %arg10[%c0_27, %c0_28] : memref<128x64xbf16, #tpu.memory_space<vmem>>, vector<128x64xbf16>
    %cst_29 = arith.constant dense<0.000000e+00> : vector<128x64xf32>
    %54 = tpu.matmul %52, %53, %cst_29 {dimension_numbers = #tpu.dot_dimension_numbers<[1], [0], [0], [1], [0, 0, 1, 1], [], []>} : vector<128x128xbf16>, vector<128x64xbf16>, vector<128x64xf32> -> vector<128x64xf32>
    %c0_30 = arith.constant 0 : index
    %c0_31 = arith.constant 0 : index
    %55 = vector.load %arg11[%c0_30, %c0_31] : memref<1x64xf32, #tpu.memory_space<vmem>>, vector<1x64xf32>
    %56 = vector.broadcast %55 : vector<1x64xf32> to vector<128x64xf32>
    %57 = arith.addf %54, %56 : vector<128x64xf32>
    %c0_32 = arith.constant 0 : index
    %c0_33 = arith.constant 0 : index
    %58 = vector.load %arg12[%c0_32, %c0_33] : memref<128x64xf32, #tpu.memory_space<vmem>>, vector<128x64xf32>
    %59 = arith.addf %57, %58 : vector<128x64xf32>
    %c0_34 = arith.constant 0 : index
    %c0_35 = arith.constant 0 : index
    %60 = vector.load %arg13[%c0_34, %c0_35] : memref<128x64xf32, #tpu.memory_space<vmem>>, vector<128x64xf32>
    tpu.vector_store %arg13[%c0_34, %c0_35], %59 {strides = array<i32>} : memref<128x64xf32, #tpu.memory_space<vmem>>, vector<128x64xf32>,
    return
  }
  func.func @transform_0(%arg0: i32) -> (i32, i32) {
    %c0_i32 = arith.constant 0 : i32
    %c0_i32_0 = arith.constant 0 : i32
    return %arg0, %c0_i32 : i32, i32
  }
  func.func @transform_1(%arg0: i32) -> (i32, i32) {
    %c0_i32 = arith.constant 0 : i32
    %c0_i32_0 = arith.constant 0 : i32
    %c0_i32_1 = arith.constant 0 : i32
    return %c0_i32, %c0_i32_0 : i32, i32
  }
  func.func @transform_2(%arg0: i32) -> (i32, i32) {
    %c0_i32 = arith.constant 0 : i32
    %c0_i32_0 = arith.constant 0 : i32
    %c0_i32_1 = arith.constant 0 : i32
    return %c0_i32, %c0_i32_0 : i32, i32
  }
  func.func @transform_3(%arg0: i32) -> (i32, i32) {
    %c0_i32 = arith.constant 0 : i32
    %c0_i32_0 = arith.constant 0 : i32
    %c0_i32_1 = arith.constant 0 : i32
    return %c0_i32, %c0_i32_0 : i32, i32
  }
  func.func @transform_4(%arg0: i32) -> (i32, i32) {
    %c0_i32 = arith.constant 0 : i32
    %c0_i32_0 = arith.constant 0 : i32
    %c0_i32_1 = arith.constant 0 : i32
    return %c0_i32, %c0_i32_0 : i32, i32
  }
  func.func @transform_5(%arg0: i32) -> (i32, i32) {
    %c0_i32 = arith.constant 0 : i32
    %c0_i32_0 = arith.constant 0 : i32
    %c0_i32_1 = arith.constant 0 : i32
    return %c0_i32, %c0_i32_0 : i32, i32
  }
  func.func @transform_6(%arg0: i32) -> (i32, i32) {
    %c0_i32 = arith.constant 0 : i32
    %c0_i32_0 = arith.constant 0 : i32
    %c0_i32_1 = arith.constant 0 : i32
    return %c0_i32, %c0_i32_0 : i32, i32
  }
  func.func @transform_7(%arg0: i32) -> (i32, i32) {
    %c0_i32 = arith.constant 0 : i32
    %c0_i32_0 = arith.constant 0 : i32
    %c0_i32_1 = arith.constant 0 : i32
    return %c0_i32, %c0_i32_0 : i32, i32
  }
  func.func @transform_8(%arg0: i32) -> (i32, i32) {
    %c0_i32 = arith.constant 0 : i32
    %c0_i32_0 = arith.constant 0 : i32
    %c0_i32_1 = arith.constant 0 : i32
    return %c0_i32, %c0_i32_0 : i32, i32
  }
  func.func @transform_9(%arg0: i32) -> (i32, i32) {
    %c0_i32 = arith.constant 0 : i32
    %c0_i32_0 = arith.constant 0 : i32
    %c0_i32_1 = arith.constant 0 : i32
    return %c0_i32, %c0_i32_0 : i32, i32
  }
  func.func @transform_10(%arg0: i32) -> (i32, i32) {
    %c0_i32 = arith.constant 0 : i32
    %c0_i32_0 = arith.constant 0 : i32
    %c0_i32_1 = arith.constant 0 : i32
    return %c0_i32, %c0_i32_0 : i32, i32
  }
  func.func @transform_11(%arg0: i32) -> (i32, i32) {
    %c0_i32 = arith.constant 0 : i32
    %c0_i32_0 = arith.constant 0 : i32
    return %arg0, %c0_i32 : i32, i32
  }
  func.func @transform_12(%arg0: i32) -> (i32, i32) {
    %c0_i32 = arith.constant 0 : i32
    %c0_i32_0 = arith.constant 0 : i32
    return %arg0, %c0_i32 : i32, i32
  }
}

module attributes {stable_mosaic.version = 11 : i64} {
  func.func @_gn_proj_attn1_kernel(%arg0: i32, %arg1: memref<1x64x64xf32, #tpu.memory_space<vmem>>, %arg2: memref<64x64xf32, #tpu.memory_space<vmem>>, %arg3: memref<1x64xf32, #tpu.memory_space<vmem>>, %arg4: memref<1x64xf32, #tpu.memory_space<vmem>>, %arg5: memref<64x128xbf16, #tpu.memory_space<vmem>>, %arg6: memref<1x128xf32, #tpu.memory_space<vmem>>, %arg7: memref<64x128xf32, #tpu.memory_space<vmem>>, %arg8: memref<1x128xf32, #tpu.memory_space<vmem>>, %arg9: memref<1x128xf32, #tpu.memory_space<vmem>>, %arg10: memref<128x128xbf16, #tpu.memory_space<vmem>>, %arg11: memref<128x256xbf16, #tpu.memory_space<vmem>>, %arg12: memref<128x128xbf16, #tpu.memory_space<vmem>>, %arg13: memref<1x128xf32, #tpu.memory_space<vmem>>, %arg14: memref<1x64x128xf32, #tpu.memory_space<vmem>>) attributes {dimension_semantics = [#tpu.dimension_semantics<parallel>], iteration_bounds = array<i64: 2>, scalar_prefetch = 0 : i64, scratch_operands = 0 : i64, tpu.core_type = #tpu.core_type<tc>, window_params = [{transform_indices = @transform_0, window_bounds = array<i64: 1, 64, 64>}, {pipeline_mode = #tpu.pipeline_mode<synchronous>, transform_indices = @transform_1, window_bounds = array<i64: 64, 64>}, {pipeline_mode = #tpu.pipeline_mode<synchronous>, transform_indices = @transform_2, window_bounds = array<i64: 1, 64>}, {pipeline_mode = #tpu.pipeline_mode<synchronous>, transform_indices = @transform_3, window_bounds = array<i64: 1, 64>}, {pipeline_mode = #tpu.pipeline_mode<synchronous>, transform_indices = @transform_4, window_bounds = array<i64: 64, 128>}, {pipeline_mode = #tpu.pipeline_mode<synchronous>, transform_indices = @transform_5, window_bounds = array<i64: 1, 128>}, {pipeline_mode = #tpu.pipeline_mode<synchronous>, transform_indices = @transform_6, window_bounds = array<i64: 64, 128>}, {pipeline_mode = #tpu.pipeline_mode<synchronous>, transform_indices = @transform_7, window_bounds = array<i64: 1, 128>}, {pipeline_mode = #tpu.pipeline_mode<synchronous>, transform_indices = @transform_8, window_bounds = array<i64: 1, 128>}, {pipeline_mode = #tpu.pipeline_mode<synchronous>, transform_indices = @transform_9, window_bounds = array<i64: 128, 128>}, {pipeline_mode = #tpu.pipeline_mode<synchronous>, transform_indices = @transform_10, window_bounds = array<i64: 128, 256>}, {pipeline_mode = #tpu.pipeline_mode<synchronous>, transform_indices = @transform_11, window_bounds = array<i64: 128, 128>}, {pipeline_mode = #tpu.pipeline_mode<synchronous>, transform_indices = @transform_12, window_bounds = array<i64: 1, 128>}, {transform_indices = @transform_13, window_bounds = array<i64: 1, 64, 128>}]} {
    %c0 = arith.constant 0 : index
    %c0_0 = arith.constant 0 : index
    %c0_1 = arith.constant 0 : index
    %0 = vector.load %arg1[%c0, %c0_0, %c0_1] : memref<1x64x64xf32, #tpu.memory_space<vmem>>, vector<1x64x64xf32>
    %1 = vector.shape_cast %0 : vector<1x64x64xf32> to vector<64x64xf32>
    %cst = arith.constant dense<0.000000e+00> : vector<64xf32>
    %2 = vector.multi_reduction <add>, %1, %cst [0] : vector<64x64xf32> to vector<64xf32>
    %3 = vector.shape_cast %2 : vector<64xf32> to vector<1x64xf32>
    %cst_2 = arith.constant 6.400000e+01 : f32
    %4 = vector.broadcast %cst_2 : f32 to vector<1x64xf32>
    %5 = arith.divf %3, %4 : vector<1x64xf32>
    %c0_3 = arith.constant 0 : index
    %c0_4 = arith.constant 0 : index
    %6 = vector.load %arg2[%c0_3, %c0_4] : memref<64x64xf32, #tpu.memory_space<vmem>>, vector<64x64xf32>
    %cst_5 = arith.constant dense<0.000000e+00> : vector<1x64xf32>
    %7 = tpu.matmul %5, %6, %cst_5 {dimension_numbers = #tpu.dot_dimension_numbers<[1], [0], [0], [1], [0, 0, 1, 1], [], []>} : vector<1x64xf32>, vector<64x64xf32>, vector<1x64xf32> -> vector<1x64xf32>
    %8 = vector.broadcast %7 : vector<1x64xf32> to vector<64x64xf32>
    %9 = arith.subf %1, %8 : vector<64x64xf32>
    %10 = arith.mulf %9, %9 : vector<64x64xf32>
    %cst_6 = arith.constant dense<0.000000e+00> : vector<64xf32>
    %11 = vector.multi_reduction <add>, %10, %cst_6 [0] : vector<64x64xf32> to vector<64xf32>
    %12 = vector.shape_cast %11 : vector<64xf32> to vector<1x64xf32>
    %cst_7 = arith.constant 6.400000e+01 : f32
    %13 = vector.broadcast %cst_7 : f32 to vector<1x64xf32>
    %14 = arith.divf %12, %13 : vector<1x64xf32>
    %c0_8 = arith.constant 0 : index
    %c0_9 = arith.constant 0 : index
    %15 = vector.load %arg2[%c0_8, %c0_9] : memref<64x64xf32, #tpu.memory_space<vmem>>, vector<64x64xf32>
    %cst_10 = arith.constant dense<0.000000e+00> : vector<1x64xf32>
    %16 = tpu.matmul %14, %15, %cst_10 {dimension_numbers = #tpu.dot_dimension_numbers<[1], [0], [0], [1], [0, 0, 1, 1], [], []>} : vector<1x64xf32>, vector<64x64xf32>, vector<1x64xf32> -> vector<1x64xf32>
    %cst_11 = arith.constant 9.99999997E-7 : f32
    %17 = vector.broadcast %cst_11 : f32 to vector<1x64xf32>
    %18 = arith.addf %16, %17 : vector<1x64xf32>
    %19 = math.rsqrt %18 : vector<1x64xf32>
    %20 = vector.broadcast %19 : vector<1x64xf32> to vector<64x64xf32>
    %21 = arith.mulf %9, %20 : vector<64x64xf32>
    %c0_12 = arith.constant 0 : index
    %c0_13 = arith.constant 0 : index
    %22 = vector.load %arg3[%c0_12, %c0_13] : memref<1x64xf32, #tpu.memory_space<vmem>>, vector<1x64xf32>
    %23 = vector.broadcast %22 : vector<1x64xf32> to vector<64x64xf32>
    %24 = arith.mulf %21, %23 : vector<64x64xf32>
    %c0_14 = arith.constant 0 : index
    %c0_15 = arith.constant 0 : index
    %25 = vector.load %arg4[%c0_14, %c0_15] : memref<1x64xf32, #tpu.memory_space<vmem>>, vector<1x64xf32>
    %26 = vector.broadcast %25 : vector<1x64xf32> to vector<64x64xf32>
    %27 = arith.addf %24, %26 : vector<64x64xf32>
    %28 = arith.truncf %27 : vector<64x64xf32> to vector<64x64xbf16>
    %c0_16 = arith.constant 0 : index
    %c0_17 = arith.constant 0 : index
    %29 = vector.load %arg5[%c0_16, %c0_17] : memref<64x128xbf16, #tpu.memory_space<vmem>>, vector<64x128xbf16>
    %cst_18 = arith.constant dense<0.000000e+00> : vector<64x128xf32>
    %30 = tpu.matmul %28, %29, %cst_18 {dimension_numbers = #tpu.dot_dimension_numbers<[1], [0], [0], [1], [0, 0, 1, 1], [], []>} : vector<64x64xbf16>, vector<64x128xbf16>, vector<64x128xf32> -> vector<64x128xf32>
    %c0_19 = arith.constant 0 : index
    %c0_20 = arith.constant 0 : index
    %31 = vector.load %arg6[%c0_19, %c0_20] : memref<1x128xf32, #tpu.memory_space<vmem>>, vector<1x128xf32>
    %32 = vector.broadcast %31 : vector<1x128xf32> to vector<64x128xf32>
    %33 = arith.addf %30, %32 : vector<64x128xf32>
    %c0_21 = arith.constant 0 : index
    %c0_22 = arith.constant 0 : index
    %34 = vector.load %arg7[%c0_21, %c0_22] : memref<64x128xf32, #tpu.memory_space<vmem>>, vector<64x128xf32>
    %35 = arith.addf %33, %34 : vector<64x128xf32>
    %cst_23 = arith.constant dense<0.000000e+00> : vector<64xf32>
    %36 = vector.multi_reduction <add>, %35, %cst_23 [1] : vector<64x128xf32> to vector<64xf32>
    %37 = vector.shape_cast %36 : vector<64xf32> to vector<64x1xf32>
    %cst_24 = arith.constant 1.280000e+02 : f32
    %38 = vector.broadcast %cst_24 : f32 to vector<64x1xf32>
    %39 = arith.divf %37, %38 : vector<64x1xf32>
    %40 = vector.broadcast %39 : vector<64x1xf32> to vector<64x128xf32>
    %41 = arith.subf %35, %40 : vector<64x128xf32>
    %42 = arith.mulf %41, %41 : vector<64x128xf32>
    %cst_25 = arith.constant dense<0.000000e+00> : vector<64xf32>
    %43 = vector.multi_reduction <add>, %42, %cst_25 [1] : vector<64x128xf32> to vector<64xf32>
    %44 = vector.shape_cast %43 : vector<64xf32> to vector<64x1xf32>
    %cst_26 = arith.constant 1.280000e+02 : f32
    %45 = vector.broadcast %cst_26 : f32 to vector<64x1xf32>
    %46 = arith.divf %44, %45 : vector<64x1xf32>
    %47 = vector.broadcast %39 : vector<64x1xf32> to vector<64x128xf32>
    %48 = arith.subf %35, %47 : vector<64x128xf32>
    %cst_27 = arith.constant 9.99999974E-6 : f32
    %49 = vector.broadcast %cst_27 : f32 to vector<64x1xf32>
    %50 = arith.addf %46, %49 : vector<64x1xf32>
    %51 = math.rsqrt %50 : vector<64x1xf32>
    %52 = vector.broadcast %51 : vector<64x1xf32> to vector<64x128xf32>
    %53 = arith.mulf %48, %52 : vector<64x128xf32>
    %c0_28 = arith.constant 0 : index
    %c0_29 = arith.constant 0 : index
    %54 = vector.load %arg8[%c0_28, %c0_29] : memref<1x128xf32, #tpu.memory_space<vmem>>, vector<1x128xf32>
    %55 = vector.broadcast %54 : vector<1x128xf32> to vector<64x128xf32>
    %56 = arith.mulf %53, %55 : vector<64x128xf32>
    %c0_30 = arith.constant 0 : index
    %c0_31 = arith.constant 0 : index
    %57 = vector.load %arg9[%c0_30, %c0_31] : memref<1x128xf32, #tpu.memory_space<vmem>>, vector<1x128xf32>
    %58 = vector.broadcast %57 : vector<1x128xf32> to vector<64x128xf32>
    %59 = arith.addf %56, %58 : vector<64x128xf32>
    %60 = arith.truncf %59 : vector<64x128xf32> to vector<64x128xbf16>
    %c0_32 = arith.constant 0 : index
    %c0_33 = arith.constant 0 : index
    %61 = vector.load %arg10[%c0_32, %c0_33] : memref<128x128xbf16, #tpu.memory_space<vmem>>, vector<128x128xbf16>
    %cst_34 = arith.constant dense<0.000000e+00> : vector<64x128xf32>
    %62 = tpu.matmul %60, %61, %cst_34 {dimension_numbers = #tpu.dot_dimension_numbers<[1], [0], [0], [1], [0, 0, 1, 1], [], []>} : vector<64x128xbf16>, vector<128x128xbf16>, vector<64x128xf32> -> vector<64x128xf32>
    %c0_35 = arith.constant 0 : index
    %c0_36 = arith.constant 0 : index
    %63 = vector.load %arg11[%c0_35, %c0_36] : memref<128x256xbf16, #tpu.memory_space<vmem>>, vector<128x256xbf16>
    %cst_37 = arith.constant dense<0.000000e+00> : vector<64x256xf32>
    %64 = tpu.matmul %60, %63, %cst_37 {dimension_numbers = #tpu.dot_dimension_numbers<[1], [0], [0], [1], [0, 0, 1, 1], [], []>} : vector<64x128xbf16>, vector<128x256xbf16>, vector<64x256xf32> -> vector<64x256xf32>
    %c0_38 = arith.constant 0 : index
    %c0_39 = arith.constant 0 : index
    %65 = vector.load %arg12[%c0_38, %c0_39] : memref<128x128xbf16, #tpu.memory_space<vmem>>, vector<128x128xbf16>
    %c0_40 = arith.constant 0 : index
    %c0_41 = arith.constant 0 : index
    %66 = vector.load %arg13[%c0_40, %c0_41] : memref<1x128xf32, #tpu.memory_space<vmem>>, vector<1x128xf32>
    %67 = vector.broadcast %66 : vector<1x128xf32> to vector<64x128xf32>
    %68 = arith.addf %35, %67 : vector<64x128xf32>
    %69 = vector.extract_strided_slice %62 {offsets = [0, 0], sizes = [64, 64], strides = [1, 1]} : vector<64x128xf32> to vector<64x64xf32>
    %70 = vector.extract_strided_slice %64 {offsets = [0, 0], sizes = [64, 64], strides = [1, 1]} : vector<64x256xf32> to vector<64x64xf32>
    %71 = vector.extract_strided_slice %64 {offsets = [0, 128], sizes = [64, 64], strides = [1, 1]} : vector<64x256xf32> to vector<64x64xf32>
    %cst_42 = arith.constant dense<0.000000e+00> : vector<64x64xf32>
    %72 = tpu.matmul %69, %70, %cst_42 {dimension_numbers = #tpu.dot_dimension_numbers<[1], [1], [0], [0], [0, 0, 1, 0], [], []>} : vector<64x64xf32>, vector<64x64xf32>, vector<64x64xf32> -> vector<64x64xf32>
    %cst_43 = arith.constant 1.250000e-01 : f32
    %73 = vector.broadcast %cst_43 : f32 to vector<64x64xf32>
    %74 = arith.mulf %72, %73 : vector<64x64xf32>
    %cst_44 = arith.constant dense<0xFF800000> : vector<64xf32>
    %75 = vector.multi_reduction <maximumf>, %74, %cst_44 [1] : vector<64x64xf32> to vector<64xf32>
    %76 = vector.shape_cast %75 : vector<64xf32> to vector<64x1xf32>
    %77 = vector.broadcast %76 : vector<64x1xf32> to vector<64x64xf32>
    %78 = arith.subf %74, %77 : vector<64x64xf32>
    %79 = math.exp %78 : vector<64x64xf32>
    %cst_45 = arith.constant dense<0.000000e+00> : vector<64xf32>
    %80 = vector.multi_reduction <add>, %79, %cst_45 [1] : vector<64x64xf32> to vector<64xf32>
    %81 = vector.shape_cast %80 : vector<64xf32> to vector<64x1xf32>
    %82 = tpu.reciprocal %81 {approx = true} : vector<64x1xf32> -> vector<64x1xf32>
    %83 = vector.broadcast %82 : vector<64x1xf32> to vector<64x64xf32>
    %84 = arith.mulf %79, %83 : vector<64x64xf32>
    %cst_46 = arith.constant dense<0.000000e+00> : vector<64x64xf32>
    %85 = tpu.matmul %84, %71, %cst_46 {dimension_numbers = #tpu.dot_dimension_numbers<[1], [0], [0], [1], [0, 0, 1, 1], [], []>} : vector<64x64xf32>, vector<64x64xf32>, vector<64x64xf32> -> vector<64x64xf32>
    %86 = arith.truncf %85 : vector<64x64xf32> to vector<64x64xbf16>
    %87 = vector.extract_strided_slice %65 {offsets = [0, 0], sizes = [64, 128], strides = [1, 1]} : vector<128x128xbf16> to vector<64x128xbf16>
    %cst_47 = arith.constant dense<0.000000e+00> : vector<64x128xf32>
    %88 = tpu.matmul %86, %87, %cst_47 {dimension_numbers = #tpu.dot_dimension_numbers<[1], [0], [0], [1], [0, 0, 1, 1], [], []>} : vector<64x64xbf16>, vector<64x128xbf16>, vector<64x128xf32> -> vector<64x128xf32>
    %89 = arith.addf %68, %88 : vector<64x128xf32>
    %90 = vector.extract_strided_slice %62 {offsets = [0, 64], sizes = [64, 64], strides = [1, 1]} : vector<64x128xf32> to vector<64x64xf32>
    %91 = vector.extract_strided_slice %64 {offsets = [0, 64], sizes = [64, 64], strides = [1, 1]} : vector<64x256xf32> to vector<64x64xf32>
    %92 = vector.extract_strided_slice %64 {offsets = [0, 192], sizes = [64, 64], strides = [1, 1]} : vector<64x256xf32> to vector<64x64xf32>
    %cst_48 = arith.constant dense<0.000000e+00> : vector<64x64xf32>
    %93 = tpu.matmul %90, %91, %cst_48 {dimension_numbers = #tpu.dot_dimension_numbers<[1], [1], [0], [0], [0, 0, 1, 0], [], []>} : vector<64x64xf32>, vector<64x64xf32>, vector<64x64xf32> -> vector<64x64xf32>
    %cst_49 = arith.constant 1.250000e-01 : f32
    %94 = vector.broadcast %cst_49 : f32 to vector<64x64xf32>
    %95 = arith.mulf %93, %94 : vector<64x64xf32>
    %cst_50 = arith.constant dense<0xFF800000> : vector<64xf32>
    %96 = vector.multi_reduction <maximumf>, %95, %cst_50 [1] : vector<64x64xf32> to vector<64xf32>
    %97 = vector.shape_cast %96 : vector<64xf32> to vector<64x1xf32>
    %98 = vector.broadcast %97 : vector<64x1xf32> to vector<64x64xf32>
    %99 = arith.subf %95, %98 : vector<64x64xf32>
    %100 = math.exp %99 : vector<64x64xf32>
    %cst_51 = arith.constant dense<0.000000e+00> : vector<64xf32>
    %101 = vector.multi_reduction <add>, %100, %cst_51 [1] : vector<64x64xf32> to vector<64xf32>
    %102 = vector.shape_cast %101 : vector<64xf32> to vector<64x1xf32>
    %103 = tpu.reciprocal %102 {approx = true} : vector<64x1xf32> -> vector<64x1xf32>
    %104 = vector.broadcast %103 : vector<64x1xf32> to vector<64x64xf32>
    %105 = arith.mulf %100, %104 : vector<64x64xf32>
    %cst_52 = arith.constant dense<0.000000e+00> : vector<64x64xf32>
    %106 = tpu.matmul %105, %92, %cst_52 {dimension_numbers = #tpu.dot_dimension_numbers<[1], [0], [0], [1], [0, 0, 1, 1], [], []>} : vector<64x64xf32>, vector<64x64xf32>, vector<64x64xf32> -> vector<64x64xf32>
    %107 = arith.truncf %106 : vector<64x64xf32> to vector<64x64xbf16>
    %108 = vector.extract_strided_slice %65 {offsets = [64, 0], sizes = [64, 128], strides = [1, 1]} : vector<128x128xbf16> to vector<64x128xbf16>
    %cst_53 = arith.constant dense<0.000000e+00> : vector<64x128xf32>
    %109 = tpu.matmul %107, %108, %cst_53 {dimension_numbers = #tpu.dot_dimension_numbers<[1], [0], [0], [1], [0, 0, 1, 1], [], []>} : vector<64x64xbf16>, vector<64x128xbf16>, vector<64x128xf32> -> vector<64x128xf32>
    %110 = arith.addf %89, %109 : vector<64x128xf32>
    %c0_54 = arith.constant 0 : index
    %c0_55 = arith.constant 0 : index
    %c0_56 = arith.constant 0 : index
    %111 = vector.load %arg14[%c0_54, %c0_55, %c0_56] : memref<1x64x128xf32, #tpu.memory_space<vmem>>, vector<1x64x128xf32>
    %112 = vector.shape_cast %111 : vector<1x64x128xf32> to vector<64x128xf32>
    %113 = vector.shape_cast %110 : vector<64x128xf32> to vector<1x64x128xf32>
    tpu.vector_store %arg14[%c0_54, %c0_55, %c0_56], %113 {strides = array<i32>} : memref<1x64x128xf32, #tpu.memory_space<vmem>>, vector<1x64x128xf32>,
    return
  }
  func.func @transform_0(%arg0: i32) -> (i32, i32, i32) {
    %c0_i32 = arith.constant 0 : i32
    %c0_i32_0 = arith.constant 0 : i32
    %c0_i32_1 = arith.constant 0 : i32
    return %arg0, %c0_i32, %c0_i32_0 : i32, i32, i32
  }
  func.func @transform_1(%arg0: i32) -> (i32, i32) {
    %c0_i32 = arith.constant 0 : i32
    %c0_i32_0 = arith.constant 0 : i32
    %c0_i32_1 = arith.constant 0 : i32
    return %c0_i32, %c0_i32_0 : i32, i32
  }
  func.func @transform_2(%arg0: i32) -> (i32, i32) {
    %c0_i32 = arith.constant 0 : i32
    %c0_i32_0 = arith.constant 0 : i32
    %c0_i32_1 = arith.constant 0 : i32
    return %c0_i32, %c0_i32_0 : i32, i32
  }
  func.func @transform_3(%arg0: i32) -> (i32, i32) {
    %c0_i32 = arith.constant 0 : i32
    %c0_i32_0 = arith.constant 0 : i32
    %c0_i32_1 = arith.constant 0 : i32
    return %c0_i32, %c0_i32_0 : i32, i32
  }
  func.func @transform_4(%arg0: i32) -> (i32, i32) {
    %c0_i32 = arith.constant 0 : i32
    %c0_i32_0 = arith.constant 0 : i32
    %c0_i32_1 = arith.constant 0 : i32
    return %c0_i32, %c0_i32_0 : i32, i32
  }
  func.func @transform_5(%arg0: i32) -> (i32, i32) {
    %c0_i32 = arith.constant 0 : i32
    %c0_i32_0 = arith.constant 0 : i32
    %c0_i32_1 = arith.constant 0 : i32
    return %c0_i32, %c0_i32_0 : i32, i32
  }
  func.func @transform_6(%arg0: i32) -> (i32, i32) {
    %c0_i32 = arith.constant 0 : i32
    %c0_i32_0 = arith.constant 0 : i32
    %c0_i32_1 = arith.constant 0 : i32
    return %c0_i32, %c0_i32_0 : i32, i32
  }
  func.func @transform_7(%arg0: i32) -> (i32, i32) {
    %c0_i32 = arith.constant 0 : i32
    %c0_i32_0 = arith.constant 0 : i32
    %c0_i32_1 = arith.constant 0 : i32
    return %c0_i32, %c0_i32_0 : i32, i32
  }
  func.func @transform_8(%arg0: i32) -> (i32, i32) {
    %c0_i32 = arith.constant 0 : i32
    %c0_i32_0 = arith.constant 0 : i32
    %c0_i32_1 = arith.constant 0 : i32
    return %c0_i32, %c0_i32_0 : i32, i32
  }
  func.func @transform_9(%arg0: i32) -> (i32, i32) {
    %c0_i32 = arith.constant 0 : i32
    %c0_i32_0 = arith.constant 0 : i32
    %c0_i32_1 = arith.constant 0 : i32
    return %c0_i32, %c0_i32_0 : i32, i32
  }
  func.func @transform_10(%arg0: i32) -> (i32, i32) {
    %c0_i32 = arith.constant 0 : i32
    %c0_i32_0 = arith.constant 0 : i32
    %c0_i32_1 = arith.constant 0 : i32
    return %c0_i32, %c0_i32_0 : i32, i32
  }
  func.func @transform_11(%arg0: i32) -> (i32, i32) {
    %c0_i32 = arith.constant 0 : i32
    %c0_i32_0 = arith.constant 0 : i32
    %c0_i32_1 = arith.constant 0 : i32
    return %c0_i32, %c0_i32_0 : i32, i32
  }
  func.func @transform_12(%arg0: i32) -> (i32, i32) {
    %c0_i32 = arith.constant 0 : i32
    %c0_i32_0 = arith.constant 0 : i32
    %c0_i32_1 = arith.constant 0 : i32
    return %c0_i32, %c0_i32_0 : i32, i32
  }
  func.func @transform_13(%arg0: i32) -> (i32, i32, i32) {
    %c0_i32 = arith.constant 0 : i32
    %c0_i32_0 = arith.constant 0 : i32
    %c0_i32_1 = arith.constant 0 : i32
    return %arg0, %c0_i32, %c0_i32_0 : i32, i32, i32
  }
}

</mosaic_0001>

<bundles_post_ra>
// kernel: context_transformer_forward.4
= control target key start
LH: loop header
LB: loop body
LE: loop exit
PB: predicated region body
PF: predicated region fallthrough
CT: control target
= control target key end

     0   :  { %13 = vsyncpa [#allocation3], 0  ;;  %s2860_s0 = inlined_call_operand.vmem [shape: f32[2,64,128], index: 0, kind: input, shape index: {}]   ;;  %s2861_s1 = inlined_call_operand.vmem [shape: f32[1,128], index: 1, kind: input, shape index: {}]   ;;  %s2862_s2 = inlined_call_operand.vmem [shape: f32[1,128], index: 2, kind: input, shape index: {}]   ;;  %s2863_s3 = inlined_call_operand.vmem [shape: bf16[128,128], index: 3, kind: input, shape index: {}]   ;;  %s2864_s4 = inlined_call_operand.hbm [shape: f32[2,8,64], index: 4, kind: input, shape index: {}]   ;;  %s2865_s5 = inlined_call_operand.vmem [shape: bf16[64,256], index: 5, kind: input, shape index: {}]   ;;  %s2866_s6 = inlined_call_operand.vmem [shape: bf16[128,128], index: 6, kind: input, shape index: {}]   ;;  %s2867_s7 = inlined_call_operand.hbm [shape: f32[1,128], index: 7, kind: input, shape index: {}]   ;;  %s2868_s8 = inlined_call_operand.vmem [shape: f32[2,64,128], index: 8, kind: output, shape index: {}]  }
   0x1   :  { %15 = vsyncpa [#allocation3 + $0x1], 0 }
   0x2   :  { %16 = vsyncpa [#allocation5], 0  ;;  %s2390_s27 = smov 0   ;;  %s2392_s28 = smov 0  }
   0x3   :  { %s2394_s29 = smov 0   ;;  %s2396_s30 = smov 0  }
   0x4 LB: > { %s2409_s9 = sadd.s32 4294967295, %s2339_s30   ;;  %p131_p0 = scmp.ne.s32.totalorder %s2331_s28, %s2327_s27  ;;  %s2339_s30 = sphi %s2396_s30, %s2886_s30   ;;  %s2335_s29 = sphi %s2394_s29, %s2885_s29   ;;  %s2331_s28 = sphi %s2392_s28, %s2884_s28   ;;  %s2327_s27 = sphi %s2390_s27, %s2883_s27  }
   0x5   : > { %p2869_p1 = scmp.eq.s32.totalorder %s2409_s9, 0  ;;  %p1795_p2 = scmp.ge.s32.totalorder %s2339_s30, 1 }
   0x6   : > { %p231_p3 = scmp.lt.s32.totalorder %s2339_s30, 3  ;;  %s2341_s12 = smov [#allocation4]  }
   0x7   : > { %p2417_p4 = por %p2869_p1, %p131_p0  ;;  %s259_s13 = sshll.u32 %s2341_s12, 4  ;;  %s260_s13 = int_to_ptr.vmem [resolvable:$true] %s259_s13 }
   0x8   : > { %p2421_p5 = pnand %p1795_p2, %p231_p3  ;;  %s2428_s14 = sadd.s32 1, %s2339_s30  }
   0x9   : > { %s2872_s10 = scalar_select %p2417_p4, 1, 0 }
   0xa   : > { %s2873_s11 = scalar_select %p2421_p5, 1, 0 }
   0xb   : > { %p2081_p6 = pneg %p2421_p5  ;;  %s115_s16 = ssub.s32 %s2339_s30, %s2428_s14 }
   0xc   : > { %p2438_p8 = scmp.eq.s32.totalorder %s115_s16, 0  ;;  %s118_s18 = sadd.s32 1, %s2335_s29 }
   0xd   : > { %p2432_p7 = pnand %p2081_p6, %p2869_p1  ;;  %s2243_s21 = scalar_lea.hbm %s2867_s7, 16 }
   0xe   : > { %s2875_s17 = scalar_select %p2438_p8, 1, 0 }
   0xf   : > { %p2244_p10 = scmp.ne.s32.totalorder %s2867_s7, %s2243_s21  ;;  %p2245_p11 = pneg %p2432_p7 }
  0x10   : > { %p2250_p0 = scmp.lt.u32.totalorder %s2243_s21, %s2867_s7 }
  0x11   : > { %p2246_p12 = pnand %p2245_p11, %p2244_p10 }
  0x13   : > { %p2247_p13 = pneg %p2246_p12 }
  0x15   : > { %p2252_p2 = pnand %p2250_p0, %p2247_p13 }
  0x17   : > { %2255 = shalt.err (!%p2252_p2)
}
  0x18   : > { %s2256_s26 = scalar_lea.vmem %s260_s13, 16  ;;  %s2263_s27 = scalar_lea.vmem %s260_s13, 32 }
  0x19   : > { %p2257_p3 = scmp.ne.s32.totalorder %s260_s13, %s2256_s26  ;;  %p2264_p9 = scmp.lt.s32.totalorder %s260_s13, %s260_s13 }
  0x1a   : > { %p2265_p4 = scmp.lt.s32.totalorder %s2263_s27, %s2256_s26 }
  0x1b   : > { %p2259_p6 = pnand %p2257_p3, %p2245_p11 }
  0x1c   : > { %p2266_p5 = por %p2265_p4, %p2264_p9 }
  0x1d   : > { %p2260_p1 = pneg %p2259_p6 }
  0x1f   : > { %p2267_p8 = pnand %p2266_p5, %p2260_p1 }
  0x21   : > { %2270 = shalt.err (!%p2267_p8)
}
  0x22   : > { %2084 = dma.hbm_to_vmem [thread:$0]  (!%p2432_p7), %s2867_s7, 16, %s260_s13, [#allocation5]  }
  0x23   : > { %p2876_p10 = scmp.ne.s32.totalorder %s2875_s17, 0  ;;  %p126_p4 = scmp.eq.s32.totalorder %s2339_s30, 0 }
  0x24   : > { %p2090_p1 = scmp.lt.s32.totalorder %s2339_s30, 2  ;;  %s278_s20 = sand.u32 1, %s2335_s29  }
  0x25   : > { %s2464_s19 = scalar_select %p2876_p10, %s2335_s29, %s118_s18  }
  0x26   : > { %s1799_s21 = sshll.u32 %s2339_s30, 7  ;;  %p2877_p5 = scmp.ne.s32.totalorder %s2335_s29, %s2331_s28 }
  0x27   : > { %s1798_s15 = sshll.u32 %s278_s20, 3  ;;  %s2476_s24 = scalar_lea.hbm %s2864_s4, %s1799_s21 }
  0x28   : > { %p127_p8 = por %p126_p4, %p2877_p5  ;;  %s282_s17 = scalar_lea.vmem [#allocation2], %s1798_s15 }
  0x29   : > { %s289_s30 = sshll.u32 %s282_s17, 4  ;;  %s279_s18 = scalar_lea.sflag [#allocation3], %s278_s20  ;;  %s2482_s30 = int_to_ptr.vmem [resolvable:$true] %s289_s30 }
  0x2a   : > { %p2478_p7 = pnand %p2090_p1, %p127_p8  ;;  %s2271_s25 = scalar_lea.hbm %s2476_s24, 128 }
  0x2b   : > { %p2272_p9 = scmp.ne.s32.totalorder %s2476_s24, %s2271_s25  ;;  %s2276_s12 = scalar_lea.hbm %s2864_s4, 256 }
  0x2c   : > { %p2273_p11 = pneg %p2478_p7  ;;  %p2277_p0 = scmp.lt.u32.totalorder %s2476_s24, %s2864_s4 }
  0x2d   : > { %p2278_p2 = scmp.lt.u32.totalorder %s2276_s12, %s2271_s25  ;;  %p2280_p6 = scmp.lt.u32.totalorder %s2271_s25, %s2476_s24 }
  0x2e   : > { %p2274_p12 = pnand %p2273_p11, %p2272_p9 }
  0x2f   : > { %p2279_p3 = por %p2278_p2, %p2277_p0 }
  0x30   : > { %p2275_p13 = pneg %p2274_p12 }
  0x31   : > { %p2281_p10 = por %p2280_p6, %p2279_p3 }
  0x33   : > { %p2282_p4 = pnand %p2281_p10, %p2275_p13 }
  0x35   : > { %2285 = shalt.err (!%p2282_p4)
}
  0x36   : > { %s2286_s20 = scalar_lea.vmem %s2482_s30, 128  ;;  %s2342_s15 = smov [#allocation2]  }
  0x37   : > { %p2287_p1 = scmp.ne.s32.totalorder %s2482_s30, %s2286_s20  ;;  %s2291_s22 = sshll.u32 %s2342_s15, 4  ;;  %s2292_s22 = int_to_ptr.vmem [resolvable:$false] %s2291_s22 }
  0x38   : > { %s2293_s23 = scalar_lea.vmem %s2292_s22, 256  ;;  %p2294_p9 = scmp.lt.s32.totalorder %s2482_s30, %s2292_s22 }
  0x39   : > { %p2289_p5 = pnand %p2287_p1, %p2273_p11  ;;  %p2295_p12 = scmp.lt.s32.totalorder %s2293_s23, %s2286_s20 }
  0x3b   : > { %p2290_p8 = pneg %p2289_p5  ;;  %p2296_p0 = por %p2295_p12, %p2294_p9 }
  0x3d   : > { %p2297_p2 = pnand %p2296_p0, %p2290_p8 }
  0x3f   : > { %2300 = shalt.err (!%p2297_p2)
}
  0x40   : > { %2088 = dma.hbm_to_vmem [thread:$0]  (!%p2478_p7), %s2476_s24, 128, %s2482_s30, %s279_s18  }
  0x41   : > { %p2879_p13 = scmp.ne.s32.totalorder %s2873_s11, 0 }
  0x42   : > { %s300_s17 = sand.u32 (!%p2879_p13), 1, %s2331_s28   ;;  %p2880_p11 = scmp.ne.s32.totalorder (!%p2879_p13), %s2872_s10, 0 }
  0x43   : > { %298 = sbr.rel (%p2879_p13) target bundleno = 2364 (0x93c), region = 52  ;;  %s2512_s25 = sshll.u32 (!%p2879_p13), %s300_s17, 3 }
  0x44   : > { %s301_s26 = scalar_lea.sflag (!%p2879_p13), [#allocation3], %s300_s17  ;;  %s304_s27 = scalar_lea.vmem (!%p2879_p13), [#allocation2], %s2512_s25 }
  0x4a   : > { %2318 = dma.done.wait (%p2880_p11), %s301_s26, 128  }
  0x4b   : > { %2320 = vsyncadd (%p2880_p11), %s301_s26, 4294967168  ;;  %p2881_p3 = scmp.eq.s32.totalorder %s2409_s9, 0 }
  0x4d   : > { %2322 = dma.done.wait (%p2881_p3), [#allocation5], 16   ;;  %p2882_p7 = pmov %p2881_p3 }
  0x4e   : > { %p346_p6 = scmp.lt.s32.totalorder %s2409_s9, 1  ;;  %v2127_v8 = vld [vmem:[%s2863_s3] sm:$0xff]   ;;  %v2131_v41 = vld [vmem:[%s2863_s3 + $0x8] sm:$0xff]   ;;  %v2135_v44 = vld [vmem:[%s2863_s3 + $0x10] sm:$0xff]   ;;  %vm667_vm0 = vcmask 523264   ;;  %v2343_v56 = vmov 0  }
  0x4f   : > { %2324 = vsyncadd (%p2882_p7), [#allocation5], 4294967280  ;;  %1945 = vmatprep.subr.bf16.mxu0 %v2127_v8  ;;  %v2128_v42 = vld [vmem:[%s2865_s5 + $0x4] ss:$8 sps:$4 sm:$0xff]   ;;  %v2130_v43 = vld [vmem:[%s2865_s5] ss:$8 sps:$4 sm:$0xff]   ;;  %703 = vmatprep.mubr.bf16.mxu1 %v2343_v56 }
  0x50   : > { %s2888_s9 = smov (!%p346_p6, %s2409_s9), 1  ;;  %1946 = vmatpush3.bf16.msra.mxu0 %v2127_v8  ;;  %671 = vmatprep.subr.bf16.mxu1 %v2128_v42  ;;  %v2132_v45 = vld [vmem:[%s2865_s5 + $0x14] ss:$8 sps:$4 sm:$0xff]   ;;  %v2134_v46 = vld [vmem:[%s2865_s5 + $0x10] ss:$8 sps:$4 sm:$0xff]   ;;  %v2143_v50 = vld [vmem:[%s2863_s3 + $0x20] sm:$0xff]  }
  0x51   : > { %s1879_s11 = sshll.u32 %s2888_s9, 6  ;;  %1947 = vmatprep.subr.bf16.mxu0 %v2131_v41  ;;  %672 = vmatpush1.bf16.msra.mxu1 %v2130_v43  ;;  %v2139_v47 = vld [vmem:[%s2863_s3 + $0x18] sm:$0xff]   ;;  %v2136_v48 = vld [vmem:[%s2865_s5 + $0x24] ss:$8 sps:$4 sm:$0xff]   ;;  %v2138_v49 = vld [vmem:[%s2865_s5 + $0x20] ss:$8 sps:$4 sm:$0xff]  }
  0x52   : > { %s2533_s10 = scalar_lea.vmem %s2860_s0, %s1879_s11  ;;  %673 = vmatprep.subr.bf16.mxu1 %v2132_v45  ;;  %v2140_v51 = vld [vmem:[%s2865_s5 + $0x34] ss:$8 sps:$4 sm:$0xff]   ;;  %v2142_v52 = vld [vmem:[%s2865_s5 + $0x30] ss:$8 sps:$4 sm:$0xff]   ;;  %v2144_v53 = vld [vmem:[%s2863_s3 + $0x28] sm:$0xff]   ;;  %vm883_vm1 = vcmask 64512   ;;  %s2826_s13 = scalar_lea.vmem %s2868_s8, %s1879_s11 }
  0x53   : > { %v357_v0 = vld [vmem:[%s2533_s10] sm:$0xff]  ;;  %v359_v1 = vld [vmem:[%s2533_s10 + $0x10] sm:$0xff]  ;;  %v358_v2 = vld [vmem:[%s2533_s10 + $0x8] sm:$0xff]  ;;  %s2344_s26 = smov 64  }
  0x54   : > { %365 = vadd.xlane.f32.xlu0 %v357_v0  ;;  %369 = vadd.xlane.f32.xlu1 %v359_v1  ;;  %v360_v3 = vld [vmem:[%s2533_s10 + $0x18] sm:$0xff]  ;;  %v361_v4 = vld [vmem:[%s2533_s10 + $0x20] sm:$0xff]  ;;  %v362_v5 = vld [vmem:[%s2533_s10 + $0x28] sm:$0xff] }
  0x55   : > { %v363_v6 = vld [vmem:[%s2533_s10 + $0x30] sm:$0xff]  ;;  %v364_v7 = vld [vmem:[%s2533_s10 + $0x38] sm:$0xff]  ;;  %1948 = vmatpush3.bf16.msra.mxu0 %v2131_v41  ;;  %674 = vmatpush1.bf16.msra.mxu1 %v2134_v46  ;;  %v617_v54 = vld [vmem:[%s304_s27] sm:$0xff] }
  0x56   : > { %1949 = vmatprep.subr.bf16.mxu0 %v2135_v44  ;;  %675 = vmatprep.subr.bf16.mxu1 %v2136_v48  ;;  %v2145_v55 = vld [vmem:[%s2863_s3 + $0x30] sm:$0xff]   ;;  %v618_v57 = vpack.c.bf16 %v617_v54, %v617_v54  ;;  %v2146_v58 = vld [vmem:[%s2863_s3 + $0x38] sm:$0xff]  }
  0x58   : > { %367 = vadd.xlane.f32.xlu0 %v358_v2  ;;  %371 = vadd.xlane.f32.xlu1 %v360_v3 }
  0x59   : > { %1950 = vmatpush3.bf16.msra.mxu0 %v2135_v44  ;;  %676 = vmatpush1.bf16.msra.mxu1 %v2138_v49 }
  0x5a   : > { %1951 = vmatprep.subr.bf16.mxu0 %v2139_v47  ;;  %677 = vmatprep.subr.bf16.mxu1 %v2140_v51 }
  0x5c   : > { %373 = vadd.xlane.f32.xlu0 %v361_v4  ;;  %375 = vadd.xlane.f32.xlu1 %v362_v5 }
  0x5d   : > { %1952 = vmatpush3.bf16.msra.mxu0 %v2139_v47  ;;  %678 = vmatpush1.bf16.msra.mxu1 %v2142_v52 }
  0x5e   : > { %1953 = vmatprep.subr.bf16.mxu0 %v2143_v50 }
  0x60   : > { %377 = vadd.xlane.f32.xlu0 %v363_v6  ;;  %379 = vadd.xlane.f32.xlu1 %v364_v7 }
  0x61   : > { %1954 = vmatpush3.bf16.msra.mxu0 %v2143_v50  ;;  %1825 = vmatmul.mubr.msk.bf16.vlgmr.msra.gmra.mrb[0].mxu1 %vm667_vm0, %v618_v57 }
  0x62   : > { %1955 = vmatprep.subr.bf16.mxu0 %v2144_v53 }
  0x65   : > { %1956 = vmatpush3.bf16.msra.mxu0 %v2144_v53 }
  0x66   : > { %1957 = vmatprep.subr.bf16.mxu0 %v2145_v55 }
  0x69   : > { %1958 = vmatpush3.bf16.msra.mxu0 %v2145_v55 }
  0x6a   : > { %1959 = vmatprep.subr.bf16.mxu0 %v2146_v58 }
  0x6d   : > { %1960 = vmatpush3.bf16.msra.mxu0 %v2146_v58 }
  0xe1   : > { %v366_v9 = vpop.xlane.xlu0 %365  ;;  %v370_v10 = vpop.xlane.xlu1 %369 }
  0xe2   : > { %v382_v11 = vmul.f32 0.0078125, %v366_v9  ;;  %v384_v12 = vmul.f32 0.0078125, %v370_v10 }
  0xe4   : > { %v2546_v13 = vsub.f32 %v357_v0, %v382_v11  ;;  %v2548_v14 = vsub.f32 %v359_v1, %v384_v12 }
  0xe5   : > { %v368_v15 = vpop.xlane.xlu0 %367  ;;  %v372_v16 = vpop.xlane.xlu1 %371 }
  0xe6   : > { %v383_v17 = vmul.f32 0.0078125, %v368_v15  ;;  %v398_v18 = vmul.f32 %v2546_v13, %v2546_v13  ;;  %v385_v19 = vmul.f32 0.0078125, %v372_v16  ;;  %v400_v22 = vmul.f32 %v2548_v14, %v2548_v14 }
  0xe8   : > { %v2552_v20 = vsub.f32 %v358_v2, %v383_v17  ;;  %406 = vadd.xlane.f32.xlu0 %v398_v18  ;;  %v2554_v21 = vsub.f32 %v360_v3, %v385_v19 }
  0xe9   : > { %v374_v23 = vpop.xlane.xlu0 %373  ;;  %v376_v24 = vpop.xlane.xlu1 %375 }
  0xea   : > { %v386_v25 = vmul.f32 0.0078125, %v374_v23  ;;  %v399_v26 = vmul.f32 %v2552_v20, %v2552_v20  ;;  %v387_v27 = vmul.f32 0.0078125, %v376_v24  ;;  %v401_v30 = vmul.f32 %v2554_v21, %v2554_v21  ;;  %v1807_v24 = vld [vmem:[%s2861_s1] ss:$0 sm:$0xff] }
  0xec   : > { %v2560_v28 = vsub.f32 %v361_v4, %v386_v25  ;;  %410 = vadd.xlane.f32.xlu0 %v400_v22  ;;  %408 = vadd.xlane.f32.xlu1 %v399_v26  ;;  %v2562_v29 = vsub.f32 %v362_v5, %v387_v27 }
  0xed   : > { %v378_v31 = vpop.xlane.xlu0 %377  ;;  %v380_v32 = vpop.xlane.xlu1 %379 }
  0xee   : > { %v388_v33 = vmul.f32 0.0078125, %v378_v31  ;;  %v402_v34 = vmul.f32 %v2560_v28, %v2560_v28  ;;  %v389_v35 = vmul.f32 0.0078125, %v380_v32  ;;  %v403_v38 = vmul.f32 %v2562_v29, %v2562_v29  ;;  %v1808_v32 = vld [vmem:[%s2862_s2] ss:$0 sm:$0xff] }
  0xf0   : > { %v2568_v36 = vsub.f32 %v363_v6, %v388_v33  ;;  %412 = vadd.xlane.f32.xlu1 %v401_v30  ;;  %414 = vadd.xlane.f32.xlu0 %v402_v34  ;;  %v2570_v37 = vsub.f32 %v364_v7, %v389_v35 }
  0xf2   : > { %v404_v39 = vmul.f32 %v2568_v36, %v2568_v36  ;;  %v405_v40 = vmul.f32 %v2570_v37, %v2570_v37 }
  0xf4   : > { %416 = vadd.xlane.f32.xlu1 %v403_v38  ;;  %418 = vadd.xlane.f32.xlu0 %v404_v39 }
  0xf8   : > { %420 = vadd.xlane.f32.xlu1 %v405_v40 }
 0x175   : > { %v407_v59 = vpop.xlane.xlu0 %406 }
 0x176   : > { %v422_v60 = vmul.f32 0.0078125, %v407_v59 }
 0x178   : > { %v430_v61 = vadd.f32 1e-05, %v422_v60 }
 0x179   : > { %v409_v62 = vpop.xlane.xlu1 %408  ;;  %v411_v63 = vpop.xlane.xlu0 %410 }
 0x17a   : > { %2155 = vrsqrt.f32 %v430_v61  ;;  %v423_v0 = vmul.f32 0.0078125, %v409_v62  ;;  %v424_v1 = vmul.f32 0.0078125, %v411_v63 }
 0x17c   : > { %v431_v2 = vadd.f32 1e-05, %v423_v0  ;;  %v432_v3 = vadd.f32 1e-05, %v424_v1 }
 0x17d   : > { %v413_v4 = vpop.xlane.xlu1 %412  ;;  %v415_v5 = vpop.xlane.xlu0 %414 }
 0x17e   : > { %2157 = vrsqrt.f32 %v431_v2  ;;  %v425_v6 = vmul.f32 0.0078125, %v413_v4  ;;  %v426_v7 = vmul.f32 0.0078125, %v415_v5 }
 0x17f   : > { %2159 = vrsqrt.f32 %v432_v3 }
 0x180   : > { %v433_v8 = vadd.f32 1e-05, %v425_v6  ;;  %v434_v9 = vadd.f32 1e-05, %v426_v7 }
 0x181   : > { %v417_v10 = vpop.xlane.xlu1 %416  ;;  %v419_v11 = vpop.xlane.xlu0 %418 }
 0x182   : > { %2161 = vrsqrt.f32 %v433_v8  ;;  %v427_v12 = vmul.f32 0.0078125, %v417_v10  ;;  %v428_v15 = vmul.f32 0.0078125, %v419_v11 }
 0x183   : > { %2163 = vrsqrt.f32 %v434_v9 }
 0x184   : > { %v2156_v16 = vpop.eup %2155  ;;  %v435_v17 = vadd.f32 1e-05, %v427_v12  ;;  %v436_v18 = vadd.f32 1e-05, %v428_v15 }
 0x185   : > { %v421_v19 = vpop.xlane.xlu1 %420  ;;  %v446_v22 = vmul.f32 %v2156_v16, %v2546_v13 }
 0x186   : > { %2165 = vrsqrt.f32 %v435_v17  ;;  %v429_v23 = vmul.f32 0.0078125, %v421_v19 }
 0x187   : > { %2167 = vrsqrt.f32 %v436_v18  ;;  %v461_v31 = vmul.f32 %v1807_v24, %v446_v22 }
 0x188   : > { %v2158_v25 = vpop.eup %2157  ;;  %v437_v26 = vadd.f32 1e-05, %v429_v23 }
 0x189   : > { %v2160_v27 = vpop.eup %2159  ;;  %v447_v30 = vmul.f32 %v2158_v25, %v2552_v20  ;;  %v476_v38 = vadd.f32 %v1808_v32, %v461_v31 }
 0x18a   : > { %2169 = vrsqrt.f32 %v437_v26  ;;  %v448_v13 = vmul.f32 %v2160_v27, %v2548_v14 }
 0x18b   : > { %v462_v33 = vmul.f32 %v1807_v24, %v447_v30 }
 0x18c   : > { %v2162_v34 = vpop.eup %2161  ;;  %v463_v41 = vmul.f32 %v1807_v24, %v448_v13 }
 0x18d   : > { %v2164_v35 = vpop.eup %2163  ;;  %v477_v39 = vadd.f32 %v1808_v32, %v462_v33  ;;  %v449_v40 = vmul.f32 %v2162_v34, %v2554_v21 }
 0x18e   : > { %v450_v42 = vmul.f32 %v2164_v35, %v2560_v28  ;;  %v478_v46 = vadd.f32 %v1808_v32, %v463_v41 }
 0x18f   : > { %v484_v43 = vpack.c.bf16 %v477_v39, %v476_v38  ;;  %v464_v20 = vmul.f32 %v1807_v24, %v449_v40 }
 0x190   : > { %v2166_v44 = vpop.eup %2165  ;;  %v465_v14 = vmul.f32 %v1807_v24, %v450_v42 }
 0x191   : > { %v2168_v45 = vpop.eup %2167  ;;  %1961 = vmatprep.mubr.bf16.mxu0 %v484_v43  ;;  %v479_v47 = vadd.f32 %v1808_v32, %v464_v20  ;;  %v451_v48 = vmul.f32 %v2166_v44, %v2562_v29  ;;  %v2640_v29 = vpop.f32.mrb[0].mxu1 }
 0x192   : > { %v452_v49 = vmul.f32 %v2168_v45, %v2568_v36  ;;  %v480_v21 = vadd.f32 %v1808_v32, %v465_v14  ;;  %v2642_v60 = vpop.f32.mrb[1].mxu1  ;;  %2057 = vmatprep.subr.msk.mxu1 %vm667_vm0, %v2640_v29  ;;  %1969 = vmatprep.subr.msk.mxu0 %vm667_vm0, %v2640_v29 }
 0x193   : > { %v485_v50 = vpack.c.bf16 %v479_v47, %v478_v46  ;;  %v466_v51 = vmul.f32 %v1807_v24, %v451_v48  ;;  %v709_v36 = vpop.f32.mrb[2].mxu1  ;;  %2058 = vmatpush3.xpose.msk.msra.mxu1 %vm667_vm0, %v2640_v29 }
 0x194   : > { %v2170_v52 = vpop.eup %2169  ;;  %v467_v54 = vmul.f32 %v1807_v24, %v452_v49  ;;  %1983 = vmatprep.subr.mxu1 %v2642_v60 }
 0x195   : > { %1962 = vmatmul.mubr.bf16.vlgmr.msra.gmra.mrb[0].mxu0 %v485_v50  ;;  %v481_v53 = vadd.f32 %v1808_v32, %v466_v51  ;;  %v453_v28 = vmul.f32 %v2170_v52, %v2570_v37  ;;  %v710_v37 = vpop.f32.mrb[3].mxu1 }
 0x196   : > { %v482_v57 = vadd.f32 %v1808_v32, %v467_v54  ;;  %1970 = vmatpush3.xpose.msk.msra.mxu0 %vm667_vm0, %v2640_v29 }
 0x197   : > { %v486_v55 = vpack.c.bf16 %v481_v53, %v480_v21  ;;  %v468_v56 = vmul.f32 %v1807_v24, %v453_v28 }
 0x199   : > { %1965 = vmatprep.mubr.bf16.mxu0 %v486_v55  ;;  %v483_v58 = vadd.f32 %v1808_v32, %v468_v56 }
 0x19b   : > { %v487_v59 = vpack.c.bf16 %v483_v58, %v482_v57 }
 0x19d   : > { %1966 = vmatmul.mubr.bf16.gmra.mrb[4].mxu0 %v487_v59 }
 0x268   : > { %v2653_v61 = vpop.f32.mrb[0].mxu0 }
 0x269   : > { %v2655_v62 = vpop.f32.mrb[1].mxu0  ;;  %1974 = vmatprep.mubr.msk.f32.mxu1 %vm667_vm0, %v2653_v61 }
 0x26a   : > { %v2659_v63 = vpop.f32.mrb[2].mxu0  ;;  %1971 = vmatprep.mubr.msk.f32.mxu0 %vm667_vm0, %v2655_v62 }
 0x26b   : > { %v2663_v0 = vpop.f32.mrb[3].mxu0  ;;  %1975 = vmatmul.mubr.msk.f32.vlgmr.msra.gmra.mrb[4].mxu1 %vm667_vm0, %v2659_v63 }
 0x26c   : > { %1984 = vmatpush3.msra.mxu1 %v2642_v60  ;;  %1972 = vmatmul.mubr.msk.f32.vlgmr.msra.gmra.mrb[8].mxu0 %vm667_vm0, %v2663_v0 }
 0x270   : > { %v2670_v1 = vpop.f32.mrb[4].mxu0 }
 0x271   : > { %v2672_v2 = vpop.f32.mrb[5].mxu0 }
 0x272   : > { %v2674_v3 = vpop.f32.mrb[6].mxu0  ;;  %1977 = vmatprep.mubr.msk.f32.mxu1 %vm667_vm0, %v2672_v2 }
 0x273   : > { %v2678_v4 = vpop.f32.mrb[7].mxu0 }
 0x274   : > { %1978 = vmatmul.mubr.msk.f32.gmra.mrb[6].mxu1 %vm667_vm0, %v2678_v4 }
 0x275   : > { %1980 = vmatprep.mubr.msk.f32.mxu1 %vm667_vm0, %v2670_v1 }
 0x278   : > { %1981 = vmatmul.mubr.msk.f32.gmra.mrb[8].mxu1 %vm667_vm0, %v2674_v3 }
 0x33e   : > { %v1976_v5 = vpop.f32.mrb[4].mxu1 }
 0x33f   : > { %v1973_v6 = vpop.f32.mrb[8].mxu0  ;;  %v846_v7 = vpop.f32.mrb[5].mxu1  ;;  %v878_v11 = vmul.f32 0.125, %v1976_v5 }
 0x340   : > { %v876_v8 = vmul.f32 0.125, %v1973_v6  ;;  %v836_v9 = vpop.f32.mrb[9].mxu0  ;;  %v877_v15 = vmul.f32 0.125, %v846_v7 }
 0x341   : > { %v875_v10 = vmul.f32 0.125, %v836_v9  ;;  %v893_v17 = vsel %vm883_vm1, %v878_v11, -inf }
 0x342   : > { %v887_v12 = vsel %vm883_vm1, %v876_v8, -inf  ;;  %v890_v19 = vsel %vm883_vm1, %v877_v15, -inf }
 0x343   : > { %888 = vmax.xlane.f32.xlu1 %v887_v12  ;;  %v884_v16 = vsel %vm883_vm1, %v875_v10, -inf }
 0x344   : > { %885 = vmax.xlane.f32.xlu0 %v884_v16 }
 0x347   : > { %v1979_v18 = vpop.f32.mrb[6].mxu1  ;;  %894 = vmax.xlane.f32.xlu1 %v893_v17  ;;  %v2147_v17 = vld [vmem:[%s2866_s6] sm:$0xff]  }
 0x348   : > { %v880_v22 = vmul.f32 0.125, %v1979_v18  ;;  %v856_v23 = vpop.f32.mrb[7].mxu1  ;;  %891 = vmax.xlane.f32.xlu0 %v890_v19  ;;  %1997 = vmatprep.subr.bf16.mxu1 %v2147_v17 }
 0x349   : > { %v879_v24 = vmul.f32 0.125, %v856_v23 }
 0x34a   : > { %v899_v25 = vsel %vm883_vm1, %v880_v22, -inf }
 0x34b   : > { %v1982_v26 = vpop.f32.mrb[8].mxu1  ;;  %900 = vmax.xlane.f32.xlu1 %v899_v25  ;;  %v896_v27 = vsel %vm883_vm1, %v879_v24, -inf }
 0x34c   : > { %v882_v30 = vmul.f32 0.125, %v1982_v26  ;;  %v866_v31 = vpop.f32.mrb[9].mxu1  ;;  %897 = vmax.xlane.f32.xlu0 %v896_v27 }
 0x34d   : > { %v881_v32 = vmul.f32 0.125, %v866_v31 }
 0x34e   : > { %v905_v13 = vsel %vm883_vm1, %v882_v30, -inf }
 0x34f   : > { %906 = vmax.xlane.f32.xlu1 %v905_v13  ;;  %v902_v33 = vsel %vm883_vm1, %v881_v32, -inf }
 0x350   : > { %903 = vmax.xlane.f32.xlu0 %v902_v33 }
 0x3d0   : > { %v889_v34 = vpop.xlane.xlu1 %888 }
 0x3d1   : > { %v909_v35 = vsub.f32 %v876_v8, %v889_v34  ;;  %v886_v38 = vpop.xlane.xlu0 %885  ;;  %v2150_v34 = vld [vmem:[%s2866_s6 + $0x18] sm:$0xff]  }
 0x3d2   : > { %v908_v39 = vsub.f32 %v875_v10, %v886_v38 }
 0x3d3   : > { %v918_v40 = vmul.f32 1.442695, %v909_v35 }
 0x3d4   : > { %v916_v41 = vmul.f32 1.442695, %v908_v39  ;;  %v895_v42 = vpop.xlane.xlu1 %894 }
 0x3d5   : > { %2171 = vpow2.f32 %v918_v40  ;;  %v911_v43 = vsub.f32 %v878_v11, %v895_v42  ;;  %v892_v20 = vpop.xlane.xlu0 %891 }
 0x3d6   : > { %2173 = vpow2.f32 %v916_v41  ;;  %v910_v44 = vsub.f32 %v877_v15, %v892_v20 }
 0x3d7   : > { %v922_v45 = vmul.f32 1.442695, %v911_v43 }
 0x3d8   : > { %v920_v46 = vmul.f32 1.442695, %v910_v44  ;;  %v901_v47 = vpop.xlane.xlu1 %900 }
 0x3d9   : > { %2175 = vpow2.f32 %v922_v45  ;;  %v913_v48 = vsub.f32 %v880_v22, %v901_v47  ;;  %v898_v14 = vpop.xlane.xlu0 %897 }
 0x3da   : > { %2177 = vpow2.f32 %v920_v46  ;;  %v912_v49 = vsub.f32 %v879_v24, %v898_v14 }
 0x3db   : > { %v926_v50 = vmul.f32 1.442695, %v913_v48 }
 0x3dc   : > { %v924_v51 = vmul.f32 1.442695, %v912_v49  ;;  %v907_v52 = vpop.xlane.xlu1 %906 }
 0x3dd   : > { %2179 = vpow2.f32 %v926_v50  ;;  %v915_v21 = vsub.f32 %v882_v30, %v907_v52  ;;  %v904_v53 = vpop.xlane.xlu0 %903  ;;  %v2149_v30 = vld [vmem:[%s2866_s6 + $0x10] sm:$0xff]  }
 0x3de   : > { %2181 = vpow2.f32 %v924_v51  ;;  %v914_v28 = vsub.f32 %v881_v32, %v904_v53 }
 0x3df   : > { %v2172_v54 = vpop.eup %2171  ;;  %v930_v55 = vmul.f32 1.442695, %v915_v21 }
 0x3e0   : > { %v2174_v56 = vpop.eup %2173  ;;  %v928_v57 = vmul.f32 1.442695, %v914_v28  ;;  %v935_v58 = vsel %vm883_vm1, %v2172_v54, 0.0 }
 0x3e1   : > { %2183 = vpow2.f32 %v930_v55  ;;  %936 = vadd.xlane.f32.xlu1 %v935_v58  ;;  %v932_v59 = vsel %vm883_vm1, %v2174_v56, 0.0 }
 0x3e2   : > { %2185 = vpow2.f32 %v928_v57  ;;  %933 = vadd.xlane.f32.xlu0 %v932_v59 }
 0x3e3   : > { %v2176_v36 = vpop.eup %2175 }
 0x3e4   : > { %v2178_v37 = vpop.eup %2177  ;;  %v941_v5 = vsel %vm883_vm1, %v2176_v36, 0.0 }
 0x3e5   : > { %942 = vadd.xlane.f32.xlu1 %v941_v5  ;;  %v938_v6 = vsel %vm883_vm1, %v2178_v37, 0.0 }
 0x3e6   : > { %939 = vadd.xlane.f32.xlu0 %v938_v6 }
 0x3e7   : > { %v2180_v7 = vpop.eup %2179 }
 0x3e8   : > { %v2182_v8 = vpop.eup %2181  ;;  %v947_v9 = vsel %vm883_vm1, %v2180_v7, 0.0 }
 0x3e9   : > { %948 = vadd.xlane.f32.xlu1 %v947_v9  ;;  %v944_v10 = vsel %vm883_vm1, %v2182_v8, 0.0 }
 0x3ea   : > { %945 = vadd.xlane.f32.xlu0 %v944_v10 }
 0x3eb   : > { %v2700_v11 = vpop.eup %2183 }
 0x3ec   : > { %v2186_v12 = vpop.eup %2185  ;;  %v953_v15 = vsel %vm883_vm1, %v2700_v11, 0.0 }
 0x3ed   : > { %954 = vadd.xlane.f32.xlu1 %v953_v15  ;;  %v950_v16 = vsel %vm883_vm1, %v2186_v12, 0.0 }
 0x3ee   : > { %951 = vadd.xlane.f32.xlu0 %v950_v16 }
 0x3fe   : > { %1214 = vrot.lane.b32.xlu1 %v2655_v62, %s2344_s26 }
 0x402   : > { %1216 = vrot.lane.b32.xlu1 %v2663_v0, %s2344_s26 }
 0x404   : > { %1230 = vrot.lane.b32.xlu0 %v2640_v29, %s2344_s26 }
 0x406   : > { %1218 = vrot.lane.b32.xlu1 %v2653_v61, %s2344_s26 }
 0x408   : > { %1220 = vrot.lane.b32.xlu0 %v2659_v63, %s2344_s26 }
 0x40a   : > { %1222 = vrot.lane.b32.xlu1 %v2672_v2, %s2344_s26 }
 0x40c   : > { %1224 = vrot.lane.b32.xlu0 %v2678_v4, %s2344_s26 }
 0x40e   : > { %1226 = vrot.lane.b32.xlu1 %v2670_v1, %s2344_s26 }
 0x410   : > { %1228 = vrot.lane.b32.xlu0 %v2674_v3, %s2344_s26  ;;  %v2148_v3 = vld [vmem:[%s2866_s6 + $0x8] sm:$0xff]  }
 0x46e   : > { %v937_v62 = vpop.xlane.xlu1 %936 }
 0x46f   : > { %2187 = vrcp.f32 %v937_v62  ;;  %v934_v29 = vpop.xlane.xlu0 %933 }
 0x470   : > { %2189 = vrcp.f32 %v934_v29 }
 0x472   : > { %v943_v61 = vpop.xlane.xlu1 %942 }
 0x473   : > { %2191 = vrcp.f32 %v943_v61  ;;  %v940_v0 = vpop.xlane.xlu0 %939 }
 0x474   : > { %2193 = vrcp.f32 %v940_v0 }
 0x476   : > { %v949_v63 = vpop.xlane.xlu1 %948 }
 0x477   : > { %2195 = vrcp.f32 %v949_v63  ;;  %v946_v2 = vpop.xlane.xlu0 %945 }
 0x478   : > { %2197 = vrcp.f32 %v946_v2 }
 0x479   : > { %v2188_v18 = vpop.eup %2187 }
 0x47a   : > { %v2190_v4 = vpop.eup %2189  ;;  %v955_v19 = vpop.xlane.xlu1 %954  ;;  %v965_v23 = vmul.f32 %v2188_v18, %v2172_v54 }
 0x47b   : > { %2199 = vrcp.f32 %v955_v19  ;;  %v952_v1 = vpop.xlane.xlu0 %951  ;;  %v964_v22 = vmul.f32 %v2190_v4, %v2174_v56 }
 0x47c   : > { %2201 = vrcp.f32 %v952_v1 }
 0x47d   : > { %v2192_v24 = vpop.eup %2191  ;;  %1985 = vmatprep.mubr.msk.f32.mxu1 %vm883_vm1, %v964_v22 }
 0x47e   : > { %v2194_v25 = vpop.eup %2193  ;;  %1986 = vmatmul.mubr.msk.f32.vlgmr.msra.gmra.mrb[10].mxu1 %vm883_vm1, %v965_v23  ;;  %v967_v27 = vmul.f32 %v2192_v24, %v2176_v36  ;;  %v1215_v47 = vpop.permute.xlu1 %1214 }
 0x47f   : > { %1998 = vmatpush3.bf16.msra.mxu1 %v2147_v17  ;;  %v966_v26 = vmul.f32 %v2194_v25, %v2178_v37  ;;  %v1231_v41 = vpop.permute.xlu0 %1230 }
 0x480   : > { %1999 = vmatprep.subr.bf16.mxu1 %v2148_v3 }
 0x481   : > { %v2196_v31 = vpop.eup %2195  ;;  %1988 = vmatprep.mubr.msk.f32.mxu1 %vm883_vm1, %v966_v26 }
 0x482   : > { %v2198_v32 = vpop.eup %2197  ;;  %1989 = vmatmul.mubr.msk.f32.gmra.mrb[12].mxu1 %vm883_vm1, %v967_v27  ;;  %v969_v33 = vmul.f32 %v2196_v31, %v2180_v7  ;;  %v1217_v52 = vpop.permute.xlu1 %1216 }
 0x483   : > { %2000 = vmatpush3.bf16.msra.mxu1 %v2148_v3  ;;  %v968_v13 = vmul.f32 %v2198_v32, %v2182_v8  ;;  %v1221_v28 = vpop.permute.xlu0 %1220 }
 0x484   : > { %2001 = vmatprep.subr.bf16.mxu1 %v2149_v30 }
 0x485   : > { %v2200_v35 = vpop.eup %2199  ;;  %1991 = vmatprep.mubr.msk.f32.mxu1 %vm883_vm1, %v968_v13 }
 0x486   : > { %v2202_v38 = vpop.eup %2201  ;;  %1992 = vmatmul.mubr.msk.f32.gmra.mrb[14].mxu1 %vm883_vm1, %v969_v33  ;;  %v971_v40 = vmul.f32 %v2200_v35, %v2700_v11  ;;  %v1219_v53 = vpop.permute.xlu1 %1218 }
 0x487   : > { %2002 = vmatpush3.bf16.msra.mxu1 %v2149_v30  ;;  %v970_v39 = vmul.f32 %v2202_v38, %v2186_v12  ;;  %v1225_v55 = vpop.permute.xlu0 %1224 }
 0x488   : > { %2003 = vmatprep.subr.bf16.mxu1 %v2150_v34 }
 0x489   : > { %1994 = vmatprep.mubr.msk.f32.mxu1 %vm883_vm1, %v970_v39 }
 0x48a   : > { %1995 = vmatmul.mubr.msk.f32.gmra.mrb[16].mxu1 %vm883_vm1, %v971_v40  ;;  %v1223_v54 = vpop.permute.xlu1 %1222 }
 0x48b   : > { %2004 = vmatpush3.bf16.msra.mxu1 %v2150_v34  ;;  %v1229_v57 = vpop.permute.xlu0 %1228 }
 0x48c   : > { %2013 = vmatprep.subr.msk.mxu1 %vm667_vm0, %v1231_v41 }
 0x48e   : > { %v1227_v56 = vpop.permute.xlu1 %1226 }
 0x551   : > { %v1987_v42 = vpop.f32.mrb[10].mxu1 }
 0x552   : > { %v1062_v43 = vpop.f32.mrb[11].mxu1 }
 0x553   : > { %v1101_v20 = vpack.c.bf16 %v1987_v42, %v1062_v43 }
 0x555   : > { %v1990_v44 = vpop.f32.mrb[12].mxu1  ;;  %2005 = vmatprep.mubr.msk.bf16.mxu1 %vm667_vm0, %v1101_v20 }
 0x556   : > { %v1072_v45 = vpop.f32.mrb[13].mxu1 }
 0x557   : > { %v1102_v46 = vpack.c.bf16 %v1990_v44, %v1072_v45 }
 0x559   : > { %v1993_v48 = vpop.f32.mrb[14].mxu1  ;;  %2006 = vmatmul.mubr.msk.bf16.vlgmr.msra.gmra.mrb[20].mxu1 %vm667_vm0, %v1102_v46 }
 0x55a   : > { %2014 = vmatpush3.xpose.msk.msra.mxu1 %vm667_vm0, %v1231_v41  ;;  %v1082_v14 = vpop.f32.mrb[15].mxu1 }
 0x55b   : > { %v1103_v49 = vpack.c.bf16 %v1993_v48, %v1082_v14 }
 0x55d   : > { %v1996_v50 = vpop.f32.mrb[16].mxu1  ;;  %2009 = vmatprep.mubr.msk.bf16.mxu1 %vm667_vm0, %v1103_v49 }
 0x55e   : > { %v1092_v51 = vpop.f32.mrb[17].mxu1 }
 0x55f   : > { %v1104_v21 = vpack.c.bf16 %v1996_v50, %v1092_v51 }
 0x561   : > { %2010 = vmatmul.mubr.msk.bf16.gmra.mrb[24].mxu1 %vm667_vm0, %v1104_v21 }
 0x562   : > { %2015 = vmatprep.mubr.msk.f32.mxu1 %vm667_vm0, %v1215_v47 }
 0x569   : > { %2016 = vmatmul.mubr.msk.f32.vlgmr.msra.gmra.mrb[18].mxu1 %vm667_vm0, %v1217_v52 }
 0x56a   : > { %2018 = vmatprep.mubr.msk.f32.mxu1 %vm667_vm0, %v1219_v53 }
 0x56d   : > { %2019 = vmatmul.mubr.msk.f32.gmra.mrb[28].mxu1 %vm667_vm0, %v1221_v28 }
 0x56e   : > { %2021 = vmatprep.mubr.msk.f32.mxu1 %vm667_vm0, %v1223_v54 }
 0x571   : > { %2022 = vmatmul.mubr.msk.f32.gmra.mrb[30].mxu1 %vm667_vm0, %v1225_v55 }
 0x572   : > { %2024 = vmatprep.mubr.msk.f32.mxu1 %vm667_vm0, %v1227_v56 }
 0x575   : > { %2025 = vmatmul.mubr.msk.f32.gmra.mrb[32].mxu1 %vm667_vm0, %v1229_v57 }
 0x62c   : > { %v2758_v58 = vpop.f32.mrb[20].mxu1 }
 0x62d   : > { %v2760_v59 = vpop.f32.mrb[21].mxu1 }
 0x62e   : > { %v2762_v36 = vpop.f32.mrb[22].mxu1 }
 0x62f   : > { %v2764_v37 = vpop.f32.mrb[23].mxu1 }
 0x634   : > { %v2766_v5 = vpop.f32.mrb[24].mxu1 }
 0x635   : > { %v2768_v6 = vpop.f32.mrb[25].mxu1 }
 0x636   : > { %v2770_v7 = vpop.f32.mrb[26].mxu1 }
 0x637   : > { %v2772_v8 = vpop.f32.mrb[27].mxu1 }
 0x63c   : > { %v2017_v9 = vpop.f32.mrb[18].mxu1 }
 0x63d   : > { %v1356_v10 = vmul.f32 0.125, %v2017_v9  ;;  %v1316_v11 = vpop.f32.mrb[19].mxu1 }
 0x63e   : > { %v1355_v12 = vmul.f32 0.125, %v1316_v11 }
 0x63f   : > { %v1366_v15 = vsel %vm883_vm1, %v1356_v10, -inf }
 0x640   : > { %1367 = vmax.xlane.f32.xlu0 %v1366_v15  ;;  %v2020_v16 = vpop.f32.mrb[28].mxu1  ;;  %v1363_v17 = vsel %vm883_vm1, %v1355_v12, -inf }
 0x641   : > { %1364 = vmax.xlane.f32.xlu1 %v1363_v17  ;;  %v1326_v62 = vpop.f32.mrb[29].mxu1  ;;  %v1358_v61 = vmul.f32 0.125, %v2020_v16 }
 0x642   : > { %v1357_v29 = vmul.f32 0.125, %v1326_v62 }
 0x643   : > { %v1372_v1 = vsel %vm883_vm1, %v1358_v61, -inf }
 0x644   : > { %v2023_v0 = vpop.f32.mrb[30].mxu1  ;;  %v1369_v63 = vsel %vm883_vm1, %v1357_v29, -inf }
 0x645   : > { %1370 = vmax.xlane.f32.xlu0 %v1369_v63  ;;  %v1336_v2 = vpop.f32.mrb[31].mxu1  ;;  %v1360_v4 = vmul.f32 0.125, %v2023_v0 }
 0x646   : > { %v1359_v18 = vmul.f32 0.125, %v1336_v2 }
 0x647   : > { %v1378_v25 = vsel %vm883_vm1, %v1360_v4, -inf }
 0x648   : > { %v2026_v19 = vpop.f32.mrb[32].mxu1  ;;  %v1375_v22 = vsel %vm883_vm1, %v1359_v18, -inf }
 0x649   : > { %1373 = vmax.xlane.f32.xlu0 %v1372_v1  ;;  %1376 = vmax.xlane.f32.xlu1 %v1375_v22  ;;  %v1346_v23 = vpop.f32.mrb[33].mxu1  ;;  %v1362_v24 = vmul.f32 0.125, %v2026_v19 }
 0x64a   : > { %v1361_v3 = vmul.f32 0.125, %v1346_v23 }
 0x64b   : > { %v1384_v27 = vsel %vm883_vm1, %v1362_v24, -inf }
 0x64c   : > { %v1381_v26 = vsel %vm883_vm1, %v1361_v3, -inf }
 0x64d   : > { %1379 = vmax.xlane.f32.xlu0 %v1378_v25  ;;  %1382 = vmax.xlane.f32.xlu1 %v1381_v26 }
 0x651   : > { %1385 = vmax.xlane.f32.xlu0 %v1384_v27  ;;  %v2152_v27 = vld [vmem:[%s2866_s6 + $0x28] sm:$0xff]  }
 0x6cd   : > { %v1368_v30 = vpop.xlane.xlu0 %1367 }
 0x6ce   : > { %v1388_v31 = vsub.f32 %v1356_v10, %v1368_v30  ;;  %v1365_v32 = vpop.xlane.xlu1 %1364 }
 0x6cf   : > { %v1387_v13 = vsub.f32 %v1355_v12, %v1365_v32 }
 0x6d0   : > { %v1397_v33 = vmul.f32 1.442695, %v1388_v31 }
 0x6d1   : > { %v1395_v34 = vmul.f32 1.442695, %v1387_v13 }
 0x6d2   : > { %2203 = vpow2.f32 %v1397_v33  ;;  %v1371_v35 = vpop.xlane.xlu0 %1370 }
 0x6d3   : > { %2205 = vpow2.f32 %v1395_v34  ;;  %v1389_v38 = vsub.f32 %v1357_v29, %v1371_v35 }
 0x6d5   : > { %v1399_v39 = vmul.f32 1.442695, %v1389_v38 }
 0x6d6   : > { %v1377_v40 = vpop.xlane.xlu1 %1376  ;;  %v1374_v41 = vpop.xlane.xlu0 %1373 }
 0x6d7   : > { %2207 = vpow2.f32 %v1399_v39  ;;  %v1391_v42 = vsub.f32 %v1359_v18, %v1377_v40  ;;  %v1390_v43 = vsub.f32 %v1358_v61, %v1374_v41 }
 0x6d9   : > { %v1403_v20 = vmul.f32 1.442695, %v1391_v42  ;;  %v1401_v44 = vmul.f32 1.442695, %v1390_v43  ;;  %v2153_v42 = vld [vmem:[%s2866_s6 + $0x30] sm:$0xff]   ;;  %v2154_v43 = vld [vmem:[%s2866_s6 + $0x38] sm:$0xff]  }
 0x6da   : > { %v1383_v45 = vpop.xlane.xlu1 %1382  ;;  %v1380_v46 = vpop.xlane.xlu0 %1379 }
 0x6db   : > { %2209 = vpow2.f32 %v1403_v20  ;;  %v1393_v47 = vsub.f32 %v1361_v3, %v1383_v45  ;;  %v1392_v48 = vsub.f32 %v1360_v4, %v1380_v46  ;;  %v2151_v3 = vld [vmem:[%s2866_s6 + $0x20] sm:$0xff]  }
 0x6dc   : > { %v2204_v14 = vpop.eup %2203  ;;  %2211 = vpow2.f32 %v1401_v44 }
 0x6dd   : > { %v2206_v49 = vpop.eup %2205  ;;  %v1407_v50 = vmul.f32 1.442695, %v1393_v47  ;;  %v1405_v51 = vmul.f32 1.442695, %v1392_v48  ;;  %v1414_v52 = vsel %vm883_vm1, %v2204_v14, 0.0 }
 0x6de   : > { %1415 = vadd.xlane.f32.xlu0 %v1414_v52  ;;  %v1386_v21 = vpop.xlane.xlu0 %1385  ;;  %v1411_v53 = vsel %vm883_vm1, %v2206_v49, 0.0 }
 0x6df   : > { %2213 = vpow2.f32 %v1407_v50  ;;  %v1394_v28 = vsub.f32 %v1362_v24, %v1386_v21  ;;  %1412 = vadd.xlane.f32.xlu1 %v1411_v53  ;;  %v1826_v53 = vld [vmem:[#allocation4] ss:$0 sm:$0xff] }
 0x6e0   : > { %2215 = vpow2.f32 %v1405_v51 }
 0x6e1   : > { %v2208_v54 = vpop.eup %2207  ;;  %v1409_v55 = vmul.f32 1.442695, %v1394_v28  ;;  %v2235_v28 = vld [vmem:[%s2533_s10 + $0x10] sm:$0xff] }
 0x6e2   : > { %v1417_v56 = vsel %vm883_vm1, %v2208_v54, 0.0 }
 0x6e3   : > { %2217 = vpow2.f32 %v1409_v55  ;;  %1418 = vadd.xlane.f32.xlu1 %v1417_v56  ;;  %v2236_v55 = vld [vmem:[%s2533_s10] sm:$0xff] }
 0x6e4   : > { %v735_v56 = vadd.f32 %v2236_v55, %v1826_v53 }
 0x6e5   : > { %v2210_v57 = vpop.eup %2209 }
 0x6e6   : > { %v2212_v9 = vpop.eup %2211  ;;  %v1423_v10 = vsel %vm883_vm1, %v2210_v57, 0.0 }
 0x6e7   : > { %1424 = vadd.xlane.f32.xlu1 %v1423_v10  ;;  %v1420_v11 = vsel %vm883_vm1, %v2212_v9, 0.0  ;;  %v2238_v10 = vld [vmem:[%s2533_s10 + $0x8] sm:$0xff] }
 0x6e8   : > { %1421 = vadd.xlane.f32.xlu0 %v1420_v11  ;;  %v736_v11 = vadd.f32 %v2238_v10, %v1826_v53 }
 0x6e9   : > { %v2214_v12 = vpop.eup %2213 }
 0x6ea   : > { %v2216_v15 = vpop.eup %2215  ;;  %v1429_v16 = vsel %vm883_vm1, %v2214_v12, 0.0 }
 0x6eb   : > { %1430 = vadd.xlane.f32.xlu1 %v1429_v16  ;;  %v1426_v17 = vsel %vm883_vm1, %v2216_v15, 0.0 }
 0x6ec   : > { %1427 = vadd.xlane.f32.xlu0 %v1426_v17 }
 0x6ed   : > { %v2218_v62 = vpop.eup %2217 }
 0x6ee   : > { %v1432_v29 = vsel %vm883_vm1, %v2218_v62, 0.0 }
 0x6f0   : > { %1433 = vadd.xlane.f32.xlu0 %v1432_v29 }
 0x6fc   : > { %1452 = vrot.lane.b32.xlu1 %v2642_v60, %s2344_s26 }
 0x76b   : > { %v1416_v0 = vpop.xlane.xlu0 %1415 }
 0x76c   : > { %v1413_v61 = vpop.xlane.xlu1 %1412 }
 0x76d   : > { %2219 = vrcp.f32 %v1413_v61 }
 0x76e   : > { %2221 = vrcp.f32 %v1416_v0 }
 0x770   : > { %v1419_v63 = vpop.xlane.xlu1 %1418 }
 0x771   : > { %2223 = vrcp.f32 %v1419_v63  ;;  %v2239_v63 = vld [vmem:[%s2533_s10 + $0x30] sm:$0xff] }
 0x774   : > { %v1425_v2 = vpop.xlane.xlu1 %1424 }
 0x775   : > { %2225 = vrcp.f32 %v1425_v2  ;;  %v1422_v18 = vpop.xlane.xlu0 %1421  ;;  %v741_v2 = vadd.f32 %v2239_v63, %v1826_v53 }
 0x776   : > { %2227 = vrcp.f32 %v1422_v18 }
 0x777   : > { %v2220_v4 = vpop.eup %2219 }
 0x778   : > { %v1431_v19 = vpop.xlane.xlu1 %1430  ;;  %v1443_v1 = vmul.f32 %v2220_v4, %v2206_v49  ;;  %v2222_v23 = vpop.eup %2221 }
 0x779   : > { %2229 = vrcp.f32 %v1431_v19  ;;  %v1428_v22 = vpop.xlane.xlu0 %1427  ;;  %v1444_v25 = vmul.f32 %v2222_v23, %v2204_v14  ;;  %v2240_v19 = vld [vmem:[%s2533_s10 + $0x20] sm:$0xff]  ;;  %v2242_v23 = vld [vmem:[%s2533_s10 + $0x28] sm:$0xff] }
 0x77a   : > { %2231 = vrcp.f32 %v1428_v22  ;;  %2029 = vmatprep.mubr.msk.f32.mxu0 %vm883_vm1, %v1443_v1 }
 0x77b   : > { %v2224_v60 = vpop.eup %2223 }
 0x77c   : > { %v1453_v24 = vpop.permute.xlu1 %1452  ;;  %v1445_v30 = vmul.f32 %v2224_v60, %v2208_v54  ;;  %v737_v54 = vadd.f32 %v2235_v28, %v1826_v53  ;;  %v740_v60 = vadd.f32 %v2242_v23, %v1826_v53 }
 0x77d   : > { %v1434_v26 = vpop.xlane.xlu0 %1433  ;;  %2027 = vmatprep.subr.mxu0 %v1453_v24 }
 0x77e   : > { %2233 = vrcp.f32 %v1434_v26  ;;  %2028 = vmatpush3.msra.mxu0 %v1453_v24 }
 0x77f   : > { %v2226_v31 = vpop.eup %2225  ;;  %2030 = vmatmul.mubr.msk.f32.vlgmr.msra.gmra.mrb[10].mxu0 %vm883_vm1, %v1444_v25  ;;  %2041 = vmatprep.subr.bf16.mxu0 %v2151_v3 }
 0x780   : > { %v2228_v32 = vpop.eup %2227  ;;  %2032 = vmatprep.mubr.msk.f32.mxu0 %vm883_vm1, %v1445_v30  ;;  %2042 = vmatpush3.bf16.msra.mxu0 %v2151_v3  ;;  %v1447_v33 = vmul.f32 %v2226_v31, %v2210_v57  ;;  %v2237_v57 = vld [vmem:[%s2533_s10 + $0x18] sm:$0xff]  ;;  %v1211_v30 = vadd.f32 %v2772_v8, %v740_v60 }
 0x781   : > { %v1446_v13 = vmul.f32 %v2228_v32, %v2212_v9  ;;  %2043 = vmatprep.subr.bf16.mxu0 %v2152_v27  ;;  %v738_v9 = vadd.f32 %v2237_v57, %v1826_v53 }
 0x783   : > { %v2230_v34 = vpop.eup %2229  ;;  %2033 = vmatmul.mubr.msk.f32.gmra.mrb[12].mxu0 %vm883_vm1, %v1446_v13  ;;  %v1209_v17 = vadd.f32 %v2762_v36, %v738_v9  ;;  %v2241_v36 = vld [vmem:[%s2533_s10 + $0x38] sm:$0xff] }
 0x784   : > { %v2232_v35 = vpop.eup %2231  ;;  %2035 = vmatprep.mubr.msk.f32.mxu0 %vm883_vm1, %v1447_v33  ;;  %2044 = vmatpush3.bf16.msra.mxu0 %v2152_v27  ;;  %v1449_v39 = vmul.f32 %v2230_v34, %v2214_v12  ;;  %v1208_v12 = vadd.f32 %v2758_v58, %v737_v54  ;;  %v1207_v58 = vadd.f32 %v2764_v37, %v736_v11 }
 0x785   : > { %v1448_v38 = vmul.f32 %v2232_v35, %v2216_v15  ;;  %2045 = vmatprep.subr.bf16.mxu0 %v2153_v42  ;;  %v1206_v15 = vadd.f32 %v2760_v59, %v735_v56  ;;  %v739_v59 = vadd.f32 %v2240_v19, %v1826_v53  ;;  %v742_v22 = vadd.f32 %v2241_v36, %v1826_v53 }
 0x786   : > { %v1212_v37 = vadd.f32 %v2766_v5, %v741_v2 }
 0x787   : > { %2036 = vmatmul.mubr.msk.f32.gmra.mrb[14].mxu0 %vm883_vm1, %v1448_v38  ;;  %v1210_v3 = vadd.f32 %v2768_v6, %v739_v59  ;;  %v1213_v25 = vadd.f32 %v2770_v7, %v742_v22 }
 0x788   : > { %v2234_v40 = vpop.eup %2233  ;;  %2038 = vmatprep.mubr.msk.f32.mxu0 %vm883_vm1, %v1449_v39  ;;  %2046 = vmatpush3.bf16.msra.mxu0 %v2153_v42 }
 0x789   : > { %v1450_v41 = vmul.f32 %v2234_v40, %v2218_v62  ;;  %2047 = vmatprep.subr.bf16.mxu0 %v2154_v43 }
 0x78b   : > { %2039 = vmatmul.mubr.msk.f32.gmra.mrb[16].mxu0 %vm883_vm1, %v1450_v41 }
 0x78c   : > { %2048 = vmatpush3.bf16.msra.mxu0 %v2154_v43 }
 0x852   : > { %v2031_v20 = vpop.f32.mrb[10].mxu0 }
 0x853   : > { %v1545_v44 = vpop.f32.mrb[11].mxu0 }
 0x854   : > { %v1584_v45 = vpack.c.bf16 %v2031_v20, %v1545_v44 }
 0x856   : > { %v2034_v46 = vpop.f32.mrb[12].mxu0  ;;  %2049 = vmatprep.mubr.msk.bf16.mxu0 %vm667_vm0, %v1584_v45 }
 0x857   : > { %v1555_v47 = vpop.f32.mrb[13].mxu0 }
 0x858   : > { %v1585_v48 = vpack.c.bf16 %v2034_v46, %v1555_v47 }
 0x85a   : > { %v2037_v14 = vpop.f32.mrb[14].mxu0  ;;  %2050 = vmatmul.mubr.msk.bf16.vlgmr.msra.gmra.mrb[20].mxu0 %vm667_vm0, %v1585_v48 }
 0x85b   : > { %v1565_v49 = vpop.f32.mrb[15].mxu0 }
 0x85c   : > { %v1586_v50 = vpack.c.bf16 %v2037_v14, %v1565_v49 }
 0x85e   : > { %v2040_v51 = vpop.f32.mrb[16].mxu0  ;;  %2053 = vmatprep.mubr.msk.bf16.mxu0 %vm667_vm0, %v1586_v50 }
 0x85f   : > { %v1575_v52 = vpop.f32.mrb[17].mxu0 }
 0x860   : > { %v1587_v21 = vpack.c.bf16 %v2040_v51, %v1575_v52 }
 0x862   : > { %2054 = vmatmul.mubr.msk.bf16.gmra.mrb[24].mxu0 %vm667_vm0, %v1587_v21 }
 0x92d   : > { %v2051_v16 = vpop.f32.mrb[20].mxu0 }
 0x92e   : > { %v1691_v62 = vadd.f32 %v2051_v16, %v1208_v12  ;;  %v1658_v29 = vpop.f32.mrb[21].mxu0 }
 0x92f   : > { %v1689_v61 = vadd.f32 %v1658_v29, %v1206_v15  ;;  %v2052_v0 = vpop.f32.mrb[22].mxu0 }
 0x930   : > { %1699 = vst [vmem:[%s2826_s13 + $0x10] sm:$0xff] %v1691_v62  ;;  %v1692_v18 = vadd.f32 %v2052_v0, %v1209_v17  ;;  %v1661_v4 = vpop.f32.mrb[23].mxu0 }
 0x931   : > { %1697 = vst [vmem:[%s2826_s13] sm:$0xff] %v1689_v61  ;;  %v1690_v1 = vadd.f32 %v1661_v4, %v1207_v58 }
 0x932   : > { %1700 = vst [vmem:[%s2826_s13 + $0x18] sm:$0xff] %v1692_v18 }
 0x933   : > { %1698 = vst [vmem:[%s2826_s13 + $0x8] sm:$0xff] %v1690_v1 }
 0x935   : > { %v2055_v24 = vpop.f32.mrb[24].mxu0 }
 0x936   : > { %v1695_v26 = vadd.f32 %v2055_v24, %v1212_v37  ;;  %v1674_v27 = vpop.f32.mrb[25].mxu0 }
 0x937   : > { %v1693_v31 = vadd.f32 %v1674_v27, %v1210_v3  ;;  %v2056_v32 = vpop.f32.mrb[26].mxu0 }
 0x938   : > { %1703 = vst [vmem:[%s2826_s13 + $0x30] sm:$0xff] %v1695_v26  ;;  %v1696_v13 = vadd.f32 %v2056_v32, %v1213_v25  ;;  %v1677_v33 = vpop.f32.mrb[27].mxu0 }
 0x939   : > { %1701 = vst [vmem:[%s2826_s13 + $0x20] sm:$0xff] %v1693_v31  ;;  %v1694_v34 = vadd.f32 %v1677_v33, %v1211_v30 }
 0x93a   : > { %1704 = vst [vmem:[%s2826_s13 + $0x38] sm:$0xff] %v1696_v13 }
 0x93b   : > { %1702 = vst [vmem:[%s2826_s13 + $0x28] sm:$0xff] %v1694_v34 }
 0x93c PF: > { %p19_p10 = scmp.ge.s32.totalorder %s2428_s14, 4   ;;  %s2883_s27 = smov %s2331_s28 }
 0x93d   : > { %s2884_s28 = smov %s2335_s29  ;;  %s2885_s29 = smov %s2464_s19 }
 0x93e   : > { %s2886_s30 = smov %s2428_s14  ;;  %21 = sbr.rel (!%p19_p10) target bundleno = 4 (0x4), region = 99 }
 0x945   :  { %1726 = vsyncpa [#allocation3], 1 }
 0x946   :  { %1728 = vsyncpa [#allocation3 + $0x1], 1 }
 0x947   :  { %1729 = vsyncpa [#allocation5], 1 }

// kernel: context_transformer_forward.3
= control target key start
LH: loop header
LB: loop body
LE: loop exit
PB: predicated region body
PF: predicated region fallthrough
CT: control target
= control target key end

     0   :  { %s4242_s0 = inlined_call_operand.vmem [shape: f32[2,64,64], index: 0, kind: input, shape index: {}]   ;;  %s4243_s1 = inlined_call_operand.hbm [shape: f32[64,64], index: 1, kind: input, shape index: {}]   ;;  %s4244_s2 = inlined_call_operand.vmem [shape: f32[1,64], index: 2, kind: input, shape index: {}]   ;;  %s4245_s3 = inlined_call_operand.vmem [shape: f32[1,64], index: 3, kind: input, shape index: {}]   ;;  %s4246_s4 = inlined_call_operand.hbm [shape: bf16[64,128], index: 4, kind: input, shape index: {}]   ;;  %s4247_s5 = inlined_call_operand.vmem [shape: f32[1,128], index: 5, kind: input, shape index: {}]   ;;  %s4248_s6 = inlined_call_operand.hbm [shape: f32[64,128], index: 6, kind: input, shape index: {}]   ;;  %s4249_s7 = inlined_call_operand.vmem [shape: f32[1,128], index: 7, kind: input, shape index: {}]   ;;  %s4250_s8 = inlined_call_operand.vmem [shape: f32[1,128], index: 8, kind: input, shape index: {}]   ;;  %s4251_s9 = inlined_call_operand.vmem [shape: bf16[128,128], index: 9, kind: input, shape index: {}]   ;;  %s4252_s10 = inlined_call_operand.hbm [shape: bf16[128,256], index: 10, kind: input, shape index: {}]   ;;  %s4253_s11 = inlined_call_operand.hbm [shape: bf16[128,128], index: 11, kind: input, shape index: {}]   ;;  %s4254_s12 = inlined_call_operand.vmem [shape: f32[1,128], index: 12, kind: input, shape index: {}]   ;;  %s4255_s13 = inlined_call_operand.vmem [shape: f32[2,64,128], index: 13, kind: output, shape index: {}]  }
   0x1   :  { %4261 = sst [smem:[#allocation14_spill]] %s4255_s13 }
   0x2   :  { %18 = vsyncpa [#allocation3], 0 }
   0x3   :  { %19 = vsyncpa [#allocation5], 0 }
   0x4   :  { %20 = vsyncpa [#allocation8], 0  ;;  %s3582_s25 = smov 0  }
   0x5 LB: > { %4262 = sst [smem:[#allocation13_spill]] %s3496_s25  ;;  %s3498_s26 = smov [#allocation4]   ;;  %s3496_s25 = sphi %s3582_s25, %s26_s25  }
   0x6   : > { %s366_s27 = sshll.u32 %s3498_s26, 4  ;;  %s3588_s28 = sadd.s32 4294967295, %s3496_s25   ;;  %s3593_s27 = int_to_ptr.vmem [resolvable:$true] %s366_s27 }
   0x7   : > { %p2519_p0 = scmp.ge.s32.totalorder %s3496_s25, 1  ;;  %p335_p1 = scmp.lt.s32.totalorder %s3496_s25, 3 }
   0x8   : > { %p4259_p2 = scmp.eq.s32.totalorder %s3588_s28, 0  ;;  %s3499_s14 = smov [#allocation7]  }
   0x9   : > { %p3595_p3 = pnand %p2519_p0, %p335_p1  ;;  %s404_s15 = sshll.u32 %s3499_s14, 4  ;;  %s3607_s15 = int_to_ptr.vmem [resolvable:$true] %s404_s15 }
   0xa   : > { %s3500_s16 = smov [#allocation2]   ;;  %s3338_s20 = scalar_lea.hbm %s4246_s4, 512 }
   0xb   : > { %s4263_s29 = scalar_select %p3595_p3, 1, 0 }
   0xc   : > { %p3124_p4 = pneg %p3595_p3  ;;  %s347_s17 = sshll.u32 %s3500_s16, 4  ;;  %s3609_s17 = int_to_ptr.vmem [resolvable:$true] %s347_s17 }
   0xd   : > { %p3339_p6 = scmp.ne.s32.totalorder %s4246_s4, %s3338_s20  ;;  %p3345_p10 = scmp.lt.u32.totalorder %s3338_s20, %s4246_s4 }
   0xe   : > { %p3603_p5 = pnand %p4259_p2, %p3124_p4 }
  0x10   : > { %p3619_p7 = pneg %p3603_p5 }
  0x12   : > { %p3341_p8 = pnand %p3619_p7, %p3339_p6 }
  0x14   : > { %p3342_p9 = pneg %p3341_p8 }
  0x16   : > { %p3347_p11 = pnand %p3345_p10, %p3342_p9 }
  0x18   : > { %3350 = shalt.err (!%p3347_p11)
}
  0x19   : > { %s3351_s14 = scalar_lea.vmem %s3593_s27, 512  ;;  %p3359_p1 = scmp.lt.s32.totalorder %s3593_s27, %s3593_s27 }
  0x1a   : > { %p3352_p12 = scmp.ne.s32.totalorder %s3593_s27, %s3351_s14  ;;  %p3360_p4 = scmp.lt.s32.totalorder %s3351_s14, %s3351_s14 }
  0x1c   : > { %p3354_p13 = pnand %p3352_p12, %p3619_p7  ;;  %p3361_p6 = por %p3360_p4, %p3359_p1 }
  0x1e   : > { %p3355_p0 = pneg %p3354_p13 }
  0x20   : > { %p3362_p8 = pnand %p3361_p6, %p3355_p0 }
  0x22   : > { %3365 = shalt.err (!%p3362_p8)
}
  0x23   : > { %s4257_s16 = smov 64   ;;  %s4258_s18 = smov 4  }
  0x24   : > { %3130 = dma.hbm_to_vmem [thread:$0]  (!%p3603_p5), %s4246_s4, 512, %s3593_s27, [#allocation5], %s4257_s16, %s4257_s16, %s4258_s18  }
  0x25   : > { %s3366_s24 = scalar_lea.hbm %s4252_s10, 2048 }
  0x26   : > { %p3367_p9 = scmp.ne.s32.totalorder %s4252_s10, %s3366_s24  ;;  %p3373_p12 = scmp.lt.u32.totalorder %s3366_s24, %s4252_s10 }
  0x28   : > { %p3369_p10 = pnand %p3367_p9, %p3619_p7 }
  0x2a   : > { %p3370_p11 = pneg %p3369_p10 }
  0x2c   : > { %p3375_p13 = pnand %p3373_p12, %p3370_p11 }
  0x2e   : > { %3378 = shalt.err (!%p3375_p13)
}
  0x2f   : > { %s3379_s27 = scalar_lea.vmem %s3607_s15, 2048  ;;  %p3387_p6 = scmp.lt.s32.totalorder %s3607_s15, %s3607_s15 }
  0x30   : > { %p3380_p0 = scmp.ne.s32.totalorder %s3607_s15, %s3379_s27  ;;  %p3388_p8 = scmp.lt.s32.totalorder %s3379_s27, %s3379_s27 }
  0x32   : > { %p3382_p1 = pnand %p3380_p0, %p3619_p7  ;;  %p3389_p9 = por %p3388_p8, %p3387_p6 }
  0x34   : > { %p3383_p4 = pneg %p3382_p1 }
  0x36   : > { %p3390_p10 = pnand %p3389_p9, %p3383_p4 }
  0x38   : > { %3393 = shalt.err (!%p3390_p10)
}
  0x39   : > { %s3503_s19 = smov 128   ;;  %s3504_s13 = smov 8  }
  0x3a   : > { %3136 = dma.hbm_to_vmem [thread:$0]  (!%p3603_p5), %s4252_s10, 2048, %s3607_s15, [#allocation8], %s3503_s19, %s3503_s19, %s3504_s13  }
  0x3b   : > { %s3394_s24 = scalar_lea.hbm %s4243_s1, 1024 }
  0x3c   : > { %p3395_p11 = scmp.ne.s32.totalorder %s4243_s1, %s3394_s24  ;;  %p3401_p0 = scmp.lt.u32.totalorder %s3394_s24, %s4243_s1 }
  0x3e   : > { %p3397_p12 = pnand %p3395_p11, %p3619_p7 }
  0x40   : > { %p3398_p13 = pneg %p3397_p12 }
  0x42   : > { %p3403_p1 = pnand %p3401_p0, %p3398_p13 }
  0x44   : > { %3406 = shalt.err (!%p3403_p1)
}
  0x45   : > { %s3407_s15 = scalar_lea.vmem %s3609_s17, 1024  ;;  %p3415_p9 = scmp.lt.s32.totalorder %s3609_s17, %s3609_s17 }
  0x46   : > { %p3408_p4 = scmp.ne.s32.totalorder %s3609_s17, %s3407_s15  ;;  %p3416_p10 = scmp.lt.s32.totalorder %s3407_s15, %s3407_s15 }
  0x48   : > { %p3410_p6 = pnand %p3408_p4, %p3619_p7  ;;  %p3417_p11 = por %p3416_p10, %p3415_p9 }
  0x4a   : > { %p3411_p8 = pneg %p3410_p6 }
  0x4c   : > { %p3418_p12 = pnand %p3417_p11, %p3411_p8 }
  0x4e   : > { %3421 = shalt.err (!%p3418_p12)
}
  0x4f   : > { %3127 = dma.hbm_to_vmem [thread:$0]  (!%p3603_p5), %s4243_s1, 1024, %s3609_s17, [#allocation3], %s3503_s19, %s3503_s19, %s3504_s13  }
  0x50   : > { %s3505_s20 = smov [#allocation6]   ;;  %s3506_s22 = smov [#allocation9]  }
  0x51   : > { %s382_s21 = sshll.u32 %s3505_s20, 4  ;;  %s417_s24 = sshll.u32 %s3506_s22, 4  ;;  %s383_s21 = int_to_ptr.vmem [resolvable:$true] %s382_s21  ;;  %s3695_s24 = int_to_ptr.vmem [resolvable:$true] %s417_s24 }
  0x52   : > { %s3422_s27 = scalar_lea.hbm %s4248_s6, 1024 }
  0x53   : > { %p3423_p13 = scmp.ne.s32.totalorder %s4248_s6, %s3422_s27  ;;  %p3429_p4 = scmp.lt.u32.totalorder %s3422_s27, %s4248_s6 }
  0x55   : > { %p3425_p0 = pnand %p3423_p13, %p3619_p7 }
  0x57   : > { %p3426_p1 = pneg %p3425_p0 }
  0x59   : > { %p3431_p6 = pnand %p3429_p4, %p3426_p1 }
  0x5b   : > { %3434 = shalt.err (!%p3431_p6)
}
  0x5c   : > { %s3435_s25 = scalar_lea.vmem %s383_s21, 1024  ;;  %p3443_p11 = scmp.lt.s32.totalorder %s383_s21, %s383_s21 }
  0x5d   : > { %p3436_p8 = scmp.ne.s32.totalorder %s383_s21, %s3435_s25  ;;  %p3444_p12 = scmp.lt.s32.totalorder %s3435_s25, %s3435_s25 }
  0x5f   : > { %p3438_p9 = pnand %p3436_p8, %p3619_p7  ;;  %p3445_p2 = por %p3444_p12, %p3443_p11 }
  0x61   : > { %p3439_p10 = pneg %p3438_p9 }
  0x63   : > { %p3446_p3 = pnand %p3445_p2, %p3439_p10 }
  0x65   : > { %3449 = shalt.err (!%p3446_p3)
}
  0x66   : > { %3133 = dma.hbm_to_vmem [thread:$0]  (!%p3603_p5), %s4248_s6, 1024, %s383_s21, [#allocation5], %s3503_s19, %s3503_s19, %s3504_s13  }
  0x67   : > { %s3450_s14 = scalar_lea.hbm %s4253_s11, 1024 }
  0x68   : > { %p3451_p13 = scmp.ne.s32.totalorder %s4253_s11, %s3450_s14  ;;  %p3457_p0 = scmp.lt.u32.totalorder %s3450_s14, %s4253_s11 }
  0x6a   : > { %p3453_p2 = pnand %p3451_p13, %p3619_p7 }
  0x6c   : > { %p3454_p3 = pneg %p3453_p2 }
  0x6e   : > { %p3459_p1 = pnand %p3457_p0, %p3454_p3 }
  0x70   : > { %3462 = shalt.err (!%p3459_p1)
}
  0x71   : > { %s3463_s19 = scalar_lea.vmem %s3695_s24, 1024  ;;  %p3471_p9 = scmp.lt.s32.totalorder %s3695_s24, %s3695_s24 }
  0x72   : > { %p3464_p4 = scmp.ne.s32.totalorder %s3695_s24, %s3463_s19  ;;  %p3472_p10 = scmp.lt.s32.totalorder %s3463_s19, %s3463_s19 }
  0x74   : > { %p3466_p6 = pnand %p3464_p4, %p3619_p7  ;;  %p3473_p11 = por %p3472_p10, %p3471_p9 }
  0x76   : > { %p3467_p8 = pneg %p3466_p6 }
  0x78   : > { %p3474_p12 = pnand %p3473_p11, %p3467_p8 }
  0x7a   : > { %3477 = shalt.err (!%p3474_p12)
}
  0x7b   : > { %s4266_s13 = smov 4   ;;  %s4267_s21 = smov 64  }
  0x7c   : > { %3139 = dma.hbm_to_vmem [thread:$0]  (!%p3603_p5), %s4253_s11, 1024, %s3695_s24, [#allocation8], %s4267_s21, %s4267_s21, %s4266_s13  }
  0x7d   : > { %p4268_p13 = scmp.ne.s32.totalorder %s4263_s29, 0 }
  0x7e   : > { %p4269_p7 = scmp.eq.s32.totalorder (!%p4268_p13), %s3588_s28, 0 }
  0x7f   : > { %444 = sbr.rel (%p4268_p13) target bundleno = 3082 (0xc0a), region = 72 }
  0x86   : > { %3483 = dma.done.wait (%p4269_p7), [#allocation3], 1024   ;;  %p4270_p2 = pmov %p4269_p7 }
  0x88   : > { %3485 = vsyncadd (%p4270_p2), [#allocation3], 4294966272  ;;  %p4271_p3 = pmov %p4270_p2 }
  0x89   : > { %p4272_p0 = pmov %p4270_p2 }
  0x8a   : > { %3487 = dma.done.wait (%p4271_p3), [#allocation5], 1536  }
  0x8b   : > { %3489 = vsyncadd (%p4272_p0), [#allocation5], 4294965760  ;;  %p4273_p1 = pmov %p4272_p0 }
  0x8c   : > { %p4274_p5 = pmov %p4272_p0 }
  0x8d   : > { %3491 = dma.done.wait (%p4273_p1), [#allocation8], 3072  }
  0x8e   : > { %3493 = vsyncadd (%p4274_p5), [#allocation8], 4294964224  ;;  %p504_p4 = scmp.lt.s32.totalorder %s3588_s28, 1  ;;  %v3507_v0 = vmov 0.0|0.0   ;;  %vm3508_vm0 = vmmov 0   ;;  %v3509_v1 = vmov 0.0   ;;  %v628_v44 = vlaneseq }
  0x8f   : > { %2984 = vmatprep.subr.bf16.mxu0 %v3507_v0  ;;  %2778 = vmatprep.mubr.msk.f32.mxu0 %vm3508_vm0, %v3509_v1  ;;  %v547_v2 = vld [vmem:[#allocation2] sm:$0xff]  ;;  %v548_v3 = vld [vmem:[#allocation2 + $0x8] sm:$0xff]  ;;  %v549_v4 = vld [vmem:[#allocation2 + $0x10] sm:$0xff]  ;;  %vm523_vm1 = vcmask 523264   ;;  %s3511_s21 = smov 64  }
  0x90   : > { %s4280_s28 = smov (!%p504_p4, %s3588_s28), 1  ;;  %2996 = vmatprep.subr.bf16.mxu1 %v3507_v0  ;;  %2797 = vmatprep.mubr.msk.f32.mxu1 %vm3508_vm0, %v3509_v1  ;;  %v2985_v5 = vpack.c.bf16 %v548_v3, %v547_v2  ;;  %v550_v6 = vld [vmem:[#allocation2 + $0x18] sm:$0xff]  ;;  %v551_v13 = vld [vmem:[#allocation2 + $0x20] sm:$0xff]  ;;  %v552_v14 = vld [vmem:[#allocation2 + $0x28] sm:$0xff]  ;;  %v629_v45 = vshrl.u32 %v628_v44, 7 }
  0x91   : > { %s2642_s29 = sshll.u32 %s4280_s28, 6  ;;  %v2988_v8 = vpack.c.bf16 %v550_v6, %v549_v4  ;;  %v553_v20 = vld [vmem:[#allocation2 + $0x30] sm:$0xff]  ;;  %v554_v21 = vld [vmem:[#allocation2 + $0x38] sm:$0xff]  ;;  %v2991_v23 = vpack.c.bf16 %v552_v14, %v551_v13  ;;  %vm3923_vm2 = vmpackc.low %vm523_vm1, %vm523_vm1 }
  0x92   : > { %s3768_s24 = scalar_lea.vmem %s4242_s0, %s2642_s29  ;;  %2986 = vmatpush3.bf16.msra.mxu0 %v2985_v5  ;;  %2998 = vmatpush3.bf16.msra.mxu1 %v2985_v5  ;;  %v2994_v30 = vpack.c.bf16 %v554_v21, %v553_v20  ;;  %v630_v46 = vsub.s32 0, %v629_v45 }
  0x93   : > { %v515_v7 = vld [vmem:[%s3768_s24] sm:$0xff]  ;;  %v516_v9 = vld [vmem:[%s3768_s24 + $0x8] sm:$0xff]  ;;  %v517_v10 = vld [vmem:[%s3768_s24 + $0x10] sm:$0xff]  ;;  %2987 = vmatprep.subr.bf16.mxu0 %v3507_v0  ;;  %2999 = vmatprep.subr.bf16.mxu1 %v3507_v0 }
  0x94   : > { %v518_v11 = vld [vmem:[%s3768_s24 + $0x18] sm:$0xff]  ;;  %v524_v12 = vsel %vm523_vm1, %v515_v7, 0.0  ;;  %v525_v15 = vsel %vm523_vm1, %v516_v9, 0.0  ;;  %v527_v16 = vsel %vm523_vm1, %v517_v10, 0.0  ;;  %v519_v17 = vld [vmem:[%s3768_s24 + $0x20] sm:$0xff]  ;;  %v520_v18 = vld [vmem:[%s3768_s24 + $0x28] sm:$0xff] }
  0x95   : > { %v526_v19 = vadd.f32 %v525_v15, %v524_v12  ;;  %v529_v22 = vsel %vm523_vm1, %v518_v11, 0.0  ;;  %v521_v24 = vld [vmem:[%s3768_s24 + $0x30] sm:$0xff]  ;;  %v531_v26 = vsel %vm523_vm1, %v519_v17, 0.0  ;;  %v522_v27 = vld [vmem:[%s3768_s24 + $0x38] sm:$0xff]  ;;  %v533_v29 = vsel %vm523_vm1, %v520_v18, 0.0  ;;  %s4277_s24 = sld [smem:[#allocation14_spill]] }
  0x96   : > { %2989 = vmatpush3.bf16.msra.mxu0 %v2988_v8  ;;  %3001 = vmatpush3.bf16.msra.mxu1 %v2988_v8  ;;  %v535_v32 = vsel %vm523_vm1, %v521_v24, 0.0  ;;  %v537_v34 = vsel %vm523_vm1, %v522_v27, 0.0 }
  0x97   : > { %v528_v25 = vadd.f32 %v527_v16, %v526_v19  ;;  %2990 = vmatprep.subr.bf16.mxu0 %v3507_v0  ;;  %3002 = vmatprep.subr.bf16.mxu1 %v3507_v0 }
  0x99   : > { %v530_v28 = vadd.f32 %v529_v22, %v528_v25  ;;  %v3213_v25 = vld [vmem:[#allocation4 + $0x8] sm:$0xff]  }
  0x9a   : > { %2992 = vmatpush3.bf16.msra.mxu0 %v2991_v23  ;;  %3004 = vmatpush3.bf16.msra.mxu1 %v2991_v23 }
  0x9b   : > { %v532_v31 = vadd.f32 %v531_v26, %v530_v28  ;;  %2993 = vmatprep.subr.bf16.mxu0 %v3507_v0  ;;  %3005 = vmatprep.subr.bf16.mxu1 %v3507_v0  ;;  %v3214_v26 = vld [vmem:[#allocation4 + $0x10] sm:$0xff]   ;;  %s4222_s20 = scalar_lea.vmem %s4277_s24, %s2642_s29 }
  0x9d   : > { %v534_v33 = vadd.f32 %v533_v29, %v532_v31 }
  0x9e   : > { %2995 = vmatpush3.bf16.msra.mxu0 %v2994_v30  ;;  %3007 = vmatpush3.bf16.msra.mxu1 %v2994_v30 }
  0x9f   : > { %v536_v35 = vadd.f32 %v535_v32, %v534_v33  ;;  %v2538_v33 = vld [vmem:[%s4244_s2] ss:$0 sm:$0xff] }
  0xa1   : > { %v538_v36 = vadd.f32 %v537_v34, %v536_v35 }
  0xa3   : > { %v539_v37 = vrot.slane %v538_v36, 4 }
  0xa5   : > { %v540_v38 = vadd.f32 %v539_v37, %v538_v36 }
  0xa7   : > { %v541_v39 = vrot.slane %v540_v38, 2 }
  0xa9   : > { %v542_v40 = vadd.f32 %v541_v39, %v540_v38  ;;  %v2539_v38 = vld [vmem:[%s4245_s3] ss:$0 sm:$0xff] }
  0xab   : > { %v543_v41 = vrot.slane %v542_v40, 1 }
  0xad   : > { %v544_v42 = vadd.f32 %v543_v41, %v542_v40 }
  0xaf   : > { %v546_v43 = vmul.f32 0.015625, %v544_v42 }
  0xb1   : > { %2779 = vmatmul.mubr.msk.f32.vlgmr.msra.gmra.mrb[0].mxu0 %vm523_vm1, %v546_v43 }
 0x184   : > { %v624_v47 = vpop.f32.mrb[0].mxu0 }
 0x185   : > { %v631_v48 = vrot.slane %v624_v47, %v630_v46  ;;  %v2780_v49 = vpop.f32.mrb[1].mxu0 }
 0x187   : > { %v632_v50 = vsub.f32 %v515_v7, %v631_v48  ;;  %v633_v51 = vsub.f32 %v516_v9, %v631_v48  ;;  %v634_v52 = vsub.f32 %v517_v10, %v631_v48  ;;  %v635_v53 = vsub.f32 %v518_v11, %v631_v48 }
 0x188   : > { %v636_v54 = vsub.f32 %v519_v17, %v631_v48  ;;  %v637_v58 = vsub.f32 %v520_v18, %v631_v48  ;;  %v638_v63 = vsub.f32 %v521_v24, %v631_v48  ;;  %v639_v3 = vsub.f32 %v522_v27, %v631_v48  ;;  %v3212_v24 = vld [vmem:[#allocation4] sm:$0xff]   ;;  %v3215_v27 = vld [vmem:[#allocation4 + $0x18] sm:$0xff]  }
 0x189   : > { %v640_v55 = vmul.f32 %v632_v50, %v632_v50  ;;  %v641_v56 = vmul.f32 %v633_v51, %v633_v51  ;;  %v642_v57 = vmul.f32 %v634_v52, %v634_v52  ;;  %v643_v59 = vmul.f32 %v635_v53, %v635_v53  ;;  %2800 = vmatprep.subr.bf16.mxu0 %v3212_v24 }
 0x18a   : > { %v644_v0 = vmul.f32 %v636_v54, %v636_v54  ;;  %v645_v4 = vmul.f32 %v637_v58, %v637_v58  ;;  %v646_v7 = vmul.f32 %v638_v63, %v638_v63  ;;  %v647_v10 = vmul.f32 %v639_v3, %v639_v3  ;;  %2801 = vmatpush3.bf16.msra.mxu0 %v3212_v24 }
 0x18b   : > { %v648_v60 = vsel %vm523_vm1, %v640_v55, 0.0  ;;  %v649_v61 = vsel %vm523_vm1, %v641_v56, 0.0  ;;  %v651_v1 = vsel %vm523_vm1, %v642_v57, 0.0  ;;  %v653_v5 = vsel %vm523_vm1, %v643_v59, 0.0  ;;  %2802 = vmatprep.subr.bf16.mxu0 %v3213_v25 }
 0x18c   : > { %v650_v62 = vadd.f32 %v649_v61, %v648_v60  ;;  %v655_v8 = vsel %vm523_vm1, %v644_v0, 0.0  ;;  %v657_v11 = vsel %vm523_vm1, %v645_v4, 0.0  ;;  %v659_v13 = vsel %vm523_vm1, %v646_v7, 0.0  ;;  %v906_v4 = vld [vmem:[#allocation6] sm:$0xff] }
 0x18d   : > { %v661_v15 = vsel %vm523_vm1, %v647_v10, 0.0 }
 0x18e   : > { %v652_v2 = vadd.f32 %v651_v1, %v650_v62  ;;  %2803 = vmatpush3.bf16.msra.mxu0 %v3213_v25  ;;  %v908_v1 = vld [vmem:[#allocation6 + $0x10] sm:$0xff] }
 0x18f   : > { %2804 = vmatprep.subr.bf16.mxu0 %v3214_v26 }
 0x190   : > { %v654_v6 = vadd.f32 %v653_v5, %v652_v2 }
 0x192   : > { %v656_v9 = vadd.f32 %v655_v8, %v654_v6  ;;  %2805 = vmatpush3.bf16.msra.mxu0 %v3214_v26  ;;  %v912_v26 = vld [vmem:[#allocation6 + $0x30] sm:$0xff] }
 0x193   : > { %2806 = vmatprep.subr.bf16.mxu0 %v3215_v27 }
 0x194   : > { %v658_v12 = vadd.f32 %v657_v11, %v656_v9  ;;  %v909_v11 = vld [vmem:[#allocation6 + $0x18] sm:$0xff] }
 0x196   : > { %v660_v14 = vadd.f32 %v659_v13, %v658_v12  ;;  %2807 = vmatpush3.bf16.msra.mxu0 %v3215_v27  ;;  %v907_v13 = vld [vmem:[#allocation6 + $0x8] sm:$0xff] }
 0x198   : > { %v662_v16 = vadd.f32 %v661_v15, %v660_v14 }
 0x19a   : > { %v663_v17 = vrot.slane %v662_v16, 4 }
 0x19c   : > { %v664_v18 = vadd.f32 %v663_v17, %v662_v16 }
 0x19e   : > { %v665_v19 = vrot.slane %v664_v18, 2 }
 0x1a0   : > { %v666_v20 = vadd.f32 %v665_v19, %v664_v18  ;;  %v910_v18 = vld [vmem:[#allocation6 + $0x20] sm:$0xff] }
 0x1a2   : > { %v667_v21 = vrot.slane %v666_v20, 1 }
 0x1a4   : > { %v668_v22 = vadd.f32 %v667_v21, %v666_v20 }
 0x1a6   : > { %v669_v23 = vmul.f32 0.015625, %v668_v22  ;;  %v911_v22 = vld [vmem:[#allocation6 + $0x28] sm:$0xff] }
 0x1a8   : > { %2798 = vmatmul.mubr.msk.f32.vlgmr.msra.gmra.mrb[0].mxu1 %vm523_vm1, %v669_v23 }
 0x27b   : > { %v739_v28 = vpop.f32.mrb[0].mxu1 }
 0x27c   : > { %v740_v29 = vadd.f32 1e-06, %v739_v28  ;;  %v2799_v30 = vpop.f32.mrb[1].mxu1 }
 0x27e   : > { %3256 = vrsqrt.f32 %v740_v29  ;;  %v913_v29 = vld [vmem:[#allocation6 + $0x38] sm:$0xff] }
 0x288   : > { %v3257_v31 = vpop.eup %3256 }
 0x289   : > { %v747_v32 = vrot.slane %v3257_v31, %v630_v46 }
 0x28b   : > { %v748_v34 = vmul.f32 %v747_v32, %v632_v50  ;;  %v749_v35 = vmul.f32 %v747_v32, %v633_v51  ;;  %v750_v36 = vmul.f32 %v747_v32, %v634_v52  ;;  %v751_v37 = vmul.f32 %v747_v32, %v635_v53 }
 0x28c   : > { %v752_v39 = vmul.f32 %v747_v32, %v636_v54  ;;  %v753_v40 = vmul.f32 %v747_v32, %v637_v58  ;;  %v754_v47 = vmul.f32 %v747_v32, %v638_v63  ;;  %v755_v48 = vmul.f32 %v747_v32, %v639_v3  ;;  %v2540_v63 = vld [vmem:[%s4247_s5] ss:$0 sm:$0xff] }
 0x28d   : > { %v763_v41 = vmul.f32 %v2538_v33, %v748_v34  ;;  %v764_v42 = vmul.f32 %v2538_v33, %v749_v35  ;;  %v765_v43 = vmul.f32 %v2538_v33, %v750_v36  ;;  %v766_v44 = vmul.f32 %v2538_v33, %v751_v37  ;;  %v3216_v32 = vld [vmem:[#allocation7] ss:$8 sps:$4 sm:$0xff]   ;;  %v3222_v35 = vld [vmem:[#allocation7 + $0x14] ss:$8 sps:$4 sm:$0xff]   ;;  %v3220_v36 = vld [vmem:[#allocation7 + $0x10] ss:$8 sps:$4 sm:$0xff]  }
 0x28e   : > { %v767_v45 = vmul.f32 %v2538_v33, %v752_v39  ;;  %v768_v46 = vmul.f32 %v2538_v33, %v753_v40  ;;  %v769_v59 = vmul.f32 %v2538_v33, %v754_v47  ;;  %v770_v60 = vmul.f32 %v2538_v33, %v755_v48  ;;  %v3218_v33 = vld [vmem:[#allocation7 + $0x4] ss:$8 sps:$4 sm:$0xff]  }
 0x28f   : > { %v778_v49 = vadd.f32 %v2539_v38, %v763_v41  ;;  %v779_v55 = vadd.f32 %v2539_v38, %v764_v42  ;;  %v780_v50 = vadd.f32 %v2539_v38, %v765_v43  ;;  %v781_v51 = vadd.f32 %v2539_v38, %v766_v44  ;;  %v3219_v34 = vld [vmem:[%s4251_s9] sm:$0xff]   ;;  %1270 = vmatprep.subr.bf16.mxu0 %v3218_v33 }
 0x290   : > { %v782_v52 = vadd.f32 %v2539_v38, %v767_v45  ;;  %v783_v53 = vadd.f32 %v2539_v38, %v768_v46  ;;  %v784_v58 = vadd.f32 %v2539_v38, %v769_v59  ;;  %v785_v61 = vadd.f32 %v2539_v38, %v770_v60  ;;  %2816 = vmatprep.subr.bf16.mxu1 %v3219_v34 }
 0x291   : > { %v786_v56 = vpack.c.bf16 %v779_v55, %v778_v49  ;;  %v787_v57 = vpack.c.bf16 %v781_v51, %v780_v50  ;;  %2817 = vmatpush3.bf16.msra.mxu1 %v3219_v34 }
 0x292   : > { %v788_v54 = vpack.c.bf16 %v783_v53, %v782_v52  ;;  %v789_v62 = vpack.c.bf16 %v785_v61, %v784_v58 }
 0x293   : > { %2808 = vmatprep.mubr.msk.bf16.mxu0 %vm523_vm1, %v786_v56 }
 0x294   : > { %2809 = vmatmul.mubr.msk.bf16.vlgmr.msra.gmra.mrb[4].mxu0 %vm523_vm1, %v787_v57 }
 0x295   : > { %2812 = vmatprep.mubr.msk.bf16.mxu0 %vm523_vm1, %v788_v54  ;;  %1271 = vmatpush1.bf16.msra.mxu0 %v3216_v32  ;;  %v3247_v32 = vld [vmem:[%s4251_s9 + $0x38] sm:$0xff]  }
 0x296   : > { %1272 = vmatprep.subr.bf16.mxu0 %v3222_v35 }
 0x299   : > { %1273 = vmatpush1.bf16.msra.mxu0 %v3220_v36 }
 0x29c   : > { %2813 = vmatmul.mubr.msk.bf16.gmra.mrb[8].mxu0 %vm523_vm1, %v789_v62 }
 0x367   : > { %v2810_v0 = vpop.f32.mrb[4].mxu0 }
 0x368   : > { %v884_v2 = vadd.f32 %v2810_v0, %v2540_v63  ;;  %v875_v3 = vpop.f32.mrb[5].mxu0 }
 0x369   : > { %v876_v5 = vadd.f32 %v2540_v63, %v875_v3  ;;  %v2811_v6 = vpop.f32.mrb[6].mxu0 }
 0x36a   : > { %v3809_v7 = vadd.f32 %v908_v1, %v884_v2  ;;  %v887_v8 = vadd.f32 %v2811_v6, %v2540_v63  ;;  %v878_v9 = vpop.f32.mrb[7].mxu0  ;;  %v3226_v6 = vld [vmem:[#allocation7 + $0x24] ss:$8 sps:$4 sm:$0xff]  }
 0x36b   : > { %v3811_v10 = vadd.f32 %v906_v4, %v876_v5  ;;  %v879_v12 = vadd.f32 %v2540_v63, %v878_v9  ;;  %v3223_v5 = vld [vmem:[%s4251_s9 + $0x8] sm:$0xff]   ;;  %1274 = vmatprep.subr.bf16.mxu0 %v3226_v6  ;;  %v3227_v9 = vld [vmem:[%s4251_s9 + $0x10] sm:$0xff]  }
 0x36c   : > { %926 = vadd.xlane.f32.xlu1 %v3809_v7  ;;  %v3815_v14 = vadd.f32 %v909_v11, %v887_v8  ;;  %v3224_v8 = vld [vmem:[#allocation7 + $0x20] ss:$8 sps:$4 sm:$0xff]   ;;  %2818 = vmatprep.subr.bf16.mxu1 %v3223_v5  ;;  %v3230_v11 = vld [vmem:[#allocation7 + $0x34] ss:$8 sps:$4 sm:$0xff]  }
 0x36d   : > { %922 = vadd.xlane.f32.xlu0 %v3811_v10  ;;  %v3817_v15 = vadd.f32 %v907_v13, %v879_v12  ;;  %2819 = vmatpush3.bf16.msra.mxu1 %v3223_v5  ;;  %v3228_v12 = vld [vmem:[#allocation7 + $0x30] ss:$8 sps:$4 sm:$0xff]  }
 0x36e   : > { %1275 = vmatpush1.bf16.msra.mxu0 %v3224_v8  ;;  %2820 = vmatprep.subr.bf16.mxu1 %v3227_v9  ;;  %v3231_v13 = vld [vmem:[%s4251_s9 + $0x18] sm:$0xff]  }
 0x36f   : > { %v2814_v16 = vpop.f32.mrb[8].mxu0  ;;  %1276 = vmatprep.subr.bf16.mxu0 %v3230_v11 }
 0x370   : > { %928 = vadd.xlane.f32.xlu1 %v3815_v14  ;;  %v891_v17 = vpop.f32.mrb[9].mxu0  ;;  %v900_v23 = vadd.f32 %v2814_v16, %v2540_v63  ;;  %v3234_v16 = vld [vmem:[#allocation7 + $0x44] ss:$8 sps:$4 sm:$0xff]  }
 0x371   : > { %v892_v19 = vadd.f32 %v2540_v63, %v891_v17  ;;  %v2815_v20 = vpop.f32.mrb[10].mxu0  ;;  %924 = vadd.xlane.f32.xlu0 %v3817_v15  ;;  %2821 = vmatpush3.bf16.msra.mxu1 %v3227_v9  ;;  %v3232_v17 = vld [vmem:[#allocation7 + $0x40] ss:$8 sps:$4 sm:$0xff]  }
 0x372   : > { %v894_v21 = vpop.f32.mrb[11].mxu0  ;;  %v903_v27 = vadd.f32 %v2815_v20, %v2540_v63  ;;  %v3826_v30 = vadd.f32 %v912_v26, %v900_v23  ;;  %1277 = vmatpush1.bf16.msra.mxu0 %v3228_v12  ;;  %2822 = vmatprep.subr.bf16.mxu1 %v3231_v13  ;;  %v3236_v20 = vld [vmem:[#allocation7 + $0x50] ss:$8 sps:$4 sm:$0xff]   ;;  %v3240_v23 = vld [vmem:[#allocation7 + $0x60] ss:$8 sps:$4 sm:$0xff]  }
 0x373   : > { %v3821_v24 = vadd.f32 %v910_v18, %v892_v19  ;;  %v895_v25 = vadd.f32 %v2540_v63, %v894_v21  ;;  %1278 = vmatprep.subr.bf16.mxu0 %v3234_v16  ;;  %v3235_v18 = vld [vmem:[%s4251_s9 + $0x20] sm:$0xff]   ;;  %v3238_v19 = vld [vmem:[#allocation7 + $0x54] ss:$8 sps:$4 sm:$0xff]   ;;  %v3239_v21 = vld [vmem:[%s4251_s9 + $0x28] sm:$0xff]  }
 0x374   : > { %v3829_v31 = vadd.f32 %v913_v29, %v903_v27  ;;  %v3244_v26 = vld [vmem:[#allocation7 + $0x70] ss:$8 sps:$4 sm:$0xff]   ;;  %v3246_v27 = vld [vmem:[#allocation7 + $0x74] ss:$8 sps:$4 sm:$0xff]   ;;  %v3510_v29 = vmov 0  }
 0x375   : > { %v3823_v28 = vadd.f32 %v911_v22, %v895_v25  ;;  %930 = vadd.xlane.f32.xlu0 %v3821_v24  ;;  %2823 = vmatpush3.bf16.msra.mxu1 %v3231_v13  ;;  %v3242_v22 = vld [vmem:[#allocation7 + $0x64] ss:$8 sps:$4 sm:$0xff]   ;;  %v3243_v25 = vld [vmem:[%s4251_s9 + $0x30] sm:$0xff]  }
 0x376   : > { %1279 = vmatpush1.bf16.msra.mxu0 %v3232_v17  ;;  %2824 = vmatprep.subr.bf16.mxu1 %v3235_v18 }
 0x377   : > { %932 = vadd.xlane.f32.xlu1 %v3823_v28  ;;  %1280 = vmatprep.subr.bf16.mxu0 %v3238_v19 }
 0x378   : > { %1302 = vmatprep.mubr.bf16.mxu0 %v3510_v29 }
 0x379   : > { %934 = vadd.xlane.f32.xlu0 %v3826_v30  ;;  %2825 = vmatpush3.bf16.msra.mxu1 %v3235_v18 }
 0x37a   : > { %1281 = vmatpush1.bf16.msra.mxu0 %v3236_v20  ;;  %2826 = vmatprep.subr.bf16.mxu1 %v3239_v21 }
 0x37b   : > { %936 = vadd.xlane.f32.xlu1 %v3829_v31  ;;  %1282 = vmatprep.subr.bf16.mxu0 %v3242_v22 }
 0x37d   : > { %2827 = vmatpush3.bf16.msra.mxu1 %v3239_v21 }
 0x37e   : > { %1283 = vmatpush1.bf16.msra.mxu0 %v3240_v23  ;;  %2828 = vmatprep.subr.bf16.mxu1 %v3243_v25 }
 0x37f   : > { %1284 = vmatprep.subr.bf16.mxu0 %v3246_v27 }
 0x381   : > { %2829 = vmatpush3.bf16.msra.mxu1 %v3243_v25 }
 0x382   : > { %1285 = vmatpush1.bf16.msra.mxu0 %v3244_v26  ;;  %2830 = vmatprep.subr.bf16.mxu1 %v3247_v32 }
 0x385   : > { %2831 = vmatpush3.bf16.msra.mxu1 %v3247_v32 }
 0x3f9   : > { %v927_v37 = vpop.xlane.xlu1 %926 }
 0x3fa   : > { %v923_v38 = vpop.xlane.xlu0 %922  ;;  %v941_v39 = vmul.f32 0.0078125, %v927_v37 }
 0x3fb   : > { %v939_v40 = vmul.f32 0.0078125, %v923_v38 }
 0x3fc   : > { %v3840_v44 = vsub.f32 %v3809_v7, %v941_v39 }
 0x3fd   : > { %v3837_v41 = vsub.f32 %v3811_v10, %v939_v40  ;;  %v929_v42 = vpop.xlane.xlu1 %928 }
 0x3fe   : > { %v925_v43 = vpop.xlane.xlu0 %924  ;;  %v942_v45 = vmul.f32 0.0078125, %v929_v42  ;;  %v957_v51 = vmul.f32 %v3840_v44, %v3840_v44 }
 0x3ff   : > { %v940_v46 = vmul.f32 0.0078125, %v925_v43  ;;  %v955_v47 = vmul.f32 %v3837_v41, %v3837_v41 }
 0x400   : > { %v3848_v55 = vsub.f32 %v3815_v14, %v942_v45 }
 0x401   : > { %v3845_v48 = vsub.f32 %v3817_v15, %v940_v46  ;;  %963 = vadd.xlane.f32.xlu0 %v955_v47 }
 0x402   : > { %v931_v49 = vpop.xlane.xlu0 %930  ;;  %v958_v58 = vmul.f32 %v3848_v55, %v3848_v55 }
 0x403   : > { %v943_v50 = vmul.f32 0.0078125, %v931_v49  ;;  %v956_v52 = vmul.f32 %v3845_v48, %v3845_v48 }
 0x404   : > { %v933_v53 = vpop.xlane.xlu1 %932 }
 0x405   : > { %v3855_v56 = vsub.f32 %v3821_v24, %v943_v50  ;;  %v944_v57 = vmul.f32 0.0078125, %v933_v53  ;;  %967 = vadd.xlane.f32.xlu0 %v957_v51  ;;  %965 = vadd.xlane.f32.xlu1 %v956_v52 }
 0x406   : > { %v935_v59 = vpop.xlane.xlu0 %934 }
 0x407   : > { %v3858_v60 = vsub.f32 %v3823_v28, %v944_v57  ;;  %v945_v54 = vmul.f32 0.0078125, %v935_v59  ;;  %v959_v61 = vmul.f32 %v3855_v56, %v3855_v56 }
 0x408   : > { %v937_v62 = vpop.xlane.xlu1 %936 }
 0x409   : > { %v3865_v63 = vsub.f32 %v3826_v30, %v945_v54  ;;  %v946_v0 = vmul.f32 0.0078125, %v937_v62  ;;  %969 = vadd.xlane.f32.xlu1 %v958_v58  ;;  %971 = vadd.xlane.f32.xlu0 %v959_v61  ;;  %v960_v2 = vmul.f32 %v3858_v60, %v3858_v60 }
 0x40b   : > { %v3868_v1 = vsub.f32 %v3829_v31, %v946_v0  ;;  %v961_v3 = vmul.f32 %v3865_v63, %v3865_v63 }
 0x40d   : > { %973 = vadd.xlane.f32.xlu1 %v960_v2  ;;  %975 = vadd.xlane.f32.xlu0 %v961_v3  ;;  %v962_v4 = vmul.f32 %v3868_v1, %v3868_v1  ;;  %v2549_v2 = vld [vmem:[%s4249_s7] ss:$0 sm:$0xff] }
 0x411   : > { %977 = vadd.xlane.f32.xlu1 %v962_v4 }
 0x48e   : > { %v964_v33 = vpop.xlane.xlu0 %963 }
 0x48f   : > { %v979_v34 = vmul.f32 0.0078125, %v964_v33 }
 0x491   : > { %v987_v35 = vadd.f32 1e-05, %v979_v34 }
 0x492   : > { %v966_v36 = vpop.xlane.xlu1 %965  ;;  %v968_v37 = vpop.xlane.xlu0 %967 }
 0x493   : > { %3258 = vrsqrt.f32 %v987_v35  ;;  %v980_v38 = vmul.f32 0.0078125, %v966_v36  ;;  %v981_v39 = vmul.f32 0.0078125, %v968_v37 }
 0x495   : > { %v988_v40 = vadd.f32 1e-05, %v980_v38  ;;  %v989_v42 = vadd.f32 1e-05, %v981_v39 }
 0x496   : > { %v970_v43 = vpop.xlane.xlu1 %969  ;;  %v972_v45 = vpop.xlane.xlu0 %971 }
 0x497   : > { %3260 = vrsqrt.f32 %v988_v40  ;;  %v982_v46 = vmul.f32 0.0078125, %v970_v43  ;;  %v983_v47 = vmul.f32 0.0078125, %v972_v45 }
 0x498   : > { %3262 = vrsqrt.f32 %v989_v42 }
 0x499   : > { %v990_v49 = vadd.f32 1e-05, %v982_v46  ;;  %v991_v50 = vadd.f32 1e-05, %v983_v47 }
 0x49a   : > { %v974_v51 = vpop.xlane.xlu1 %973  ;;  %v976_v52 = vpop.xlane.xlu0 %975 }
 0x49b   : > { %3264 = vrsqrt.f32 %v990_v49  ;;  %v984_v53 = vmul.f32 0.0078125, %v974_v51  ;;  %v985_v57 = vmul.f32 0.0078125, %v976_v52 }
 0x49c   : > { %3266 = vrsqrt.f32 %v991_v50 }
 0x49d   : > { %v3259_v59 = vpop.eup %3258  ;;  %v992_v54 = vadd.f32 1e-05, %v984_v53  ;;  %v993_v58 = vadd.f32 1e-05, %v985_v57 }
 0x49e   : > { %v978_v61 = vpop.xlane.xlu1 %977  ;;  %v1003_v62 = vmul.f32 %v3259_v59, %v3837_v41  ;;  %v2550_v41 = vld [vmem:[%s4250_s8] ss:$0 sm:$0xff] }
 0x49f   : > { %3268 = vrsqrt.f32 %v992_v54  ;;  %v986_v0 = vmul.f32 0.0078125, %v978_v61 }
 0x4a0   : > { %3270 = vrsqrt.f32 %v993_v58  ;;  %v1018_v8 = vmul.f32 %v2549_v2, %v1003_v62 }
 0x4a1   : > { %v3261_v3 = vpop.eup %3260  ;;  %v994_v4 = vadd.f32 1e-05, %v986_v0 }
 0x4a2   : > { %v3263_v5 = vpop.eup %3262  ;;  %v1004_v6 = vmul.f32 %v3261_v3, %v3845_v48  ;;  %v1033_v18 = vadd.f32 %v2550_v41, %v1018_v8 }
 0x4a3   : > { %v1005_v9 = vmul.f32 %v3263_v5, %v3840_v44  ;;  %3272 = vrsqrt.f32 %v994_v4 }
 0x4a4   : > { %v1019_v11 = vmul.f32 %v2549_v2, %v1004_v6 }
 0x4a5   : > { %v3265_v12 = vpop.eup %3264  ;;  %v1020_v13 = vmul.f32 %v2549_v2, %v1005_v9 }
 0x4a6   : > { %v3267_v16 = vpop.eup %3266  ;;  %v1006_v17 = vmul.f32 %v3265_v12, %v3848_v55  ;;  %v1034_v19 = vadd.f32 %v2550_v41, %v1019_v11 }
 0x4a7   : > { %v1007_v20 = vmul.f32 %v3267_v16, %v3855_v56  ;;  %v1035_v23 = vadd.f32 %v2550_v41, %v1020_v13 }
 0x4a8   : > { %v1041_v21 = vpack.c.bf16 %v1034_v19, %v1033_v18  ;;  %v1021_v48 = vmul.f32 %v2549_v2, %v1006_v17 }
 0x4a9   : > { %v3269_v22 = vpop.eup %3268  ;;  %v1022_v27 = vmul.f32 %v2549_v2, %v1007_v20 }
 0x4aa   : > { %v3271_v44 = vpop.eup %3270  ;;  %2832 = vmatprep.mubr.bf16.mxu1 %v1041_v21  ;;  %1303 = vmatmul.mubr.bf16.vlgmr.msra.gmra.mrb[12].mxu0 %v1041_v21  ;;  %v1036_v25 = vadd.f32 %v2550_v41, %v1021_v48  ;;  %v1008_v26 = vmul.f32 %v3269_v22, %v3858_v60 }
 0x4ab   : > { %1312 = vmatprep.mubr.bf16.mxu0 %v3510_v29  ;;  %v1009_v32 = vmul.f32 %v3271_v44, %v3865_v63  ;;  %v1037_v56 = vadd.f32 %v2550_v41, %v1022_v27 }
 0x4ac   : > { %v1042_v55 = vpack.c.bf16 %v1036_v25, %v1035_v23  ;;  %v1023_v33 = vmul.f32 %v2549_v2, %v1008_v26 }
 0x4ad   : > { %v3273_v34 = vpop.eup %3272  ;;  %v1024_v37 = vmul.f32 %v2549_v2, %v1009_v32 }
 0x4ae   : > { %2833 = vmatmul.mubr.bf16.vlgmr.msra.gmra.mrb[4].mxu1 %v1042_v55  ;;  %v1038_v35 = vadd.f32 %v2550_v41, %v1023_v33  ;;  %v1010_v36 = vmul.f32 %v3273_v34, %v3868_v1 }
 0x4af   : > { %v1039_v40 = vadd.f32 %v2550_v41, %v1024_v37 }
 0x4b0   : > { %v1043_v38 = vpack.c.bf16 %v1038_v35, %v1037_v56  ;;  %v1025_v39 = vmul.f32 %v2549_v2, %v1010_v36 }
 0x4b2   : > { %2836 = vmatprep.mubr.bf16.mxu1 %v1043_v38  ;;  %1313 = vmatmul.mubr.bf16.gmra.mrb[16].mxu0 %v1042_v55  ;;  %v1040_v60 = vadd.f32 %v2550_v41, %v1025_v39 }
 0x4b3   : > { %1322 = vmatprep.mubr.bf16.mxu0 %v3510_v29 }
 0x4b4   : > { %v1044_v42 = vpack.c.bf16 %v1040_v60, %v1039_v40 }
 0x4b6   : > { %2837 = vmatmul.mubr.bf16.gmra.mrb[8].mxu1 %v1044_v42 }
 0x4ba   : > { %1323 = vmatmul.mubr.bf16.gmra.mrb[20].mxu0 %v1043_v38 }
 0x4bb   : > { %1332 = vmatprep.mubr.bf16.mxu0 %v3510_v29 }
 0x4c2   : > { %1333 = vmatmul.mubr.bf16.gmra.mrb[24].mxu0 %v1044_v42 }
 0x57d   : > { %v3915_v63 = vpop.f32.mrb[12].mxu0 }
 0x57e   : > { %v3917_v43 = vpop.f32.mrb[13].mxu0 }
 0x57f   : > { %v3919_v1 = vpop.f32.mrb[14].mxu0 }
 0x580   : > { %v3172_v46 = vpack.i.bf16 %v3919_v1, %v3915_v63  ;;  %v3008_v47 = vpack.c.bf16 %v3919_v1, %v3915_v63  ;;  %v3931_v29 = vpop.f32.mrb[15].mxu0 }
 0x581   : > { %v3192_v49 = vpack.i.bf16 %v3931_v29, %v3917_v43  ;;  %v3032_v50 = vpack.c.bf16 %v3931_v29, %v3917_v43  ;;  %v3937_v51 = vpop.f32.mrb[4].mxu1 }
 0x582   : > { %v3939_v52 = vpop.f32.mrb[5].mxu1  ;;  %3010 = vmatprep.subr.msk.bf16.mxu1 %vm3923_vm2, %v3008_v47 }
 0x583   : > { %v3943_v53 = vpop.f32.mrb[6].mxu1  ;;  %3013 = vmatpush3.bf16.xpose.msk.msra.mxu1 %vm3923_vm2, %v3008_v47  ;;  %2856 = vmatprep.mubr.msk.f32.mxu1 %vm523_vm1, %v3939_v52 }
 0x584   : > { %3033 = vmatprep.subr.bf16.mxu0 %v3032_v50  ;;  %v3949_v57 = vpop.f32.mrb[7].mxu1 }
 0x585   : > { %3035 = vmatpush3.bf16.msra.mxu0 %v3032_v50  ;;  %v3951_v59 = vpop.f32.mrb[16].mxu0 }
 0x586   : > { %v3953_v54 = vpop.f32.mrb[17].mxu0 }
 0x587   : > { %v3955_v58 = vpop.f32.mrb[18].mxu0 }
 0x588   : > { %v3177_v61 = vpack.i.bf16 %v3955_v58, %v3951_v59  ;;  %v3014_v62 = vpack.c.bf16 %v3955_v58, %v3951_v59  ;;  %v3961_v0 = vpop.f32.mrb[19].mxu0 }
 0x589   : > { %v3197_v2 = vpack.i.bf16 %v3961_v0, %v3953_v54  ;;  %v3036_v3 = vpack.c.bf16 %v3961_v0, %v3953_v54  ;;  %v3967_v4 = vpop.f32.mrb[8].mxu1 }
 0x58a   : > { %v3969_v5 = vpop.f32.mrb[9].mxu1  ;;  %3016 = vmatprep.subr.msk.bf16.mxu1 %vm3923_vm2, %v3014_v62 }
 0x58b   : > { %v3973_v6 = vpop.f32.mrb[10].mxu1  ;;  %3019 = vmatpush3.bf16.xpose.msk.msra.mxu1 %vm3923_vm2, %v3014_v62  ;;  %3037 = vmatprep.subr.bf16.mxu0 %v3036_v3 }
 0x58c   : > { %v3977_v8 = vpop.f32.mrb[11].mxu1  ;;  %3039 = vmatpush3.bf16.msra.mxu0 %v3036_v3 }
 0x58d   : > { %v3979_v9 = vpop.f32.mrb[20].mxu0 }
 0x58e   : > { %v3981_v41 = vpop.f32.mrb[21].mxu0 }
 0x58f   : > { %v3983_v11 = vpop.f32.mrb[22].mxu0 }
 0x590   : > { %v3182_v12 = vpack.i.bf16 %v3983_v11, %v3979_v9  ;;  %v3020_v13 = vpack.c.bf16 %v3983_v11, %v3979_v9  ;;  %v3989_v16 = vpop.f32.mrb[23].mxu0 }
 0x591   : > { %v3202_v17 = vpack.i.bf16 %v3989_v16, %v3981_v41  ;;  %v3040_v18 = vpack.c.bf16 %v3989_v16, %v3981_v41 }
 0x592   : > { %3022 = vmatprep.subr.msk.bf16.mxu1 %vm3923_vm2, %v3020_v13 }
 0x593   : > { %3025 = vmatpush3.bf16.xpose.msk.msra.mxu1 %vm3923_vm2, %v3020_v13  ;;  %3041 = vmatprep.subr.bf16.mxu0 %v3040_v18 }
 0x594   : > { %3043 = vmatpush3.bf16.msra.mxu0 %v3040_v18 }
 0x595   : > { %v3999_v19 = vpop.f32.mrb[24].mxu0 }
 0x596   : > { %v4001_v20 = vpop.f32.mrb[25].mxu0 }
 0x597   : > { %v4003_v21 = vpop.f32.mrb[26].mxu0 }
 0x598   : > { %v3187_v48 = vpack.i.bf16 %v4003_v21, %v3999_v19  ;;  %v3026_v22 = vpack.c.bf16 %v4003_v21, %v3999_v19  ;;  %v4009_v23 = vpop.f32.mrb[27].mxu0 }
 0x599   : > { %v3207_v44 = vpack.i.bf16 %v4009_v23, %v4001_v20  ;;  %v3044_v25 = vpack.c.bf16 %v4009_v23, %v4001_v20 }
 0x59a   : > { %3028 = vmatprep.subr.msk.bf16.mxu1 %vm3923_vm2, %v3026_v22 }
 0x59b   : > { %3031 = vmatpush3.bf16.xpose.msk.msra.mxu1 %vm3923_vm2, %v3026_v22  ;;  %3045 = vmatprep.subr.bf16.mxu0 %v3044_v25 }
 0x59c   : > { %3047 = vmatpush3.bf16.msra.mxu0 %v3044_v25 }
 0x5a2   : > { %2857 = vmatmul.mubr.msk.f32.vlgmr.msra.gmra.mrb[2].mxu1 %vm523_vm1, %v3949_v57 }
 0x5a3   : > { %2859 = vmatprep.mubr.msk.f32.mxu1 %vm523_vm1, %v3937_v51 }
 0x5a6   : > { %2860 = vmatmul.mubr.msk.f32.gmra.mrb[12].mxu1 %vm523_vm1, %v3943_v53 }
 0x5a7   : > { %2862 = vmatprep.mubr.msk.f32.mxu1 %vm523_vm1, %v3969_v5 }
 0x5aa   : > { %2863 = vmatmul.mubr.msk.f32.gmra.mrb[14].mxu1 %vm523_vm1, %v3977_v8 }
 0x5ab   : > { %2865 = vmatprep.mubr.msk.f32.mxu1 %vm523_vm1, %v3967_v4 }
 0x5ae   : > { %2866 = vmatmul.mubr.msk.f32.gmra.mrb[16].mxu1 %vm523_vm1, %v3973_v6 }
 0x675   : > { %v2858_v26 = vpop.f32.mrb[2].mxu1 }
 0x676   : > { %v1528_v27 = vmul.f32 0.125, %v2858_v26  ;;  %v1488_v32 = vpop.f32.mrb[3].mxu1 }
 0x677   : > { %v1527_v55 = vmul.f32 0.125, %v1488_v32 }
 0x678   : > { %v1538_v33 = vsel %vm523_vm1, %v1528_v27, -inf }
 0x679   : > { %1539 = vmax.xlane.f32.xlu1 %v1538_v33  ;;  %v2861_v34 = vpop.f32.mrb[12].mxu1  ;;  %v1535_v56 = vsel %vm523_vm1, %v1527_v55, -inf }
 0x67a   : > { %v1530_v35 = vmul.f32 0.125, %v2861_v34  ;;  %1536 = vmax.xlane.f32.xlu0 %v1535_v56  ;;  %v1498_v36 = vpop.f32.mrb[13].mxu1 }
 0x67b   : > { %v1529_v37 = vmul.f32 0.125, %v1498_v36 }
 0x67c   : > { %v1544_v38 = vsel %vm523_vm1, %v1530_v35, -inf }
 0x67d   : > { %1545 = vmax.xlane.f32.xlu1 %v1544_v38  ;;  %v2864_v39 = vpop.f32.mrb[14].mxu1  ;;  %v1541_v40 = vsel %vm523_vm1, %v1529_v37, -inf }
 0x67e   : > { %v1532_v60 = vmul.f32 0.125, %v2864_v39  ;;  %1542 = vmax.xlane.f32.xlu0 %v1541_v40  ;;  %v1508_v42 = vpop.f32.mrb[15].mxu1 }
 0x67f   : > { %v1531_v47 = vmul.f32 0.125, %v1508_v42 }
 0x680   : > { %v1550_v50 = vsel %vm523_vm1, %v1532_v60, -inf }
 0x681   : > { %1551 = vmax.xlane.f32.xlu1 %v1550_v50  ;;  %v2867_v62 = vpop.f32.mrb[16].mxu1  ;;  %v1547_v3 = vsel %vm523_vm1, %v1531_v47, -inf }
 0x682   : > { %v1534_v13 = vmul.f32 0.125, %v2867_v62  ;;  %1548 = vmax.xlane.f32.xlu0 %v1547_v3  ;;  %v1518_v18 = vpop.f32.mrb[17].mxu1 }
 0x683   : > { %v4039_v22 = vmul.f32 0.125, %v1518_v18 }
 0x684   : > { %v1556_v25 = vsel %vm523_vm1, %v1534_v13, -inf }
 0x685   : > { %1557 = vmax.xlane.f32.xlu1 %v1556_v25  ;;  %v1553_v26 = vsel %vm523_vm1, %v4039_v22, -inf }
 0x686   : > { %1554 = vmax.xlane.f32.xlu0 %v1553_v26 }
 0x706   : > { %v1540_v32 = vpop.xlane.xlu1 %1539 }
 0x707   : > { %v1560_v33 = vsub.f32 %v1528_v27, %v1540_v32  ;;  %v1537_v34 = vpop.xlane.xlu0 %1536 }
 0x708   : > { %v1559_v56 = vsub.f32 %v1527_v55, %v1537_v34 }
 0x709   : > { %v1569_v36 = vmul.f32 1.442695, %v1560_v33 }
 0x70a   : > { %v1567_v38 = vmul.f32 1.442695, %v1559_v56  ;;  %v1546_v27 = vpop.xlane.xlu1 %1545 }
 0x70b   : > { %3274 = vpow2.f32 %v1569_v36  ;;  %v1543_v55 = vpop.xlane.xlu0 %1542  ;;  %v1562_v62 = vsub.f32 %v1530_v35, %v1546_v27 }
 0x70c   : > { %3276 = vpow2.f32 %v1567_v38  ;;  %v1561_v3 = vsub.f32 %v1529_v37, %v1543_v55 }
 0x70d   : > { %v1573_v26 = vmul.f32 1.442695, %v1562_v62 }
 0x70e   : > { %v1552_v18 = vpop.xlane.xlu1 %1551  ;;  %v1571_v33 = vmul.f32 1.442695, %v1561_v3 }
 0x70f   : > { %v1549_v25 = vpop.xlane.xlu0 %1548  ;;  %v1564_v32 = vsub.f32 %v1532_v60, %v1552_v18  ;;  %3278 = vpow2.f32 %v1573_v26 }
 0x710   : > { %v1563_v34 = vsub.f32 %v1531_v47, %v1549_v25  ;;  %3280 = vpow2.f32 %v1571_v33 }
 0x711   : > { %v1577_v56 = vmul.f32 1.442695, %v1564_v32 }
 0x712   : > { %v1575_v59 = vmul.f32 1.442695, %v1563_v34  ;;  %v1558_v47 = vpop.xlane.xlu1 %1557 }
 0x713   : > { %3282 = vpow2.f32 %v1577_v56  ;;  %v1566_v36 = vsub.f32 %v1534_v13, %v1558_v47  ;;  %v1555_v19 = vpop.xlane.xlu0 %1554 }
 0x714   : > { %3284 = vpow2.f32 %v1575_v59 }
 0x715   : > { %v4044_v39 = vpop.eup %3274  ;;  %v1581_v21 = vmul.f32 1.442695, %v1566_v36 }
 0x716   : > { %v4046_v40 = vpop.eup %3276  ;;  %v1586_v42 = vsel %vm523_vm1, %v4044_v39, 0.0 }
 0x717   : > { %1587 = vadd.xlane.f32.xlu1 %v1586_v42  ;;  %v1583_v50 = vsel %vm523_vm1, %v4046_v40, 0.0  ;;  %3286 = vpow2.f32 %v1581_v21 }
 0x718   : > { %1584 = vadd.xlane.f32.xlu0 %v1583_v50 }
 0x719   : > { %v4060_v58 = vpop.eup %3278 }
 0x71a   : > { %v4062_v63 = vpop.eup %3280  ;;  %v1592_v1 = vsel %vm523_vm1, %v4060_v58, 0.0 }
 0x728   : > { %3178 = vrot.lane.b32.xlu1 %v3177_v61, %s3511_s21  ;;  %v1589_v61 = vsel %vm523_vm1, %v4062_v63, 0.0 }
 0x72e   : > { %3173 = vrot.lane.b32.xlu0 %v3172_v46, %s3511_s21  ;;  %v4066_v46 = vpop.eup %3282 }
 0x72f   : > { %v4070_v35 = vpop.eup %3284  ;;  %v1598_v37 = vsel %vm523_vm1, %v4066_v46, 0.0 }
 0x730   : > { %v1595_v60 = vsel %vm523_vm1, %v4070_v35, 0.0  ;;  %v4095_v11 = vpop.eup %3286 }
 0x74c   : > { %1593 = vadd.xlane.f32.xlu1 %v1592_v1 }
 0x74d   : > { %1590 = vadd.xlane.f32.xlu0 %v1589_v61 }
 0x750   : > { %1599 = vadd.xlane.f32.xlu1 %v1598_v37 }
 0x751   : > { %1596 = vadd.xlane.f32.xlu0 %v1595_v60 }
 0x761   : > { %3188 = vrot.lane.b32.xlu1 %v3187_v48, %s3511_s21 }
 0x765   : > { %1867 = vrot.lane.b32.xlu1 %v3949_v57, %s3511_s21  ;;  %v1565_v57 = vsub.f32 %v4039_v22, %v1555_v19 }
 0x767   : > { %3183 = vrot.lane.b32.xlu0 %v3182_v12, %s3511_s21  ;;  %v1579_v9 = vmul.f32 1.442695, %v1565_v57  ;;  %v3249_v57 = vld [vmem:[#allocation9 + $0x8] sm:$0xff]  }
 0x769   : > { %3288 = vpow2.f32 %v1579_v9  ;;  %v3250_v9 = vld [vmem:[#allocation9 + $0x10] sm:$0xff]  }
 0x76b   : > { %1865 = vrot.lane.b32.xlu0 %v3939_v52, %s3511_s21 }
 0x76f   : > { %1869 = vrot.lane.b32.xlu0 %v3937_v51, %s3511_s21  ;;  %v1604_v51 = vsel %vm523_vm1, %v4095_v11, 0.0 }
 0x773   : > { %1873 = vrot.lane.b32.xlu0 %v3969_v5, %s3511_s21  ;;  %v4099_v52 = vpop.eup %3288 }
 0x774   : > { %v1601_v5 = vsel %vm523_vm1, %v4099_v52, 0.0 }
 0x777   : > { %1877 = vrot.lane.b32.xlu0 %v3967_v4, %s3511_s21 }
 0x789   : > { %1605 = vadd.xlane.f32.xlu1 %v1604_v51 }
 0x78d   : > { %1602 = vadd.xlane.f32.xlu1 %v1601_v5 }
 0x79e   : > { %1871 = vrot.lane.b32.xlu1 %v3943_v53, %s3511_s21 }
 0x7a2   : > { %1875 = vrot.lane.b32.xlu1 %v3977_v8, %s3511_s21 }
 0x7a4   : > { %v1588_v4 = vpop.xlane.xlu1 %1587 }
 0x7a5   : > { %3290 = vrcp.f32 %v1588_v4  ;;  %v1585_v12 = vpop.xlane.xlu0 %1584 }
 0x7a6   : > { %3292 = vrcp.f32 %v1585_v12  ;;  %1879 = vrot.lane.b32.xlu1 %v3973_v6, %s3511_s21 }
 0x7a8   : > { %v3179_v42 = vpop.permute.xlu1 %3178 }
 0x7a9   : > { %v3174_v48 = vpop.permute.xlu0 %3173  ;;  %v3181_v27 = vunpack.i.h.bf16 %v3179_v42  ;;  %v3180_v55 = vunpack.i.l.bf16 %v3179_v42 }
 0x7aa   : > { %v3176_v13 = vunpack.i.h.bf16 %v3174_v48  ;;  %v3175_v22 = vunpack.i.l.bf16 %v3174_v48 }
 0x7ab   : > { %v3054_v3 = vpack.c.bf16 %v3181_v27, %v3180_v55 }
 0x7ac   : > { %v3048_v38 = vpack.c.bf16 %v3176_v13, %v3175_v22 }
 0x7ae   : > { %3050 = vmatprep.subr.msk.bf16.mxu0 %vm3923_vm2, %v3048_v38 }
 0x7af   : > { %v3291_v50 = vpop.eup %3290 }
 0x7b0   : > { %v3293_v53 = vpop.eup %3292  ;;  %v1616_v62 = vmul.f32 %v3291_v50, %v4044_v39  ;;  %v3251_v50 = vld [vmem:[#allocation9 + $0x18] sm:$0xff]  }
 0x7b1   : > { %v1615_v8 = vmul.f32 %v3293_v53, %v4046_v40 }
 0x7b3   : > { %2884 = vmatprep.mubr.msk.f32.mxu0 %vm523_vm1, %v1615_v8 }
 0x7b4   : > { %2885 = vmatmul.mubr.msk.f32.vlgmr.msra.gmra.mrb[2].mxu0 %vm523_vm1, %v1616_v62 }
 0x7b5   : > { %3053 = vmatpush3.bf16.xpose.msk.msra.mxu0 %vm3923_vm2, %v3048_v38 }
 0x7b6   : > { %3056 = vmatprep.subr.msk.bf16.mxu0 %vm3923_vm2, %v3054_v3 }
 0x7bd   : > { %3059 = vmatpush3.bf16.xpose.msk.msra.mxu0 %vm3923_vm2, %v3054_v3 }
 0x7d9   : > { %v1594_v6 = vpop.xlane.xlu1 %1593 }
 0x7da   : > { %3294 = vrcp.f32 %v1594_v6  ;;  %v1591_v18 = vpop.xlane.xlu0 %1590 }
 0x7db   : > { %3296 = vrcp.f32 %v1591_v18 }
 0x7dd   : > { %v1600_v40 = vpop.xlane.xlu1 %1599 }
 0x7de   : > { %3298 = vrcp.f32 %v1600_v40  ;;  %v1597_v39 = vpop.xlane.xlu0 %1596 }
 0x7df   : > { %3300 = vrcp.f32 %v1597_v39 }
 0x7e1   : > { %v3189_v25 = vpop.permute.xlu1 %3188 }
 0x7e2   : > { %v3184_v26 = vpop.permute.xlu0 %3183  ;;  %v3191_v32 = vunpack.i.h.bf16 %v3189_v25  ;;  %v3190_v33 = vunpack.i.l.bf16 %v3189_v25 }
 0x7e3   : > { %v3186_v34 = vunpack.i.h.bf16 %v3184_v26  ;;  %v3185_v56 = vunpack.i.l.bf16 %v3184_v26 }
 0x7e4   : > { %v3295_v59 = vpop.eup %3294  ;;  %v3066_v60 = vpack.c.bf16 %v3191_v32, %v3190_v33 }
 0x7e5   : > { %v3297_v1 = vpop.eup %3296  ;;  %v3060_v61 = vpack.c.bf16 %v3186_v34, %v3185_v56  ;;  %v1618_v47 = vmul.f32 %v3295_v59, %v4060_v58  ;;  %v3248_v58 = vld [vmem:[#allocation9] sm:$0xff]   ;;  %v1868_v51 = vpop.permute.xlu1 %1867 }
 0x7e6   : > { %v1617_v37 = vmul.f32 %v3297_v1, %v4062_v63  ;;  %2896 = vmatprep.subr.bf16.mxu1 %v3248_v58 }
 0x7e7   : > { %3062 = vmatprep.subr.msk.bf16.mxu0 %vm3923_vm2, %v3060_v61  ;;  %2897 = vmatpush3.bf16.msra.mxu1 %v3248_v58 }
 0x7e8   : > { %v3299_v36 = vpop.eup %3298  ;;  %2887 = vmatprep.mubr.msk.f32.mxu0 %vm523_vm1, %v1617_v37  ;;  %3065 = vmatpush3.bf16.xpose.msk.msra.mxu0 %vm3923_vm2, %v3060_v61 }
 0x7e9   : > { %v3301_v19 = vpop.eup %3300  ;;  %2888 = vmatmul.mubr.msk.f32.gmra.mrb[28].mxu0 %vm523_vm1, %v1618_v47  ;;  %3068 = vmatprep.subr.msk.bf16.mxu0 %vm3923_vm2, %v3066_v60  ;;  %v1620_v21 = vmul.f32 %v3299_v36, %v4066_v46 }
 0x7ea   : > { %v1619_v63 = vmul.f32 %v3301_v19, %v4070_v35  ;;  %2898 = vmatprep.subr.bf16.mxu1 %v3249_v57  ;;  %v1866_v35 = vpop.permute.xlu0 %1865 }
 0x7eb   : > { %2899 = vmatpush3.bf16.msra.mxu1 %v3249_v57 }
 0x7ec   : > { %2890 = vmatprep.mubr.msk.f32.mxu0 %vm523_vm1, %v1619_v63  ;;  %2900 = vmatprep.subr.bf16.mxu1 %v3250_v9 }
 0x7ed   : > { %2891 = vmatmul.mubr.msk.f32.gmra.mrb[30].mxu0 %vm523_vm1, %v1620_v21 }
 0x7ee   : > { %v1870_v13 = vpop.permute.xlu0 %1869 }
 0x7ef   : > { %2901 = vmatpush3.bf16.msra.mxu1 %v3250_v9 }
 0x7f0   : > { %3071 = vmatpush3.bf16.xpose.msk.msra.mxu0 %vm3923_vm2, %v3066_v60  ;;  %2902 = vmatprep.subr.bf16.mxu1 %v3251_v50 }
 0x7f2   : > { %v1874_v38 = vpop.permute.xlu0 %1873 }
 0x7f3   : > { %2903 = vmatpush3.bf16.msra.mxu1 %v3251_v50 }
 0x816   : > { %v1606_v5 = vpop.xlane.xlu1 %1605 }
 0x817   : > { %3302 = vrcp.f32 %v1606_v5 }
 0x81a   : > { %v1603_v46 = vpop.xlane.xlu1 %1602 }
 0x81b   : > { %3304 = vrcp.f32 %v1603_v46 }
 0x81e   : > { %v1872_v22 = vpop.permute.xlu1 %1871 }
 0x821   : > { %v3303_v4 = vpop.eup %3302 }
 0x822   : > { %v1622_v48 = vmul.f32 %v3303_v4, %v4095_v11  ;;  %v1876_v42 = vpop.permute.xlu1 %1875 }
 0x825   : > { %v3305_v12 = vpop.eup %3304 }
 0x826   : > { %v1621_v45 = vmul.f32 %v3305_v12, %v4099_v52  ;;  %v1878_v52 = vpop.permute.xlu0 %1877  ;;  %v1880_v11 = vpop.permute.xlu1 %1879 }
 0x828   : > { %2893 = vmatprep.mubr.msk.f32.mxu0 %vm523_vm1, %v1621_v45 }
 0x829   : > { %2894 = vmatmul.mubr.msk.f32.gmra.mrb[32].mxu0 %vm523_vm1, %v1622_v48 }
 0x82a   : > { %2928 = vmatprep.mubr.msk.f32.mxu0 %vm523_vm1, %v1866_v35 }
 0x82d   : > { %2929 = vmatmul.mubr.msk.f32.vlgmr.msra.gmra.mrb[34].mxu0 %vm523_vm1, %v1868_v51 }
 0x82e   : > { %2931 = vmatprep.mubr.msk.f32.mxu0 %vm523_vm1, %v1870_v13 }
 0x831   : > { %2932 = vmatmul.mubr.msk.f32.gmra.mrb[36].mxu0 %vm523_vm1, %v1872_v22 }
 0x832   : > { %2934 = vmatprep.mubr.msk.f32.mxu0 %vm523_vm1, %v1874_v38 }
 0x835   : > { %2935 = vmatmul.mubr.msk.f32.gmra.mrb[38].mxu0 %vm523_vm1, %v1876_v42 }
 0x836   : > { %2937 = vmatprep.mubr.msk.f32.mxu0 %vm523_vm1, %v1878_v52 }
 0x839   : > { %2938 = vmatmul.mubr.msk.f32.gmra.mrb[40].mxu0 %vm523_vm1, %v1880_v11 }
 0x887   : > { %v2886_v53 = vpop.f32.mrb[2].mxu0 }
 0x888   : > { %v1713_v27 = vpop.f32.mrb[3].mxu0 }
 0x889   : > { %v1752_v55 = vpack.c.bf16 %v2886_v53, %v1713_v27 }
 0x88b   : > { %2904 = vmatprep.mubr.msk.bf16.mxu1 %vm523_vm1, %v1752_v55 }
 0x8bc   : > { %v2889_v8 = vpop.f32.mrb[28].mxu0 }
 0x8bd   : > { %v1723_v62 = vpop.f32.mrb[29].mxu0 }
 0x8be   : > { %v1753_v3 = vpack.c.bf16 %v2889_v8, %v1723_v62 }
 0x8c0   : > { %v2892_v6 = vpop.f32.mrb[30].mxu0  ;;  %2905 = vmatmul.mubr.msk.bf16.vlgmr.msra.gmra.mrb[20].mxu1 %vm523_vm1, %v1753_v3 }
 0x8c1   : > { %v1733_v18 = vpop.f32.mrb[31].mxu0 }
 0x8c2   : > { %v1754_v40 = vpack.c.bf16 %v2892_v6, %v1733_v18 }
 0x8c4   : > { %2908 = vmatprep.mubr.msk.bf16.mxu1 %vm523_vm1, %v1754_v40 }
 0x8fc   : > { %v2895_v39 = vpop.f32.mrb[32].mxu0 }
 0x8fd   : > { %v1743_v25 = vpop.f32.mrb[33].mxu0 }
 0x8fe   : > { %v1755_v26 = vpack.c.bf16 %v2895_v39, %v1743_v25 }
 0x900   : > { %2909 = vmatmul.mubr.msk.bf16.gmra.mrb[24].mxu1 %vm523_vm1, %v1755_v26  ;;  %v2930_v32 = vpop.f32.mrb[34].mxu0 }
 0x901   : > { %v2035_v33 = vmul.f32 0.125, %v2930_v32  ;;  %v1995_v34 = vpop.f32.mrb[35].mxu0 }
 0x902   : > { %v2034_v56 = vmul.f32 0.125, %v1995_v34 }
 0x903   : > { %v2045_v59 = vsel %vm523_vm1, %v2035_v33, -inf }
 0x904   : > { %2046 = vmax.xlane.f32.xlu1 %v2045_v59  ;;  %v2933_v1 = vpop.f32.mrb[36].mxu0  ;;  %v2042_v61 = vsel %vm523_vm1, %v2034_v56, -inf }
 0x905   : > { %v2037_v37 = vmul.f32 0.125, %v2933_v1  ;;  %2043 = vmax.xlane.f32.xlu0 %v2042_v61  ;;  %v2005_v60 = vpop.f32.mrb[37].mxu0 }
 0x906   : > { %v2036_v36 = vmul.f32 0.125, %v2005_v60 }
 0x907   : > { %v2051_v47 = vsel %vm523_vm1, %v2037_v37, -inf }
 0x908   : > { %v2936_v19 = vpop.f32.mrb[38].mxu0  ;;  %v2048_v51 = vsel %vm523_vm1, %v2036_v36, -inf }
 0x909   : > { %v2039_v63 = vmul.f32 0.125, %v2936_v19  ;;  %2052 = vmax.xlane.f32.xlu0 %v2051_v47  ;;  %v2015_v21 = vpop.f32.mrb[39].mxu0 }
 0x90a   : > { %v2038_v57 = vmul.f32 0.125, %v2015_v21 }
 0x90b   : > { %v2057_v58 = vsel %vm523_vm1, %v2039_v63, -inf }
 0x90c   : > { %2058 = vmax.xlane.f32.xlu1 %v2057_v58  ;;  %v2939_v9 = vpop.f32.mrb[40].mxu0  ;;  %v2054_v12 = vsel %vm523_vm1, %v2038_v57, -inf }
 0x90d   : > { %v2041_v5 = vmul.f32 0.125, %v2939_v9  ;;  %2049 = vmax.xlane.f32.xlu0 %v2048_v51  ;;  %v2025_v46 = vpop.f32.mrb[41].mxu0 }
 0x90e   : > { %v2040_v4 = vmul.f32 0.125, %v2025_v46 }
 0x90f   : > { %v2063_v35 = vsel %vm523_vm1, %v2041_v5, -inf }
 0x910   : > { %2064 = vmax.xlane.f32.xlu1 %v2063_v35  ;;  %v2060_v45 = vsel %vm523_vm1, %v2040_v4, -inf }
 0x911   : > { %2055 = vmax.xlane.f32.xlu0 %v2054_v12 }
 0x915   : > { %2061 = vmax.xlane.f32.xlu0 %v2060_v45 }
 0x921   : > { %3198 = vrot.lane.b32.xlu1 %v3197_v2, %s3511_s21 }
 0x92b   : > { %3193 = vrot.lane.b32.xlu0 %v3192_v49, %s3511_s21 }
 0x991   : > { %v2047_v48 = vpop.xlane.xlu1 %2046 }
 0x992   : > { %v2067_v13 = vsub.f32 %v2035_v33, %v2047_v48  ;;  %v2044_v22 = vpop.xlane.xlu0 %2043 }
 0x993   : > { %v2066_v38 = vsub.f32 %v2034_v56, %v2044_v22 }
 0x994   : > { %v2076_v42 = vmul.f32 1.442695, %v2067_v13 }
 0x995   : > { %v2074_v52 = vmul.f32 1.442695, %v2066_v38 }
 0x996   : > { %3306 = vpow2.f32 %v2076_v42  ;;  %v2053_v11 = vpop.xlane.xlu0 %2052 }
 0x997   : > { %3308 = vpow2.f32 %v2074_v52  ;;  %v2069_v50 = vsub.f32 %v2037_v37, %v2053_v11 }
 0x999   : > { %v2080_v53 = vmul.f32 1.442695, %v2069_v50  ;;  %v2059_v27 = vpop.xlane.xlu1 %2058 }
 0x99a   : > { %v2071_v55 = vsub.f32 %v2039_v63, %v2059_v27  ;;  %v2050_v54 = vpop.xlane.xlu0 %2049 }
 0x99b   : > { %3310 = vpow2.f32 %v2080_v53  ;;  %v2068_v0 = vsub.f32 %v2036_v36, %v2050_v54 }
 0x99c   : > { %v2084_v2 = vmul.f32 1.442695, %v2071_v55  ;;  %v3252_v55 = vld [vmem:[#allocation9 + $0x20] sm:$0xff]  }
 0x99d   : > { %v2078_v8 = vmul.f32 1.442695, %v2068_v0  ;;  %v2065_v43 = vpop.xlane.xlu1 %2064 }
 0x99e   : > { %3312 = vpow2.f32 %v2084_v2  ;;  %v2073_v29 = vsub.f32 %v2041_v5, %v2065_v43  ;;  %v2056_v49 = vpop.xlane.xlu0 %2055 }
 0x99f   : > { %3314 = vpow2.f32 %v2078_v8  ;;  %v2070_v62 = vsub.f32 %v2038_v57, %v2056_v49  ;;  %v3253_v8 = vld [vmem:[#allocation9 + $0x28] sm:$0xff]  }
 0x9a0   : > { %v4169_v3 = vpop.eup %3306  ;;  %v2088_v6 = vmul.f32 1.442695, %v2073_v29 }
 0x9a1   : > { %v3309_v18 = vpop.eup %3308  ;;  %v2082_v40 = vmul.f32 1.442695, %v2070_v62  ;;  %v2093_v39 = vsel %vm523_vm1, %v4169_v3, 0.0  ;;  %v3199_v34 = vpop.permute.xlu1 %3198 }
 0x9a2   : > { %3316 = vpow2.f32 %v2088_v6  ;;  %2094 = vadd.xlane.f32.xlu1 %v2093_v39  ;;  %v2062_v25 = vpop.xlane.xlu0 %2061  ;;  %v2090_v26 = vsel %vm523_vm1, %v3309_v18, 0.0  ;;  %v3201_v47 = vunpack.i.h.bf16 %v3199_v34  ;;  %v3200_v36 = vunpack.i.l.bf16 %v3199_v34 }
 0x9a3   : > { %3318 = vpow2.f32 %v2082_v40  ;;  %v2072_v32 = vsub.f32 %v2040_v4, %v2062_v25  ;;  %2091 = vadd.xlane.f32.xlu0 %v2090_v26 }
 0x9a4   : > { %v3076_v9 = vpack.c.bf16 %v3201_v47, %v3200_v36 }
 0x9a5   : > { %v4174_v33 = vpop.eup %3310  ;;  %v2086_v56 = vmul.f32 1.442695, %v2072_v32  ;;  %v3254_v32 = vld [vmem:[#allocation9 + $0x30] sm:$0xff]  }
 0x9a6   : > { %v3194_v59 = vpop.permute.xlu0 %3193  ;;  %v2099_v1 = vsel %vm523_vm1, %v4174_v33, 0.0 }
 0x9a7   : > { %3320 = vpow2.f32 %v2086_v56  ;;  %v3196_v61 = vunpack.i.h.bf16 %v3194_v59  ;;  %v3195_v37 = vunpack.i.l.bf16 %v3194_v59  ;;  %2100 = vadd.xlane.f32.xlu1 %v2099_v1 }
 0x9a8   : > { %v4178_v60 = vpop.eup %3312 }
 0x9a9   : > { %v3315_v19 = vpop.eup %3314  ;;  %v3072_v63 = vpack.c.bf16 %v3196_v61, %v3195_v37  ;;  %v2105_v21 = vsel %vm523_vm1, %v4178_v60, 0.0 }
 0x9aa   : > { %v2096_v58 = vsel %vm523_vm1, %v3315_v19, 0.0 }
 0x9ab   : > { %2106 = vadd.xlane.f32.xlu1 %v2105_v21  ;;  %2097 = vadd.xlane.f32.xlu0 %v2096_v58  ;;  %v2575_v58 = vld [vmem:[%s4254_s12] ss:$0 sm:$0xff] }
 0x9ac   : > { %v4183_v57 = vpop.eup %3316  ;;  %3073 = vmatprep.subr.bf16.mxu1 %v3072_v63 }
 0x9ad   : > { %v3319_v51 = vpop.eup %3318  ;;  %3075 = vmatpush3.bf16.msra.mxu1 %v3072_v63  ;;  %v2111_v5 = vsel %vm523_vm1, %v4183_v57, 0.0 }
 0x9ae   : > { %3077 = vmatprep.subr.bf16.mxu1 %v3076_v9  ;;  %v2102_v46 = vsel %vm523_vm1, %v3319_v51, 0.0 }
 0x9af   : > { %2112 = vadd.xlane.f32.xlu1 %v2111_v5  ;;  %2103 = vadd.xlane.f32.xlu0 %v2102_v46 }
 0x9b1   : > { %v3321_v35 = vpop.eup %3320  ;;  %3079 = vmatpush3.bf16.msra.mxu1 %v3076_v9 }
 0x9b2   : > { %v2108_v4 = vsel %vm523_vm1, %v3321_v35, 0.0 }
 0x9b3   : > { %2109 = vadd.xlane.f32.xlu1 %v2108_v4 }
 0x9c4   : > { %3208 = vrot.lane.b32.xlu1 %v3207_v44, %s3511_s21 }
 0x9c5   : > { %3203 = vrot.lane.b32.xlu0 %v3202_v17, %s3511_s21 }
 0xa2f   : > { %v2095_v12 = vpop.xlane.xlu1 %2094 }
 0xa30   : > { %v2092_v45 = vpop.xlane.xlu0 %2091 }
 0xa31   : > { %3322 = vrcp.f32 %v2092_v45 }
 0xa32   : > { %3324 = vrcp.f32 %v2095_v12 }
 0xa34   : > { %v2101_v48 = vpop.xlane.xlu1 %2100 }
 0xa38   : > { %v2107_v13 = vpop.xlane.xlu1 %2106  ;;  %v2098_v22 = vpop.xlane.xlu0 %2097 }
 0xa39   : > { %3326 = vrcp.f32 %v2098_v22 }
 0xa3a   : > { %3328 = vrcp.f32 %v2101_v48 }
 0xa3b   : > { %v3323_v38 = vpop.eup %3322 }
 0xa3c   : > { %v2113_v42 = vpop.xlane.xlu1 %2112  ;;  %v2104_v52 = vpop.xlane.xlu0 %2103  ;;  %v2122_v11 = vmul.f32 %v3323_v38, %v3309_v18 }
 0xa3d   : > { %3330 = vrcp.f32 %v2104_v52  ;;  %v3325_v54 = vpop.eup %3324 }
 0xa3e   : > { %2956 = vmatprep.mubr.msk.f32.mxu1 %vm523_vm1, %v2122_v11  ;;  %3332 = vrcp.f32 %v2107_v13  ;;  %v2123_v2 = vmul.f32 %v3325_v54, %v4169_v3 }
 0xa40   : > { %v2110_v20 = vpop.xlane.xlu1 %2109  ;;  %v3204_v23 = vpop.permute.xlu0 %3203 }
 0xa41   : > { %v3206_v44 = vunpack.i.h.bf16 %v3204_v23  ;;  %v3205_v50 = vunpack.i.l.bf16 %v3204_v23  ;;  %3334 = vrcp.f32 %v2110_v20  ;;  %v1371_v20 = vadd.f32 %v2575_v58, %v3823_v28 }
 0xa42   : > { %3336 = vrcp.f32 %v2113_v42 }
 0xa43   : > { %v3080_v41 = vpack.c.bf16 %v3206_v44, %v3205_v50  ;;  %v3327_v0 = vpop.eup %3326 }
 0xa44   : > { %v3209_v16 = vpop.permute.xlu1 %3208  ;;  %v3329_v43 = vpop.eup %3328  ;;  %v2124_v29 = vmul.f32 %v3327_v0, %v3315_v19 }
 0xa45   : > { %v3211_v17 = vunpack.i.h.bf16 %v3209_v16  ;;  %v3210_v53 = vunpack.i.l.bf16 %v3209_v16  ;;  %3081 = vmatprep.subr.bf16.mxu1 %v3080_v41  ;;  %v2125_v62 = vmul.f32 %v3329_v43, %v4174_v33  ;;  %v3255_v33 = vld [vmem:[#allocation9 + $0x38] sm:$0xff]  }
 0xa46   : > { %3083 = vmatpush3.bf16.msra.mxu1 %v3080_v41 }
 0xa47   : > { %v3084_v27 = vpack.c.bf16 %v3211_v17, %v3210_v53  ;;  %v3331_v49 = vpop.eup %3330 }
 0xa48   : > { %v3333_v6 = vpop.eup %3332  ;;  %v2126_v18 = vmul.f32 %v3331_v49, %v3319_v51  ;;  %v1366_v51 = vadd.f32 %v2575_v58, %v3811_v10  ;;  %v1372_v10 = vadd.f32 %v2575_v58, %v3826_v30 }
 0xa49   : > { %3085 = vmatprep.subr.bf16.mxu1 %v3084_v27  ;;  %v2127_v3 = vmul.f32 %v3333_v6, %v4178_v60 }
 0xa4a   : > { %3087 = vmatpush3.bf16.msra.mxu1 %v3084_v27 }
 0xa4b   : > { %2968 = vmatprep.subr.bf16.mxu1 %v3252_v55  ;;  %v3335_v40 = vpop.eup %3334 }
 0xa4c   : > { %v3337_v39 = vpop.eup %3336  ;;  %v2128_v25 = vmul.f32 %v3335_v40, %v3321_v35  ;;  %v1369_v35 = vadd.f32 %v2575_v58, %v3815_v14  ;;  %v1370_v14 = vadd.f32 %v2575_v58, %v3821_v24 }
 0xa4d   : > { %2957 = vmatmul.mubr.msk.f32.vlgmr.msra.gmra.mrb[18].mxu1 %vm523_vm1, %v2123_v2  ;;  %v2129_v26 = vmul.f32 %v3337_v39, %v4183_v57  ;;  %v1368_v57 = vadd.f32 %v2575_v58, %v3809_v7  ;;  %v1367_v7 = vadd.f32 %v2575_v58, %v3817_v15  ;;  %v1373_v15 = vadd.f32 %v2575_v58, %v3829_v31 }
 0xa4e   : > { %2959 = vmatprep.mubr.msk.f32.mxu1 %vm523_vm1, %v2124_v29  ;;  %2969 = vmatpush3.bf16.msra.mxu1 %v3252_v55 }
 0xa4f   : > { %2970 = vmatprep.subr.bf16.mxu1 %v3253_v8 }
 0xa51   : > { %2960 = vmatmul.mubr.msk.f32.gmra.mrb[28].mxu1 %vm523_vm1, %v2125_v62 }
 0xa52   : > { %2962 = vmatprep.mubr.msk.f32.mxu1 %vm523_vm1, %v2126_v18  ;;  %2971 = vmatpush3.bf16.msra.mxu1 %v3253_v8 }
 0xa53   : > { %2972 = vmatprep.subr.bf16.mxu1 %v3254_v32 }
 0xa55   : > { %2963 = vmatmul.mubr.msk.f32.gmra.mrb[30].mxu1 %vm523_vm1, %v2127_v3 }
 0xa56   : > { %2965 = vmatprep.mubr.msk.f32.mxu1 %vm523_vm1, %v2128_v25  ;;  %2973 = vmatpush3.bf16.msra.mxu1 %v3254_v32 }
 0xa57   : > { %2974 = vmatprep.subr.bf16.mxu1 %v3255_v33 }
 0xa59   : > { %2966 = vmatmul.mubr.msk.f32.gmra.mrb[32].mxu1 %vm523_vm1, %v2129_v26 }
 0xa5a   : > { %2975 = vmatpush3.bf16.msra.mxu1 %v3255_v33 }
 0xb20   : > { %v2958_v34 = vpop.f32.mrb[18].mxu1 }
 0xb21   : > { %v2252_v56 = vpop.f32.mrb[19].mxu1 }
 0xb22   : > { %v2291_v59 = vpack.c.bf16 %v2958_v34, %v2252_v56 }
 0xb24   : > { %v2961_v1 = vpop.f32.mrb[28].mxu1  ;;  %2976 = vmatprep.mubr.msk.bf16.mxu1 %vm523_vm1, %v2291_v59 }
 0xb25   : > { %v2262_v61 = vpop.f32.mrb[29].mxu1 }
 0xb26   : > { %v2292_v37 = vpack.c.bf16 %v2961_v1, %v2262_v61 }
 0xb28   : > { %v2964_v60 = vpop.f32.mrb[30].mxu1  ;;  %2977 = vmatmul.mubr.msk.bf16.vlgmr.msra.gmra.mrb[20].mxu1 %vm523_vm1, %v2292_v37 }
 0xb29   : > { %v2272_v47 = vpop.f32.mrb[31].mxu1 }
 0xb2a   : > { %v2293_v36 = vpack.c.bf16 %v2964_v60, %v2272_v47 }
 0xb2c   : > { %v2967_v19 = vpop.f32.mrb[32].mxu1  ;;  %2980 = vmatprep.mubr.msk.bf16.mxu1 %vm523_vm1, %v2293_v36 }
 0xb2d   : > { %v2282_v63 = vpop.f32.mrb[33].mxu1 }
 0xb2e   : > { %v2294_v21 = vpack.c.bf16 %v2967_v19, %v2282_v63 }
 0xb30   : > { %2981 = vmatmul.mubr.msk.bf16.gmra.mrb[24].mxu1 %vm523_vm1, %v2294_v21 }
 0xbfb   : > { %v2978_v9 = vpop.f32.mrb[20].mxu1 }
 0xbfc   : > { %v3088_v5 = vadd.f32 %v2978_v9, %v1368_v57  ;;  %v2365_v46 = vpop.f32.mrb[21].mxu1 }
 0xbfd   : > { %v3089_v4 = vadd.f32 %v2365_v46, %v1366_v51  ;;  %v2979_v12 = vpop.f32.mrb[22].mxu1 }
 0xbfe   : > { %2406 = vst [vmem:[%s4222_s20 + $0x10] sm:$0xff] %v3088_v5  ;;  %v3090_v45 = vadd.f32 %v2979_v12, %v1369_v35  ;;  %v2368_v48 = vpop.f32.mrb[23].mxu1 }
 0xbff   : > { %2404 = vst [vmem:[%s4222_s20] sm:$0xff] %v3089_v4  ;;  %v3091_v13 = vadd.f32 %v2368_v48, %v1367_v7 }
 0xc00   : > { %2407 = vst [vmem:[%s4222_s20 + $0x18] sm:$0xff] %v3090_v45 }
 0xc01   : > { %2405 = vst [vmem:[%s4222_s20 + $0x8] sm:$0xff] %v3091_v13 }
 0xc03   : > { %v2982_v22 = vpop.f32.mrb[24].mxu1 }
 0xc04   : > { %v3092_v38 = vadd.f32 %v2982_v22, %v1372_v10  ;;  %v2381_v42 = vpop.f32.mrb[25].mxu1 }
 0xc05   : > { %v3093_v52 = vadd.f32 %v2381_v42, %v1370_v14  ;;  %v2983_v11 = vpop.f32.mrb[26].mxu1 }
 0xc06   : > { %2410 = vst [vmem:[%s4222_s20 + $0x30] sm:$0xff] %v3092_v38  ;;  %v3094_v23 = vadd.f32 %v2983_v11, %v1373_v15  ;;  %v2384_v44 = vpop.f32.mrb[27].mxu1 }
 0xc07   : > { %2408 = vst [vmem:[%s4222_s20 + $0x20] sm:$0xff] %v3093_v52  ;;  %v3095_v50 = vadd.f32 %v2384_v44, %v1371_v20 }
 0xc08   : > { %2411 = vst [vmem:[%s4222_s20 + $0x38] sm:$0xff] %v3094_v23 }
 0xc09   : > { %2409 = vst [vmem:[%s4222_s20 + $0x28] sm:$0xff] %v3095_v50 }
 0xc0a PF: > { %s4278_s28 = sld [smem:[#allocation13_spill]] }
 0xc10   : > { %s26_s25 = sadd.s32 1, %s4278_s28  }
 0xc11   : > { %p23_p6 = scmp.ge.s32.totalorder %s26_s25, 4  }
 0xc13   :  { %25 = sbr.rel (!%p23_p6) target bundleno = 5 (0x5), region = 123 }
 0xc1a   :  { %2433 = vsyncpa [#allocation3], 1 }
 0xc1b   :  { %2435 = vsyncpa [#allocation3 + $0x1], 1 }
 0xc1c   :  { %2436 = vsyncpa [#allocation5], 1 }
 0xc1d   :  { %2437 = vsyncpa [#allocation8], 1 }

// kernel: context_transformer_forward.5
= control target key start
LH: loop header
LB: loop body
LE: loop exit
PB: predicated region body
PF: predicated region fallthrough
CT: control target
= control target key end

     0   :  { %s4713_s0 = inlined_call_operand.vmem [shape: f32[128,128], index: 0, kind: input, shape index: {}]   ;;  %s4714_s1 = inlined_call_operand.vmem [shape: f32[1,128], index: 1, kind: input, shape index: {}]   ;;  %s4715_s2 = inlined_call_operand.vmem [shape: f32[1,128], index: 2, kind: input, shape index: {}]   ;;  %s4716_s3 = inlined_call_operand.vmem [shape: bf16[128,512], index: 3, kind: input, shape index: {}]   ;;  %s4717_s4 = inlined_call_operand.vmem [shape: f32[1,512], index: 4, kind: input, shape index: {}]   ;;  %s4718_s5 = inlined_call_operand.vmem [shape: bf16[128,512], index: 5, kind: input, shape index: {}]   ;;  %s4719_s6 = inlined_call_operand.vmem [shape: f32[1,512], index: 6, kind: input, shape index: {}]   ;;  %s4720_s7 = inlined_call_operand.vmem [shape: bf16[512,128], index: 7, kind: input, shape index: {}]   ;;  %s4721_s8 = inlined_call_operand.vmem [shape: f32[1,128], index: 8, kind: input, shape index: {}]   ;;  %s4722_s9 = inlined_call_operand.vmem [shape: bf16[128,64], index: 9, kind: input, shape index: {}]   ;;  %s4723_s10 = inlined_call_operand.vmem [shape: f32[1,64], index: 10, kind: input, shape index: {}]   ;;  %s4724_s11 = inlined_call_operand.vmem [shape: f32[128,64], index: 11, kind: input, shape index: {}]   ;;  %s4725_s12 = inlined_call_operand.hbm [shape: f32[128,64], index: 12, kind: output, shape index: {}]  }
   0x1   :  { %v43_v0 = vld [vmem:[%s4713_s0] sm:$0xff]  ;;  %v45_v1 = vld [vmem:[%s4713_s0 + $0x10] sm:$0xff]  ;;  %v44_v2 = vld [vmem:[%s4713_s0 + $0x8] sm:$0xff] }
   0x2   :  { %59 = vadd.xlane.f32.xlu0 %v43_v0  ;;  %63 = vadd.xlane.f32.xlu1 %v45_v1  ;;  %v46_v3 = vld [vmem:[%s4713_s0 + $0x18] sm:$0xff]  ;;  %v47_v4 = vld [vmem:[%s4713_s0 + $0x20] sm:$0xff]  ;;  %v48_v5 = vld [vmem:[%s4713_s0 + $0x28] sm:$0xff] }
   0x3   :  { %v3030_v6 = vld [vmem:[%s4713_s0 + $0x30] sm:$0xff]  ;;  %v3035_v7 = vld [vmem:[%s4713_s0 + $0x38] sm:$0xff]  ;;  %v3040_v8 = vld [vmem:[%s4713_s0 + $0x40] sm:$0xff] }
   0x4   :  { %v3045_v9 = vld [vmem:[%s4713_s0 + $0x48] sm:$0xff]  ;;  %v3052_v10 = vld [vmem:[%s4713_s0 + $0x50] sm:$0xff]  ;;  %v3057_v11 = vld [vmem:[%s4713_s0 + $0x58] sm:$0xff] }
   0x5   :  { %v3064_v12 = vld [vmem:[%s4713_s0 + $0x60] sm:$0xff]  ;;  %v3069_v13 = vld [vmem:[%s4713_s0 + $0x68] sm:$0xff]  ;;  %v3076_v14 = vld [vmem:[%s4713_s0 + $0x70] sm:$0xff] }
   0x6   :  { %61 = vadd.xlane.f32.xlu0 %v44_v2  ;;  %65 = vadd.xlane.f32.xlu1 %v46_v3  ;;  %v3081_v15 = vld [vmem:[%s4713_s0 + $0x78] sm:$0xff]  ;;  %v2604_v16 = vld [vmem:[%s4716_s3 + $0x4] ss:$16 sps:$4 sm:$0xff]   ;;  %v2606_v17 = vld [vmem:[%s4716_s3] ss:$16 sps:$4 sm:$0xff]  }
   0x7   :  { %v2607_v18 = vld [vmem:[%s4716_s3 + $0xc] ss:$16 sps:$4 sm:$0xff]   ;;  %v2609_v19 = vld [vmem:[%s4716_s3 + $0x8] ss:$16 sps:$4 sm:$0xff]   ;;  %v2610_v20 = vld [vmem:[%s4716_s3 + $0x24] ss:$16 sps:$4 sm:$0xff]   ;;  %504 = vmatprep.subr.bf16.mxu0 %v2604_v16 }
   0x8   :  { %617 = vmatprep.subr.bf16.mxu1 %v2607_v18  ;;  %v2613_v21 = vld [vmem:[%s4716_s3 + $0x2c] ss:$16 sps:$4 sm:$0xff]  }
   0xa   :  { %67 = vadd.xlane.f32.xlu0 %v47_v4  ;;  %69 = vadd.xlane.f32.xlu1 %v48_v5 }
   0xe   :  { %71 = vadd.xlane.f32.xlu0 %v3030_v6  ;;  %73 = vadd.xlane.f32.xlu1 %v3035_v7 }
  0x12   :  { %75 = vadd.xlane.f32.xlu0 %v3040_v8  ;;  %77 = vadd.xlane.f32.xlu1 %v3045_v9 }
  0x16   :  { %79 = vadd.xlane.f32.xlu0 %v3052_v10  ;;  %81 = vadd.xlane.f32.xlu1 %v3057_v11 }
  0x1a   :  { %83 = vadd.xlane.f32.xlu0 %v3064_v12  ;;  %85 = vadd.xlane.f32.xlu1 %v3069_v13 }
  0x1e   :  { %87 = vadd.xlane.f32.xlu0 %v3076_v14  ;;  %89 = vadd.xlane.f32.xlu1 %v3081_v15 }
  0x1f   :  { %17 = vsyncpa [#allocation3], 0  ;;  %505 = vmatpush1.bf16.msra.mxu0 %v2606_v17  ;;  %618 = vmatpush1.bf16.msra.mxu1 %v2609_v19  ;;  %v2612_v22 = vld [vmem:[%s4716_s3 + $0x20] ss:$16 sps:$4 sm:$0xff]   ;;  %v2615_v61 = vld [vmem:[%s4716_s3 + $0x28] ss:$16 sps:$4 sm:$0xff]  }
  0x20   :  { %506 = vmatprep.subr.bf16.mxu0 %v2610_v20  ;;  %619 = vmatprep.subr.bf16.mxu1 %v2613_v21  ;;  %vm2267_vm0 = vcmask 523264  }
  0x23   :  { %507 = vmatpush1.bf16.msra.mxu0 %v2612_v22  ;;  %620 = vmatpush1.bf16.msra.mxu1 %v2615_v61  ;;  %v2622_v22 = vld [vmem:[%s4716_s3 + $0x64] ss:$16 sps:$4 sm:$0xff]  }
  0x8f   :  { %v60_v23 = vpop.xlane.xlu0 %59  ;;  %v64_v24 = vpop.xlane.xlu1 %63 }
  0x90   :  { %v92_v25 = vmul.f32 0.0078125, %v60_v23  ;;  %v94_v26 = vmul.f32 0.0078125, %v64_v24  ;;  %v2625_v23 = vld [vmem:[%s4716_s3 + $0x6c] ss:$16 sps:$4 sm:$0xff]  }
  0x92   :  { %v3108_v27 = vsub.f32 %v43_v0, %v92_v25  ;;  %v3110_v28 = vsub.f32 %v45_v1, %v94_v26 }
  0x93   :  { %v62_v29 = vpop.xlane.xlu0 %61  ;;  %v66_v30 = vpop.xlane.xlu1 %65 }
  0x94   :  { %v93_v31 = vmul.f32 0.0078125, %v62_v29  ;;  %v124_v32 = vmul.f32 %v3108_v27, %v3108_v27  ;;  %v95_v33 = vmul.f32 0.0078125, %v66_v30  ;;  %v126_v36 = vmul.f32 %v3110_v28, %v3110_v28 }
  0x96   :  { %v3114_v34 = vsub.f32 %v44_v2, %v93_v31  ;;  %140 = vadd.xlane.f32.xlu0 %v124_v32  ;;  %v3116_v35 = vsub.f32 %v46_v3, %v95_v33  ;;  %v2616_v3 = vld [vmem:[%s4716_s3 + $0x44] ss:$16 sps:$4 sm:$0xff]  }
  0x97   :  { %v68_v37 = vpop.xlane.xlu0 %67  ;;  %v70_v38 = vpop.xlane.xlu1 %69  ;;  %508 = vmatprep.subr.bf16.mxu0 %v2616_v3 }
  0x98   :  { %v96_v39 = vmul.f32 0.0078125, %v68_v37  ;;  %v125_v40 = vmul.f32 %v3114_v34, %v3114_v34  ;;  %v97_v41 = vmul.f32 0.0078125, %v70_v38  ;;  %v127_v44 = vmul.f32 %v3116_v35, %v3116_v35  ;;  %v2631_v37 = vld [vmem:[%s4716_s3 + $0x8c] ss:$16 sps:$4 sm:$0xff]  }
  0x9a   :  { %v3122_v42 = vsub.f32 %v47_v4, %v96_v39  ;;  %144 = vadd.xlane.f32.xlu0 %v126_v36  ;;  %142 = vadd.xlane.f32.xlu1 %v125_v40  ;;  %v3124_v43 = vsub.f32 %v48_v5, %v97_v41  ;;  %v2619_v4 = vld [vmem:[%s4716_s3 + $0x4c] ss:$16 sps:$4 sm:$0xff]   ;;  %v2628_v36 = vld [vmem:[%s4716_s3 + $0x84] ss:$16 sps:$4 sm:$0xff]  }
  0x9b   :  { %v72_v45 = vpop.xlane.xlu0 %71  ;;  %v74_v46 = vpop.xlane.xlu1 %73  ;;  %621 = vmatprep.subr.bf16.mxu1 %v2619_v4  ;;  %v2634_v40 = vld [vmem:[%s4716_s3 + $0xa4] ss:$16 sps:$4 sm:$0xff]   ;;  %v2637_v41 = vld [vmem:[%s4716_s3 + $0xac] ss:$16 sps:$4 sm:$0xff]  }
  0x9c   :  { %v98_v47 = vmul.f32 0.0078125, %v72_v45  ;;  %v128_v48 = vmul.f32 %v3122_v42, %v3122_v42  ;;  %v99_v49 = vmul.f32 0.0078125, %v74_v46  ;;  %v129_v52 = vmul.f32 %v3124_v43, %v3124_v43  ;;  %v2639_v45 = vld [vmem:[%s4716_s3 + $0xa8] ss:$16 sps:$4 sm:$0xff]   ;;  %v2640_v46 = vld [vmem:[%s4716_s3 + $0xc4] ss:$16 sps:$4 sm:$0xff]  }
  0x9e   :  { %v3131_v50 = vsub.f32 %v3030_v6, %v98_v47  ;;  %146 = vadd.xlane.f32.xlu1 %v127_v44  ;;  %148 = vadd.xlane.f32.xlu0 %v128_v48  ;;  %v3134_v51 = vsub.f32 %v3035_v7, %v99_v49  ;;  %v2636_v44 = vld [vmem:[%s4716_s3 + $0xa0] ss:$16 sps:$4 sm:$0xff]   ;;  %v2643_v47 = vld [vmem:[%s4716_s3 + $0xcc] ss:$16 sps:$4 sm:$0xff]   ;;  %v2645_v49 = vld [vmem:[%s4716_s3 + $0xc8] ss:$16 sps:$4 sm:$0xff]  }
  0x9f   :  { %v76_v53 = vpop.xlane.xlu0 %75  ;;  %v78_v54 = vpop.xlane.xlu1 %77  ;;  %v2642_v48 = vld [vmem:[%s4716_s3 + $0xc0] ss:$16 sps:$4 sm:$0xff]  }
  0xa0   :  { %v100_v55 = vmul.f32 0.0078125, %v76_v53  ;;  %v130_v56 = vmul.f32 %v3131_v50, %v3131_v50  ;;  %v101_v57 = vmul.f32 0.0078125, %v78_v54  ;;  %v131_v60 = vmul.f32 %v3134_v51, %v3134_v51  ;;  %v2649_v53 = vld [vmem:[%s4716_s3 + $0xec] ss:$16 sps:$4 sm:$0xff]   ;;  %v2648_v54 = vld [vmem:[%s4716_s3 + $0xe0] ss:$16 sps:$4 sm:$0xff]  }
  0xa2   :  { %v3141_v58 = vsub.f32 %v3040_v8, %v100_v55  ;;  %150 = vadd.xlane.f32.xlu1 %v129_v52  ;;  %152 = vadd.xlane.f32.xlu0 %v130_v56  ;;  %v3144_v59 = vsub.f32 %v3045_v9, %v101_v57  ;;  %v2618_v8 = vld [vmem:[%s4716_s3 + $0x40] ss:$16 sps:$4 sm:$0xff]   ;;  %v2646_v52 = vld [vmem:[%s4716_s3 + $0xe4] ss:$16 sps:$4 sm:$0xff]   ;;  %v2651_v55 = vld [vmem:[%s4716_s3 + $0xe8] ss:$16 sps:$4 sm:$0xff]  }
  0xa3   :  { %v80_v62 = vpop.xlane.xlu0 %79  ;;  %v82_v63 = vpop.xlane.xlu1 %81  ;;  %509 = vmatpush1.bf16.msra.mxu0 %v2618_v8  ;;  %v2940_v56 = vmov 0   ;;  %v2654_v57 = vld [vmem:[%s4718_s5 + $0x4] ss:$16 sps:$4 sm:$0xff]  }
  0xa4   :  { %v102_v0 = vmul.f32 0.0078125, %v80_v62  ;;  %v132_v1 = vmul.f32 %v3141_v58, %v3141_v58  ;;  %v103_v2 = vmul.f32 0.0078125, %v82_v63  ;;  %v133_v7 = vmul.f32 %v3144_v59, %v3144_v59  ;;  %510 = vmatprep.subr.bf16.mxu0 %v2622_v22  ;;  %536 = vmatprep.mubr.bf16.mxu0 %v2940_v56 }
  0xa5   :  { %649 = vmatprep.mubr.bf16.mxu1 %v2940_v56 }
  0xa6   :  { %v3160_v5 = vsub.f32 %v3052_v10, %v102_v0  ;;  %154 = vadd.xlane.f32.xlu1 %v131_v60  ;;  %156 = vadd.xlane.f32.xlu0 %v132_v1  ;;  %v3163_v6 = vsub.f32 %v3057_v11, %v103_v2  ;;  %v2621_v10 = vld [vmem:[%s4716_s3 + $0x48] ss:$16 sps:$4 sm:$0xff]   ;;  %v2657_v60 = vld [vmem:[%s4718_s5 + $0xc] ss:$16 sps:$4 sm:$0xff]  }
  0xa7   :  { %v84_v9 = vpop.xlane.xlu0 %83  ;;  %v86_v16 = vpop.xlane.xlu1 %85  ;;  %622 = vmatpush1.bf16.msra.mxu1 %v2621_v10 }
  0xa8   :  { %v104_v17 = vmul.f32 0.0078125, %v84_v9  ;;  %v134_v11 = vmul.f32 %v3160_v5, %v3160_v5  ;;  %v105_v18 = vmul.f32 0.0078125, %v86_v16  ;;  %v135_v21 = vmul.f32 %v3163_v6, %v3163_v6  ;;  %623 = vmatprep.subr.bf16.mxu1 %v2625_v23 }
  0xaa   :  { %v3176_v19 = vsub.f32 %v3064_v12, %v104_v17  ;;  %158 = vadd.xlane.f32.xlu1 %v133_v7  ;;  %160 = vadd.xlane.f32.xlu0 %v134_v11  ;;  %v3179_v20 = vsub.f32 %v3069_v13, %v105_v18  ;;  %v2624_v12 = vld [vmem:[%s4716_s3 + $0x60] ss:$16 sps:$4 sm:$0xff]   ;;  %v2627_v13 = vld [vmem:[%s4716_s3 + $0x68] ss:$16 sps:$4 sm:$0xff]  }
  0xab   :  { %v88_v24 = vpop.xlane.xlu0 %87  ;;  %v90_v25 = vpop.xlane.xlu1 %89  ;;  %511 = vmatpush1.bf16.msra.mxu0 %v2624_v12  ;;  %624 = vmatpush1.bf16.msra.mxu1 %v2627_v13 }
  0xac   :  { %v106_v26 = vmul.f32 0.0078125, %v88_v24  ;;  %v136_v29 = vmul.f32 %v3176_v19, %v3176_v19  ;;  %v107_v30 = vmul.f32 0.0078125, %v90_v25  ;;  %v137_v33 = vmul.f32 %v3179_v20, %v3179_v20  ;;  %512 = vmatprep.subr.bf16.mxu0 %v2628_v36  ;;  %625 = vmatprep.subr.bf16.mxu1 %v2631_v37 }
  0xae   :  { %v3198_v31 = vsub.f32 %v3076_v14, %v106_v26  ;;  %162 = vadd.xlane.f32.xlu1 %v135_v21  ;;  %164 = vadd.xlane.f32.xlu0 %v136_v29  ;;  %v3201_v32 = vsub.f32 %v3081_v15, %v107_v30  ;;  %v2630_v14 = vld [vmem:[%s4716_s3 + $0x80] ss:$16 sps:$4 sm:$0xff]   ;;  %v2633_v15 = vld [vmem:[%s4716_s3 + $0x88] ss:$16 sps:$4 sm:$0xff]  }
  0xaf   :  { %513 = vmatpush1.bf16.msra.mxu0 %v2630_v14  ;;  %626 = vmatpush1.bf16.msra.mxu1 %v2633_v15  ;;  %v3269_v26 = vld [vmem:[%s4714_s1] ss:$0 sm:$0xff] }
  0xb0   :  { %v138_v38 = vmul.f32 %v3198_v31, %v3198_v31  ;;  %v139_v39 = vmul.f32 %v3201_v32, %v3201_v32  ;;  %514 = vmatprep.subr.bf16.mxu0 %v2634_v40  ;;  %627 = vmatprep.subr.bf16.mxu1 %v2637_v41 }
  0xb2   :  { %166 = vadd.xlane.f32.xlu1 %v137_v33  ;;  %168 = vadd.xlane.f32.xlu0 %v138_v38 }
  0xb3   :  { %515 = vmatpush1.bf16.msra.mxu0 %v2636_v44  ;;  %628 = vmatpush1.bf16.msra.mxu1 %v2639_v45 }
  0xb4   :  { %516 = vmatprep.subr.bf16.mxu0 %v2640_v46  ;;  %629 = vmatprep.subr.bf16.mxu1 %v2643_v47 }
  0xb6   :  { %170 = vadd.xlane.f32.xlu1 %v139_v39 }
  0xb7   :  { %517 = vmatpush1.bf16.msra.mxu0 %v2642_v48  ;;  %630 = vmatpush1.bf16.msra.mxu1 %v2645_v49  ;;  %v2652_v48 = vld [vmem:[%s4718_s5] ss:$16 sps:$4 sm:$0xff]   ;;  %v2655_v49 = vld [vmem:[%s4718_s5 + $0x8] ss:$16 sps:$4 sm:$0xff]  }
  0xb8   :  { %518 = vmatprep.subr.bf16.mxu0 %v2646_v52  ;;  %631 = vmatprep.subr.bf16.mxu1 %v2649_v53 }
  0xbb   :  { %519 = vmatpush1.bf16.msra.mxu0 %v2648_v54  ;;  %632 = vmatpush1.bf16.msra.mxu1 %v2651_v55  ;;  %v2660_v54 = vld [vmem:[%s4718_s5 + $0x24] ss:$16 sps:$4 sm:$0xff]   ;;  %v2663_v55 = vld [vmem:[%s4718_s5 + $0x2c] ss:$16 sps:$4 sm:$0xff]  }
  0xbc   :  { %944 = vmatprep.subr.bf16.mxu0 %v2654_v57  ;;  %1057 = vmatprep.subr.bf16.mxu1 %v2657_v60 }
 0x123   :  { %v141_v61 = vpop.xlane.xlu0 %140 }
 0x124   :  { %v172_v62 = vmul.f32 0.0078125, %v141_v61 }
 0x126   :  { %v188_v63 = vadd.f32 1e-05, %v172_v62  ;;  %v2658_v62 = vld [vmem:[%s4718_s5 + $0x20] ss:$16 sps:$4 sm:$0xff]  }
 0x127   :  { %v143_v0 = vpop.xlane.xlu1 %142  ;;  %v145_v1 = vpop.xlane.xlu0 %144 }
 0x128   :  { %2740 = vrsqrt.f32 %v188_v63  ;;  %v173_v2 = vmul.f32 0.0078125, %v143_v0  ;;  %v174_v3 = vmul.f32 0.0078125, %v145_v1  ;;  %v2661_v63 = vld [vmem:[%s4718_s5 + $0x28] ss:$16 sps:$4 sm:$0xff]  }
 0x12a   :  { %v189_v4 = vadd.f32 1e-05, %v173_v2  ;;  %v190_v7 = vadd.f32 1e-05, %v174_v3  ;;  %v2666_v3 = vld [vmem:[%s4718_s5 + $0x44] ss:$16 sps:$4 sm:$0xff]  }
 0x12b   :  { %v147_v8 = vpop.xlane.xlu1 %146  ;;  %v149_v9 = vpop.xlane.xlu0 %148 }
 0x12c   :  { %2742 = vrsqrt.f32 %v189_v4  ;;  %v175_v16 = vmul.f32 0.0078125, %v147_v8  ;;  %v176_v17 = vmul.f32 0.0078125, %v149_v9  ;;  %v2669_v4 = vld [vmem:[%s4718_s5 + $0x4c] ss:$16 sps:$4 sm:$0xff]  }
 0x12d   :  { %2744 = vrsqrt.f32 %v190_v7 }
 0x12e   :  { %v191_v10 = vadd.f32 1e-05, %v175_v16  ;;  %v192_v22 = vadd.f32 1e-05, %v176_v17  ;;  %v2664_v17 = vld [vmem:[%s4718_s5 + $0x40] ss:$16 sps:$4 sm:$0xff]  }
 0x12f   :  { %v151_v11 = vpop.xlane.xlu1 %150  ;;  %v153_v25 = vpop.xlane.xlu0 %152 }
 0x130   :  { %2746 = vrsqrt.f32 %v191_v10  ;;  %v177_v18 = vmul.f32 0.0078125, %v151_v11  ;;  %v178_v30 = vmul.f32 0.0078125, %v153_v25 }
 0x132   :  { %v2741_v21 = vpop.eup %2740  ;;  %v193_v23 = vadd.f32 1e-05, %v177_v18  ;;  %v194_v40 = vadd.f32 1e-05, %v178_v30 }
 0x133   :  { %v220_v24 = vmul.f32 %v2741_v21, %v3108_v27  ;;  %v155_v12 = vpop.xlane.xlu1 %154  ;;  %v3276_v27 = vld [vmem:[%s4715_s2] ss:$0 sm:$0xff]  ;;  %v157_v45 = vpop.xlane.xlu0 %156 }
 0x134   :  { %2748 = vrsqrt.f32 %v193_v23  ;;  %v179_v13 = vmul.f32 0.0078125, %v155_v12  ;;  %v180_v53 = vmul.f32 0.0078125, %v157_v45  ;;  %v2675_v23 = vld [vmem:[%s4718_s5 + $0x6c] ss:$16 sps:$4 sm:$0xff]   ;;  %v2676_v45 = vld [vmem:[%s4718_s5 + $0x80] ss:$16 sps:$4 sm:$0xff]  }
 0x135   :  { %2750 = vrsqrt.f32 %v192_v22  ;;  %v243_v36 = vmul.f32 %v3269_v26, %v220_v24  ;;  %v2672_v22 = vld [vmem:[%s4718_s5 + $0x64] ss:$16 sps:$4 sm:$0xff]  }
 0x136   :  { %v2743_v29 = vpop.eup %2742  ;;  %v195_v14 = vadd.f32 1e-05, %v179_v13  ;;  %v196_v7 = vadd.f32 1e-05, %v180_v53 }
 0x137   :  { %v221_v33 = vmul.f32 %v2743_v29, %v3114_v34  ;;  %v2745_v37 = vpop.eup %2744  ;;  %v159_v15 = vpop.xlane.xlu1 %158  ;;  %v266_v34 = vadd.f32 %v3276_v27, %v243_v36  ;;  %v2673_v36 = vld [vmem:[%s4718_s5 + $0x68] ss:$16 sps:$4 sm:$0xff]  }
 0x138   :  { %v222_v41 = vmul.f32 %v2745_v37, %v3110_v28  ;;  %2752 = vrsqrt.f32 %v195_v14  ;;  %v181_v47 = vmul.f32 0.0078125, %v159_v15  ;;  %v161_v8 = vpop.xlane.xlu0 %160  ;;  %v2681_v14 = vld [vmem:[%s4718_s5 + $0x8c] ss:$16 sps:$4 sm:$0xff]  }
 0x139   :  { %v244_v38 = vmul.f32 %v3269_v26, %v221_v33  ;;  %2754 = vrsqrt.f32 %v194_v40  ;;  %v182_v21 = vmul.f32 0.0078125, %v161_v8  ;;  %v2670_v33 = vld [vmem:[%s4718_s5 + $0x60] ss:$16 sps:$4 sm:$0xff]  }
 0x13a   :  { %v2747_v39 = vpop.eup %2746  ;;  %v245_v57 = vmul.f32 %v3269_v26, %v222_v41  ;;  %v197_v61 = vadd.f32 1e-05, %v181_v47  ;;  %v2684_v47 = vld [vmem:[%s4718_s5 + $0xa4] ss:$16 sps:$4 sm:$0xff]  }
 0x13b   :  { %v223_v44 = vmul.f32 %v2747_v39, %v3116_v35  ;;  %v267_v46 = vadd.f32 %v3276_v27, %v244_v38  ;;  %v163_v1 = vpop.xlane.xlu1 %162  ;;  %v198_v37 = vadd.f32 1e-05, %v182_v21 }
 0x13c   :  { %v268_v9 = vadd.f32 %v3276_v27, %v245_v57  ;;  %2756 = vrsqrt.f32 %v197_v61  ;;  %v183_v16 = vmul.f32 0.0078125, %v163_v1  ;;  %v165_v38 = vpop.xlane.xlu0 %164  ;;  %v2682_v57 = vld [vmem:[%s4718_s5 + $0xa0] ss:$16 sps:$4 sm:$0xff]  }
 0x13d   :  { %v3289_v52 = vpack.c.bf16 %v267_v46, %v266_v34  ;;  %v246_v28 = vmul.f32 %v3269_v26, %v223_v44  ;;  %2758 = vrsqrt.f32 %v196_v7  ;;  %v2679_v34 = vld [vmem:[%s4718_s5 + $0x88] ss:$16 sps:$4 sm:$0xff]   ;;  %v184_v46 = vmul.f32 0.0078125, %v165_v38  ;;  %v2688_v7 = vld [vmem:[%s4718_s5 + $0xc0] ss:$16 sps:$4 sm:$0xff]  }
 0x13e   :  { %v2749_v35 = vpop.eup %2748  ;;  %v199_v12 = vadd.f32 1e-05, %v183_v16  ;;  %v2699_v16 = vld [vmem:[%s4718_s5 + $0xec] ss:$16 sps:$4 sm:$0xff]  }
 0x13f   :  { %537 = vmatmul.mubr.bf16.vlgmr.msra.gmra.mrb[0].mxu0 %v3289_v52  ;;  %650 = vmatmul.mubr.bf16.vlgmr.msra.gmra.mrb[0].mxu1 %v3289_v52  ;;  %v2751_v60 = vpop.eup %2750  ;;  %v225_v0 = vmul.f32 %v2749_v35, %v3124_v43  ;;  %v269_v2 = vadd.f32 %v3276_v27, %v246_v28  ;;  %v167_v29 = vpop.xlane.xlu1 %166  ;;  %v200_v61 = vadd.f32 1e-05, %v184_v46 }
 0x140   :  { %945 = vmatpush1.bf16.msra.mxu0 %v2652_v48  ;;  %1058 = vmatpush1.bf16.msra.mxu1 %v2655_v49  ;;  %v224_v43 = vmul.f32 %v2751_v60, %v3122_v42  ;;  %v2667_v42 = vld [vmem:[%s4718_s5 + $0x48] ss:$16 sps:$4 sm:$0xff]   ;;  %2760 = vrsqrt.f32 %v199_v12  ;;  %v185_v40 = vmul.f32 0.0078125, %v167_v29  ;;  %v2687_v48 = vld [vmem:[%s4718_s5 + $0xac] ss:$16 sps:$4 sm:$0xff]  }
 0x141   :  { %546 = vmatprep.mubr.bf16.mxu0 %v2940_v56  ;;  %659 = vmatprep.mubr.bf16.mxu1 %v2940_v56  ;;  %v3319_v10 = vpack.c.bf16 %v269_v2, %v268_v9  ;;  %v248_v11 = vmul.f32 %v3269_v26, %v225_v0  ;;  %2762 = vrsqrt.f32 %v198_v37  ;;  %v2685_v60 = vld [vmem:[%s4718_s5 + $0xa8] ss:$16 sps:$4 sm:$0xff]   ;;  %v169_v0 = vpop.xlane.xlu0 %168  ;;  %v2696_v9 = vld [vmem:[%s4718_s5 + $0xe4] ss:$16 sps:$4 sm:$0xff]  }
 0x142   :  { %946 = vmatprep.subr.bf16.mxu0 %v2660_v54  ;;  %1059 = vmatprep.subr.bf16.mxu1 %v2663_v55  ;;  %v2753_v18 = vpop.eup %2752  ;;  %v247_v24 = vmul.f32 %v3269_v26, %v224_v43  ;;  %v201_v35 = vadd.f32 1e-05, %v185_v40  ;;  %v2691_v43 = vld [vmem:[%s4718_s5 + $0xc8] ss:$16 sps:$4 sm:$0xff]   ;;  %v186_v8 = vmul.f32 0.0078125, %v169_v0  ;;  %v2719_v0 = vld [vmem:[%s4720_s7 + $0xa0] sm:$0xff]  }
 0x143   :  { %v2755_v25 = vpop.eup %2754  ;;  %v227_v13 = vmul.f32 %v2753_v18, %v3134_v51  ;;  %v271_v30 = vadd.f32 %v3276_v27, %v248_v11  ;;  %v2678_v51 = vld [vmem:[%s4718_s5 + $0x84] ss:$16 sps:$4 sm:$0xff]   ;;  %v171_v54 = vpop.xlane.xlu1 %170 }
 0x144   :  { %947 = vmatpush1.bf16.msra.mxu0 %v2658_v62  ;;  %1060 = vmatpush1.bf16.msra.mxu1 %v2661_v63  ;;  %v226_v15 = vmul.f32 %v2755_v25, %v3131_v50  ;;  %v270_v39 = vadd.f32 %v3276_v27, %v247_v24  ;;  %v2693_v62 = vld [vmem:[%s4718_s5 + $0xcc] ss:$16 sps:$4 sm:$0xff]   ;;  %2764 = vrsqrt.f32 %v201_v35  ;;  %v187_v2 = vmul.f32 0.0078125, %v171_v54  ;;  %v2709_v35 = vld [vmem:[%s4720_s7 + $0x10] sm:$0xff]  }
 0x145   :  { %948 = vmatprep.subr.bf16.mxu0 %v2666_v3  ;;  %1061 = vmatprep.subr.bf16.mxu1 %v2669_v4  ;;  %v250_v44 = vmul.f32 %v3269_v26, %v227_v13  ;;  %2766 = vrsqrt.f32 %v200_v61  ;;  %v202_v24 = vadd.f32 1e-05, %v186_v8  ;;  %v2711_v54 = vld [vmem:[%s4720_s7 + $0x90] sm:$0xff]   ;;  %v2715_v61 = vld [vmem:[%s4720_s7 + $0x98] sm:$0xff]  }
 0x146   :  { %v3355_v41 = vpack.c.bf16 %v271_v30, %v270_v39  ;;  %v2757_v50 = vpop.eup %2756  ;;  %v249_v49 = vmul.f32 %v3269_v26, %v226_v15  ;;  %v2727_v8 = vld [vmem:[%s4720_s7 + $0xb0] sm:$0xff]  }
 0x147   :  { %547 = vmatmul.mubr.bf16.gmra.mrb[4].mxu0 %v3319_v10  ;;  %660 = vmatmul.mubr.bf16.gmra.mrb[4].mxu1 %v3319_v10  ;;  %v2759_v28 = vpop.eup %2758  ;;  %v229_v53 = vmul.f32 %v2757_v50, %v3144_v59  ;;  %v273_v55 = vadd.f32 %v3276_v27, %v250_v44  ;;  %v2690_v59 = vld [vmem:[%s4718_s5 + $0xc4] ss:$16 sps:$4 sm:$0xff]  }
 0x148   :  { %556 = vmatprep.mubr.bf16.mxu0 %v2940_v56  ;;  %669 = vmatprep.mubr.bf16.mxu1 %v2940_v56  ;;  %v228_v63 = vmul.f32 %v2759_v28, %v3141_v58  ;;  %v272_v1 = vadd.f32 %v3276_v27, %v249_v49  ;;  %v2706_v49 = vld [vmem:[%s4720_s7 + $0xc8] sm:$0xff]   ;;  %v2708_v28 = vld [vmem:[%s4720_s7 + $0x50] sm:$0xff]  }
 0x149   :  { %949 = vmatpush1.bf16.msra.mxu0 %v2664_v17  ;;  %1062 = vmatpush1.bf16.msra.mxu1 %v2667_v42  ;;  %v252_v4 = vmul.f32 %v3269_v26, %v229_v53  ;;  %v203_v42 = vadd.f32 1e-05, %v187_v2  ;;  %v2710_v53 = vld [vmem:[%s4720_s7 + $0xd0] sm:$0xff]   ;;  %v2722_v2 = vld [vmem:[%s4720_s7 + $0xe8] sm:$0xff]  }
 0x14a   :  { %950 = vmatprep.subr.bf16.mxu0 %v2672_v22  ;;  %1063 = vmatprep.subr.bf16.mxu1 %v2675_v23  ;;  %v3391_v3 = vpack.c.bf16 %v273_v55, %v272_v1  ;;  %v2761_v58 = vpop.eup %2760  ;;  %v251_v17 = vmul.f32 %v3269_v26, %v228_v63  ;;  %v2694_v22 = vld [vmem:[%s4718_s5 + $0xe0] ss:$16 sps:$4 sm:$0xff]   ;;  %v2697_v23 = vld [vmem:[%s4718_s5 + $0xe8] ss:$16 sps:$4 sm:$0xff]   ;;  %s2941_s5 = smov [#allocation2]  }
 0x14b   :  { %v2763_v11 = vpop.eup %2762  ;;  %v231_v18 = vmul.f32 %v2761_v58, %v3163_v6  ;;  %v275_v21 = vadd.f32 %v3276_v27, %v252_v4  ;;  %2768 = vrsqrt.f32 %v203_v42  ;;  %v2712_v55 = vld [vmem:[%s4720_s7 + $0x58] sm:$0xff]   ;;  %v2718_v63 = vld [vmem:[%s4720_s7 + $0xe0] sm:$0xff]   ;;  %v2720_v1 = vld [vmem:[%s4720_s7 + $0x68] sm:$0xff]  }
 0x14c   :  { %v230_v25 = vmul.f32 %v2763_v11, %v3160_v5  ;;  %v274_v12 = vadd.f32 %v3276_v27, %v251_v17  ;;  %2770 = vrsqrt.f32 %v202_v24  ;;  %v2723_v4 = vld [vmem:[%s4720_s7 + $0xa8] sm:$0xff]   ;;  %v2725_v58 = vld [vmem:[%s4720_s7 + $0x30] sm:$0xff]   ;;  %v2729_v17 = vld [vmem:[%s4720_s7 + $0x38] sm:$0xff]  }
 0x14d   :  { %951 = vmatpush1.bf16.msra.mxu0 %v2670_v33  ;;  %1064 = vmatpush1.bf16.msra.mxu1 %v2673_v36  ;;  %v254_v13 = vmul.f32 %v3269_v26, %v231_v18  ;;  %v2731_v11 = vld [vmem:[%s4720_s7 + $0xb8] sm:$0xff]  }
 0x14e   :  { %952 = vmatprep.subr.bf16.mxu0 %v2678_v51  ;;  %1065 = vmatprep.subr.bf16.mxu1 %v2681_v14  ;;  %v286_v6 = vpack.c.bf16 %v275_v21, %v274_v12  ;;  %v2765_v29 = vpop.eup %2764  ;;  %v253_v30 = vmul.f32 %v3269_v26, %v230_v25 }
 0x14f   :  { %557 = vmatmul.mubr.bf16.gmra.mrb[8].mxu0 %v3355_v41  ;;  %670 = vmatmul.mubr.bf16.gmra.mrb[8].mxu1 %v3355_v41  ;;  %v2767_v33 = vpop.eup %2766  ;;  %v233_v5 = vmul.f32 %v2765_v29, %v3179_v20  ;;  %v277_v36 = vadd.f32 %v3276_v27, %v254_v13 }
 0x150   :  { %566 = vmatprep.mubr.bf16.mxu0 %v2940_v56  ;;  %679 = vmatprep.mubr.bf16.mxu1 %v2940_v56  ;;  %v232_v37 = vmul.f32 %v2767_v33, %v3176_v19  ;;  %v276_v51 = vadd.f32 %v3276_v27, %v253_v30 }
 0x151   :  { %953 = vmatpush1.bf16.msra.mxu0 %v2676_v45  ;;  %1066 = vmatpush1.bf16.msra.mxu1 %v2679_v34  ;;  %v256_v15 = vmul.f32 %v3269_v26, %v233_v5 }
 0x152   :  { %954 = vmatprep.subr.bf16.mxu0 %v2684_v47  ;;  %1067 = vmatprep.subr.bf16.mxu1 %v2687_v48  ;;  %v287_v14 = vpack.c.bf16 %v277_v36, %v276_v51  ;;  %v255_v39 = vmul.f32 %v3269_v26, %v232_v37 }
 0x153   :  { %v279_v44 = vadd.f32 %v3276_v27, %v256_v15 }
 0x154   :  { %v278_v45 = vadd.f32 %v3276_v27, %v255_v39 }
 0x155   :  { %955 = vmatpush1.bf16.msra.mxu0 %v2682_v57  ;;  %1068 = vmatpush1.bf16.msra.mxu1 %v2685_v60  ;;  %v2769_v38 = vpop.eup %2768  ;;  %v2713_v57 = vld [vmem:[%s4720_s7 + $0x18] sm:$0xff]  }
 0x156   :  { %956 = vmatprep.subr.bf16.mxu0 %v2690_v59  ;;  %1069 = vmatprep.subr.bf16.mxu1 %v2693_v62  ;;  %v2771_v40 = vpop.eup %2770  ;;  %v235_v20 = vmul.f32 %v2769_v38, %v3201_v32  ;;  %v288_v34 = vpack.c.bf16 %v279_v44, %v278_v45  ;;  %v2714_v60 = vld [vmem:[%s4720_s7 + $0xd8] sm:$0xff]   ;;  %v2716_v59 = vld [vmem:[%s4720_s7 + $0x60] sm:$0xff]  }
 0x157   :  { %567 = vmatmul.mubr.bf16.gmra.mrb[12].mxu0 %v3391_v3  ;;  %680 = vmatmul.mubr.bf16.gmra.mrb[12].mxu1 %v3391_v3  ;;  %v234_v19 = vmul.f32 %v2771_v40, %v3198_v31  ;;  %v2700_v31 = vld [vmem:[%s4720_s7 + $0x40] sm:$0xff]  }
 0x158   :  { %576 = vmatprep.mubr.bf16.mxu0 %v2940_v56  ;;  %689 = vmatprep.mubr.bf16.mxu1 %v2940_v56  ;;  %v258_v50 = vmul.f32 %v3269_v26, %v235_v20  ;;  %v2717_v62 = vld [vmem:[%s4720_s7 + $0x20] sm:$0xff]  }
 0x159   :  { %957 = vmatpush1.bf16.msra.mxu0 %v2688_v7  ;;  %1070 = vmatpush1.bf16.msra.mxu1 %v2691_v43  ;;  %v257_v46 = vmul.f32 %v3269_v26, %v234_v19  ;;  %v2701_v26 = vld [vmem:[%s4720_s7] sm:$0xff]   ;;  %v2724_v7 = vld [vmem:[%s4720_s7 + $0x70] sm:$0xff]  }
 0x15a   :  { %958 = vmatprep.subr.bf16.mxu0 %v2696_v9  ;;  %1071 = vmatprep.subr.bf16.mxu1 %v2699_v16  ;;  %v281_v47 = vadd.f32 %v3276_v27, %v258_v50  ;;  %v2726_v43 = vld [vmem:[%s4720_s7 + $0xf0] sm:$0xff]   ;;  %v2728_v9 = vld [vmem:[%s4720_s7 + $0x78] sm:$0xff]  }
 0x15b   :  { %v280_v32 = vadd.f32 %v3276_v27, %v257_v46  ;;  %v2702_v27 = vld [vmem:[%s4720_s7 + $0xc0] sm:$0xff]   ;;  %v2730_v16 = vld [vmem:[%s4720_s7 + $0xf8] sm:$0xff]  }
 0x15d   :  { %959 = vmatpush1.bf16.msra.mxu0 %v2694_v22  ;;  %1072 = vmatpush1.bf16.msra.mxu1 %v2697_v23  ;;  %v289_v48 = vpack.c.bf16 %v281_v47, %v280_v32  ;;  %v324_v32 = vlaneseq }
 0x15e   :  { %2408 = vmatprep.subr.bf16.mxu0 %v2700_v31  ;;  %2472 = vmatprep.subr.bf16.mxu1 %v2702_v27 }
 0x15f   :  { %577 = vmatmul.mubr.bf16.gmra.mrb[16].mxu0 %v286_v6  ;;  %690 = vmatmul.mubr.bf16.gmra.mrb[16].mxu1 %v286_v6 }
 0x160   :  { %586 = vmatprep.mubr.bf16.mxu0 %v2940_v56  ;;  %699 = vmatprep.mubr.bf16.mxu1 %v2940_v56 }
 0x167   :  { %587 = vmatmul.mubr.bf16.gmra.mrb[20].mxu0 %v287_v14  ;;  %700 = vmatmul.mubr.bf16.gmra.mrb[20].mxu1 %v287_v14 }
 0x168   :  { %596 = vmatprep.mubr.bf16.mxu0 %v2940_v56  ;;  %709 = vmatprep.mubr.bf16.mxu1 %v2940_v56 }
 0x16f   :  { %597 = vmatmul.mubr.bf16.gmra.mrb[24].mxu0 %v288_v34  ;;  %710 = vmatmul.mubr.bf16.gmra.mrb[24].mxu1 %v288_v34 }
 0x170   :  { %606 = vmatprep.mubr.bf16.mxu0 %v2940_v56  ;;  %719 = vmatprep.mubr.bf16.mxu1 %v2940_v56 }
 0x177   :  { %607 = vmatmul.mubr.bf16.gmra.mrb[28].mxu0 %v289_v48  ;;  %720 = vmatmul.mubr.bf16.gmra.mrb[28].mxu1 %v289_v48 }
 0x178   :  { %976 = vmatprep.mubr.bf16.mxu0 %v2940_v56  ;;  %1089 = vmatprep.mubr.bf16.mxu1 %v2940_v56 }
 0x17f   :  { %977 = vmatmul.mubr.bf16.vlgmr.msra.gmra.mrb[32].mxu0 %v3289_v52  ;;  %1090 = vmatmul.mubr.bf16.vlgmr.msra.gmra.mrb[32].mxu1 %v3289_v52  ;;  %v2703_v52 = vld [vmem:[%s4720_s7 + $0x80] sm:$0xff]  }
 0x180   :  { %986 = vmatprep.mubr.bf16.mxu0 %v2940_v56  ;;  %1099 = vmatprep.mubr.bf16.mxu1 %v2940_v56 }
 0x181   :  { %2409 = vmatpush3.bf16.msra.mxu0 %v2701_v26  ;;  %2473 = vmatpush3.bf16.msra.mxu1 %v2703_v52  ;;  %v325_v26 = vshrl.u32 %v324_v32, 7 }
 0x182   :  { %2474 = vmatprep.subr.bf16.mxu1 %v2706_v49 }
 0x187   :  { %987 = vmatmul.mubr.bf16.gmra.mrb[36].mxu0 %v3319_v10  ;;  %1100 = vmatmul.mubr.bf16.gmra.mrb[36].mxu1 %v3319_v10  ;;  %v2704_v10 = vld [vmem:[%s4720_s7 + $0x48] sm:$0xff]  }
 0x188   :  { %996 = vmatprep.mubr.bf16.mxu0 %v2940_v56  ;;  %1109 = vmatprep.mubr.bf16.mxu1 %v2940_v56 }
 0x189   :  { %2410 = vmatprep.subr.bf16.mxu0 %v2704_v10 }
 0x18f   :  { %997 = vmatmul.mubr.bf16.gmra.mrb[40].mxu0 %v3355_v41  ;;  %1110 = vmatmul.mubr.bf16.gmra.mrb[40].mxu1 %v3355_v41  ;;  %v2705_v41 = vld [vmem:[%s4720_s7 + $0x8] sm:$0xff]  }
 0x190   :  { %1006 = vmatprep.mubr.bf16.mxu0 %v2940_v56  ;;  %1119 = vmatprep.mubr.bf16.mxu1 %v2940_v56 }
 0x191   :  { %2411 = vmatpush3.bf16.msra.mxu0 %v2705_v41 }
 0x192   :  { %2412 = vmatprep.subr.bf16.mxu0 %v2708_v28  ;;  %v326_v28 = vsub.s32 0, %v325_v26 }
 0x195   :  { %2413 = vmatpush3.bf16.msra.mxu0 %v2709_v35  ;;  %v334_v35 = vsub.s32 2, %v325_v26 }
 0x196   :  { %2414 = vmatprep.subr.bf16.mxu0 %v2712_v55  ;;  %v322_v55 = vld [vmem:[%s4717_s4] sm:$0xf] }
 0x197   :  { %1007 = vmatmul.mubr.bf16.gmra.mrb[44].mxu0 %v3391_v3  ;;  %1120 = vmatmul.mubr.bf16.gmra.mrb[44].mxu1 %v3391_v3  ;;  %v2721_v3 = vld [vmem:[%s4720_s7 + $0x28] sm:$0xff]  }
 0x198   :  { %1016 = vmatprep.mubr.bf16.mxu0 %v2940_v56  ;;  %1129 = vmatprep.mubr.bf16.mxu1 %v2940_v56 }
 0x199   :  { %2415 = vmatpush3.bf16.msra.mxu0 %v2713_v57  ;;  %v330_v57 = vsub.s32 1, %v325_v26 }
 0x19a   :  { %2416 = vmatprep.subr.bf16.mxu0 %v2716_v59  ;;  %v3648_v59 = vrot.slane %v322_v55, %v334_v35 }
 0x19d   :  { %2417 = vmatpush3.bf16.msra.mxu0 %v2717_v62  ;;  %v3650_v62 = vrot.slane %v322_v55, %v330_v57 }
 0x19e   :  { %2418 = vmatprep.subr.bf16.mxu0 %v2720_v1 }
 0x19f   :  { %1017 = vmatmul.mubr.bf16.gmra.mrb[48].mxu0 %v286_v6  ;;  %1130 = vmatmul.mubr.bf16.gmra.mrb[48].mxu1 %v286_v6 }
 0x1a0   :  { %1026 = vmatprep.mubr.bf16.mxu0 %v2940_v56  ;;  %1139 = vmatprep.mubr.bf16.mxu1 %v2940_v56 }
 0x1a1   :  { %2419 = vmatpush3.bf16.msra.mxu0 %v2721_v3 }
 0x1a2   :  { %2420 = vmatprep.subr.bf16.mxu0 %v2724_v7 }
 0x1a5   :  { %2421 = vmatpush3.bf16.msra.mxu0 %v2725_v58 }
 0x1a6   :  { %2422 = vmatprep.subr.bf16.mxu0 %v2728_v9 }
 0x1a7   :  { %1027 = vmatmul.mubr.bf16.gmra.mrb[52].mxu0 %v287_v14  ;;  %1140 = vmatmul.mubr.bf16.gmra.mrb[52].mxu1 %v287_v14 }
 0x1a8   :  { %1036 = vmatprep.mubr.bf16.mxu0 %v2940_v56  ;;  %1149 = vmatprep.mubr.bf16.mxu1 %v2940_v56 }
 0x1a9   :  { %2423 = vmatpush3.bf16.msra.mxu0 %v2729_v17 }
 0x1af   :  { %1037 = vmatmul.mubr.bf16.gmra.mrb[56].mxu0 %v288_v34  ;;  %1150 = vmatmul.mubr.bf16.gmra.mrb[56].mxu1 %v288_v34 }
 0x1b0   :  { %1046 = vmatprep.mubr.bf16.mxu0 %v2940_v56  ;;  %1159 = vmatprep.mubr.bf16.mxu1 %v2940_v56  ;;  %v2707_v56 = vld [vmem:[%s4720_s7 + $0x88] sm:$0xff]  }
 0x1b1   :  { %2475 = vmatpush3.bf16.msra.mxu1 %v2707_v56 }
 0x1b2   :  { %2476 = vmatprep.subr.bf16.mxu1 %v2710_v53 }
 0x1b5   :  { %2477 = vmatpush3.bf16.msra.mxu1 %v2711_v54 }
 0x1b6   :  { %2478 = vmatprep.subr.bf16.mxu1 %v2714_v60  ;;  %v338_v60 = vsub.s32 3, %v325_v26 }
 0x1b7   :  { %1047 = vmatmul.mubr.bf16.gmra.mrb[60].mxu0 %v289_v48  ;;  %1160 = vmatmul.mubr.bf16.gmra.mrb[60].mxu1 %v289_v48 }
 0x1b9   :  { %2479 = vmatpush3.bf16.msra.mxu1 %v2715_v61  ;;  %v3646_v61 = vrot.slane %v322_v55, %v326_v28 }
 0x1ba   :  { %2480 = vmatprep.subr.bf16.mxu1 %v2718_v63  ;;  %v3652_v63 = vrot.slane %v322_v55, %v338_v60 }
 0x1bd   :  { %2481 = vmatpush3.bf16.msra.mxu1 %v2719_v0 }
 0x1be   :  { %2482 = vmatprep.subr.bf16.mxu1 %v2722_v2 }
 0x1c1   :  { %2483 = vmatpush3.bf16.msra.mxu1 %v2723_v4 }
 0x1c2   :  { %2484 = vmatprep.subr.bf16.mxu1 %v2726_v43 }
 0x1c5   :  { %2485 = vmatpush3.bf16.msra.mxu1 %v2727_v8 }
 0x1c6   :  { %2486 = vmatprep.subr.bf16.mxu1 %v2730_v16 }
 0x1c9   :  { %2487 = vmatpush3.bf16.msra.mxu1 %v2731_v11 }
 0x212   :  { %v3563_v42 = vpop.f32.mrb[0].mxu0  ;;  %v3565_v18 = vpop.f32.mrb[0].mxu1 }
 0x213   :  { %v3567_v21 = vpop.f32.mrb[1].mxu0  ;;  %v3569_v22 = vpop.f32.mrb[1].mxu1 }
 0x214   :  { %v3571_v23 = vpop.f32.mrb[2].mxu0  ;;  %v3573_v24 = vpop.f32.mrb[2].mxu1 }
 0x215   :  { %v3575_v25 = vpop.f32.mrb[3].mxu0  ;;  %v3577_v12 = vpop.f32.mrb[3].mxu1 }
 0x21a   :  { %v3579_v6 = vpop.f32.mrb[4].mxu0  ;;  %v3581_v13 = vpop.f32.mrb[4].mxu1 }
 0x21b   :  { %v3583_v29 = vpop.f32.mrb[5].mxu0  ;;  %v3585_v30 = vpop.f32.mrb[5].mxu1 }
 0x21c   :  { %v3587_v33 = vpop.f32.mrb[6].mxu0  ;;  %v3589_v5 = vpop.f32.mrb[6].mxu1 }
 0x21d   :  { %v3591_v36 = vpop.f32.mrb[7].mxu0  ;;  %v3593_v37 = vpop.f32.mrb[7].mxu1 }
 0x222   :  { %v3595_v51 = vpop.f32.mrb[8].mxu0  ;;  %v3597_v14 = vpop.f32.mrb[8].mxu1 }
 0x223   :  { %v3599_v15 = vpop.f32.mrb[9].mxu0  ;;  %v3601_v38 = vpop.f32.mrb[9].mxu1 }
 0x224   :  { %v3603_v39 = vpop.f32.mrb[10].mxu0  ;;  %v3605_v40 = vpop.f32.mrb[10].mxu1 }
 0x225   :  { %v3607_v20 = vpop.f32.mrb[11].mxu0  ;;  %v3609_v44 = vpop.f32.mrb[11].mxu1 }
 0x22a   :  { %v3611_v19 = vpop.f32.mrb[12].mxu0  ;;  %v3613_v45 = vpop.f32.mrb[12].mxu1 }
 0x22b   :  { %v3615_v34 = vpop.f32.mrb[13].mxu0  ;;  %v3617_v50 = vpop.f32.mrb[13].mxu1 }
 0x22c   :  { %v3619_v46 = vpop.f32.mrb[14].mxu0  ;;  %v3621_v47 = vpop.f32.mrb[14].mxu1 }
 0x22d   :  { %v3623_v48 = vpop.f32.mrb[15].mxu0  ;;  %v3625_v31 = vpop.f32.mrb[15].mxu1 }
 0x232   :  { %v3627_v27 = vpop.f32.mrb[16].mxu0  ;;  %v3629_v52 = vpop.f32.mrb[16].mxu1 }
 0x233   :  { %v3631_v10 = vpop.f32.mrb[17].mxu0  ;;  %v3633_v41 = vpop.f32.mrb[17].mxu1 }
 0x234   :  { %v3635_v49 = vpop.f32.mrb[18].mxu0  ;;  %v3637_v56 = vpop.f32.mrb[18].mxu1 }
 0x235   :  { %v3639_v53 = vpop.f32.mrb[19].mxu0  ;;  %v3641_v54 = vpop.f32.mrb[19].mxu1 }
 0x23a   :  { %v588_v0 = vpop.f32.mrb[20].mxu0  ;;  %v701_v1 = vpop.f32.mrb[20].mxu1 }
 0x23b   :  { %v3655_v2 = vadd.f32 %v588_v0, %v3646_v61  ;;  %v3658_v3 = vadd.f32 %v701_v1, %v3648_v59  ;;  %v590_v4 = vpop.f32.mrb[21].mxu0  ;;  %v703_v7 = vpop.f32.mrb[21].mxu1 }
 0x23c   :  { %v3661_v43 = vadd.f32 %v590_v4, %v3650_v62  ;;  %v3664_v58 = vadd.f32 %v703_v7, %v3652_v63  ;;  %v592_v8 = vpop.f32.mrb[22].mxu0  ;;  %v705_v9 = vpop.f32.mrb[22].mxu1 }
 0x23d   :  { %4726 = vst [vmem:[#allocation5_spill] sm:$0xff] %v3655_v2  ;;  %4727 = vst [vmem:[#allocation6_spill] sm:$0xff] %v3658_v3  ;;  %v3667_v16 = vadd.f32 %v592_v8, %v3646_v61  ;;  %v3670_v17 = vadd.f32 %v705_v9, %v3648_v59  ;;  %v594_v11 = vpop.f32.mrb[23].mxu0  ;;  %v707_v32 = vpop.f32.mrb[23].mxu1 }
 0x23e   :  { %4728 = vst [vmem:[#allocation7_spill] sm:$0xff] %v3661_v43  ;;  %4729 = vst [vmem:[#allocation8_spill] sm:$0xff] %v3664_v58  ;;  %v3673_v26 = vadd.f32 %v594_v11, %v3650_v62  ;;  %v3676_v55 = vadd.f32 %v707_v32, %v3652_v63 }
 0x23f   :  { %4730 = vst [vmem:[#allocation9_spill] sm:$0xff] %v3667_v16  ;;  %4731 = vst [vmem:[#allocation10_spill] sm:$0xff] %v3670_v17 }
 0x240   :  { %4732 = vst [vmem:[#allocation11_spill] sm:$0xff] %v3673_v26  ;;  %4733 = vst [vmem:[#allocation12_spill] sm:$0xff] %v3676_v55 }
 0x242   :  { %v598_v0 = vpop.f32.mrb[24].mxu0  ;;  %v711_v1 = vpop.f32.mrb[24].mxu1 }
 0x243   :  { %v3679_v4 = vadd.f32 %v598_v0, %v3646_v61  ;;  %v3682_v7 = vadd.f32 %v711_v1, %v3648_v59  ;;  %v600_v8 = vpop.f32.mrb[25].mxu0  ;;  %v713_v3 = vpop.f32.mrb[25].mxu1  ;;  %v762_v1 = vld [vmem:[%s4719_s6] sm:$0xf] }
 0x244   :  { %v3685_v9 = vadd.f32 %v600_v8, %v3650_v62  ;;  %v3688_v17 = vadd.f32 %v713_v3, %v3652_v63  ;;  %v602_v11 = vpop.f32.mrb[26].mxu0  ;;  %v715_v16 = vpop.f32.mrb[26].mxu1 }
 0x245   :  { %4734 = vst [vmem:[#allocation13_spill] sm:$0xff] %v3679_v4  ;;  %4735 = vst [vmem:[#allocation14_spill] sm:$0xff] %v3682_v7  ;;  %v3691_v32 = vadd.f32 %v602_v11, %v3646_v61  ;;  %v3694_v2 = vadd.f32 %v715_v16, %v3648_v59  ;;  %v604_v0 = vpop.f32.mrb[27].mxu0  ;;  %v717_v4 = vpop.f32.mrb[27].mxu1  ;;  %v3705_v7 = vrot.slane %v762_v1, %v326_v28 }
 0x246   :  { %4736 = vst [vmem:[#allocation15_spill] sm:$0xff] %v3685_v9  ;;  %4737 = vst [vmem:[#allocation16_spill] sm:$0xff] %v3688_v17  ;;  %v3700_v8 = vadd.f32 %v604_v0, %v3650_v62  ;;  %v3703_v3 = vadd.f32 %v717_v4, %v3652_v63  ;;  %v3707_v17 = vrot.slane %v762_v1, %v334_v35 }
 0x247   :  { %4738 = vst [vmem:[#allocation17_spill] sm:$0xff] %v3691_v32  ;;  %4739 = vst [vmem:[#allocation18_spill] sm:$0xff] %v3694_v2  ;;  %v3709_v11 = vrot.slane %v762_v1, %v330_v57  ;;  %v3713_v16 = vadd.f32 %v3563_v42, %v3646_v61  ;;  %v3717_v2 = vadd.f32 %v3565_v18, %v3648_v59 }
 0x248   :  { %4740 = vst [vmem:[#allocation19_spill] sm:$0xff] %v3700_v8  ;;  %4741 = vst [vmem:[#allocation20_spill] sm:$0xff] %v3703_v3  ;;  %v3721_v0 = vadd.f32 %v3567_v21, %v3650_v62  ;;  %v3723_v4 = vrot.slane %v762_v1, %v338_v60  ;;  %v3727_v28 = vadd.f32 %v3569_v22, %v3652_v63 }
 0x249   :  { %v3731_v35 = vadd.f32 %v3571_v23, %v3646_v61  ;;  %v3735_v42 = vadd.f32 %v3573_v24, %v3648_v59  ;;  %v3739_v18 = vadd.f32 %v3575_v25, %v3650_v62  ;;  %v3743_v60 = vadd.f32 %v3577_v12, %v3652_v63 }
 0x24a   :  { %v608_v21 = vpop.f32.mrb[28].mxu0  ;;  %v721_v57 = vpop.f32.mrb[28].mxu1  ;;  %v3747_v22 = vadd.f32 %v3579_v6, %v3646_v61  ;;  %v3757_v25 = vadd.f32 %v3581_v13, %v3648_v59  ;;  %v3761_v12 = vadd.f32 %v3583_v29, %v3650_v62  ;;  %v3775_v13 = vadd.f32 %v3587_v33, %v3646_v61 }
 0x24b   :  { %v3750_v23 = vadd.f32 %v608_v21, %v3646_v61  ;;  %v3753_v24 = vadd.f32 %v721_v57, %v3648_v59  ;;  %v610_v1 = vpop.f32.mrb[29].mxu0  ;;  %v723_v32 = vpop.f32.mrb[29].mxu1  ;;  %v3771_v57 = vadd.f32 %v3585_v30, %v3652_v63  ;;  %v3789_v30 = vadd.f32 %v3591_v36, %v3650_v62 }
 0x24c   :  { %4744 = vst [vmem:[#allocation23_spill] sm:$0xff] %v3757_v25  ;;  %v3764_v3 = vadd.f32 %v610_v1, %v3650_v62  ;;  %v3767_v6 = vadd.f32 %v723_v32, %v3652_v63  ;;  %v612_v21 = vpop.f32.mrb[30].mxu0  ;;  %4747 = vst [vmem:[#allocation26_spill] sm:$0xff] %v3775_v13  ;;  %v3785_v32 = vadd.f32 %v3589_v5, %v3648_v59 }
 0x24d   :  { %4742 = vst [vmem:[#allocation21_spill] sm:$0xff] %v3750_v23  ;;  %4743 = vst [vmem:[#allocation22_spill] sm:$0xff] %v3753_v24  ;;  %v725_v23 = vpop.f32.mrb[30].mxu1  ;;  %v3778_v24 = vadd.f32 %v612_v21, %v3646_v61  ;;  %v614_v1 = vpop.f32.mrb[31].mxu0  ;;  %v3803_v21 = vadd.f32 %v3595_v51, %v3646_v61  ;;  %v3807_v5 = vadd.f32 %v3597_v14, %v3648_v59 }
 0x24e   :  { %4745 = vst [vmem:[#allocation24_spill] sm:$0xff] %v3764_v3  ;;  %4746 = vst [vmem:[#allocation25_spill] sm:$0xff] %v3767_v6  ;;  %v3781_v29 = vadd.f32 %v725_v23, %v3648_v59  ;;  %v727_v3 = vpop.f32.mrb[31].mxu1  ;;  %v3792_v6 = vadd.f32 %v614_v1, %v3650_v62  ;;  %v3799_v23 = vadd.f32 %v3593_v37, %v3652_v63 }
 0x24f   :  { %4748 = vst [vmem:[#allocation27_spill] sm:$0xff] %v3778_v24  ;;  %4750 = vst [vmem:[#allocation29_spill] sm:$0xff] %v3785_v32  ;;  %v3795_v33 = vadd.f32 %v727_v3, %v3652_v63  ;;  %v3811_v36 = vadd.f32 %v3599_v15, %v3650_v62  ;;  %v3815_v3 = vadd.f32 %v3601_v38, %v3652_v63 }
 0x250   :  { %4749 = vst [vmem:[#allocation28_spill] sm:$0xff] %v3781_v29  ;;  %4751 = vst [vmem:[#allocation30_spill] sm:$0xff] %v3792_v6  ;;  %v3819_v37 = vadd.f32 %v3603_v39, %v3646_v61  ;;  %v3823_v51 = vadd.f32 %v3605_v40, %v3648_v59  ;;  %v3827_v14 = vadd.f32 %v3607_v20, %v3650_v62 }
 0x251   :  { %4752 = vst [vmem:[#allocation31_spill] sm:$0xff] %v3795_v33  ;;  %4753 = vst [vmem:[#allocation32_spill] sm:$0xff] %v3803_v21  ;;  %v3831_v15 = vadd.f32 %v3609_v44, %v3652_v63  ;;  %v3835_v38 = vadd.f32 %v3611_v19, %v3646_v61  ;;  %v3839_v39 = vadd.f32 %v3613_v45, %v3648_v59 }
 0x252   :  { %4754 = vst [vmem:[#allocation33_spill] sm:$0xff] %v3807_v5  ;;  %4755 = vst [vmem:[#allocation34_spill] sm:$0xff] %v3811_v36  ;;  %v3843_v40 = vadd.f32 %v3615_v34, %v3650_v62  ;;  %v3847_v20 = vadd.f32 %v3617_v50, %v3652_v63  ;;  %v3851_v44 = vadd.f32 %v3619_v46, %v3646_v61  ;;  %v978_v1 = vpop.f32.mrb[32].mxu0  ;;  %v1091_v33 = vpop.f32.mrb[32].mxu1 }
 0x253   :  { %4756 = vst [vmem:[#allocation35_spill] sm:$0xff] %v3815_v3  ;;  %4757 = vst [vmem:[#allocation36_spill] sm:$0xff] %v3819_v37  ;;  %v3855_v19 = vadd.f32 %v3621_v47, %v3648_v59  ;;  %v3859_v45 = vadd.f32 %v3623_v48, %v3650_v62  ;;  %v3863_v34 = vadd.f32 %v3625_v31, %v3652_v63  ;;  %v980_v47 = vpop.f32.mrb[33].mxu0  ;;  %v1093_v29 = vpop.f32.mrb[33].mxu1 }
 0x254   :  { %4758 = vst [vmem:[#allocation37_spill] sm:$0xff] %v3823_v51  ;;  %4759 = vst [vmem:[#allocation38_spill] sm:$0xff] %v3827_v14  ;;  %v3867_v50 = vadd.f32 %v3627_v27, %v3646_v61  ;;  %v979_v46 = vadd.f32 %v978_v1, %v3705_v7  ;;  %v1092_v6 = vadd.f32 %v1091_v33, %v3707_v17  ;;  %v982_v27 = vpop.f32.mrb[34].mxu0  ;;  %v1095_v9 = vpop.f32.mrb[34].mxu1 }
 0x255   :  { %4760 = vst [vmem:[#allocation39_spill] sm:$0xff] %v3831_v15  ;;  %4761 = vst [vmem:[#allocation40_spill] sm:$0xff] %v3835_v38  ;;  %v3873_v48 = vadd.f32 %v3629_v52, %v3648_v59  ;;  %v3877_v24 = vadd.f32 %v3631_v10, %v3650_v62  ;;  %v981_v31 = vadd.f32 %v980_v47, %v3709_v11  ;;  %v984_v26 = vpop.f32.mrb[35].mxu0  ;;  %v1097_v43 = vpop.f32.mrb[35].mxu1 }
 0x256   :  { %4762 = vst [vmem:[#allocation41_spill] sm:$0xff] %v3839_v39  ;;  %4763 = vst [vmem:[#allocation42_spill] sm:$0xff] %v3843_v40  ;;  %v1094_v8 = vadd.f32 %v1093_v29, %v3723_v4  ;;  %v3883_v1 = vadd.f32 %v3633_v41, %v3652_v63  ;;  %v3887_v33 = vadd.f32 %v3635_v49, %v3646_v61  ;;  %v1234_v52 = vmul.f32 0.70710677, %v979_v46 }
 0x257   :  { %4764 = vst [vmem:[#allocation43_spill] sm:$0xff] %v3847_v20  ;;  %4765 = vst [vmem:[#allocation44_spill] sm:$0xff] %v3851_v44  ;;  %v1236_v55 = vmul.f32 0.70710677, %v1092_v6  ;;  %v3891_v10 = vadd.f32 %v3637_v56, %v3648_v59  ;;  %v3895_v47 = vadd.f32 %v3639_v53, %v3650_v62  ;;  %v1235_v29 = vmul.f32 0.70710677, %v981_v31 }
 0x258   :  { %4766 = vst [vmem:[#allocation45_spill] sm:$0xff] %v3855_v19  ;;  %4767 = vst [vmem:[#allocation46_spill] sm:$0xff] %v3859_v45  ;;  %v1237_v58 = vmul.f32 0.70710677, %v1094_v8  ;;  %v3899_v41 = vadd.f32 %v3641_v54, %v3652_v63  ;;  %2772 = verf.f32 %v1234_v52  ;;  %v983_v49 = vadd.f32 %v982_v27, %v3705_v7 }
 0x259   :  { %4768 = vst [vmem:[#allocation47_spill] sm:$0xff] %v3863_v34  ;;  %4769 = vst [vmem:[#allocation48_spill] sm:$0xff] %v3867_v50  ;;  %v1096_v61 = vadd.f32 %v1095_v9, %v3707_v17  ;;  %2774 = verf.f32 %v1236_v55  ;;  %v985_v56 = vadd.f32 %v984_v26, %v3709_v11  ;;  %v1098_v53 = vadd.f32 %v1097_v43, %v3723_v4 }
 0x25a   :  { %4770 = vst [vmem:[#allocation49_spill] sm:$0xff] %v3873_v48  ;;  %4771 = vst [vmem:[#allocation50_spill] sm:$0xff] %v3877_v24  ;;  %v3903_v48 = vmul.f32 0.5, %v979_v46  ;;  %v3907_v59 = vmul.f32 0.5, %v1092_v6  ;;  %v3909_v62 = vmul.f32 0.5, %v981_v31  ;;  %2776 = verf.f32 %v1235_v29  ;;  %v988_v52 = vpop.f32.mrb[36].mxu0 }
 0x25b   :  { %4772 = vst [vmem:[#allocation51_spill] sm:$0xff] %v3883_v1  ;;  %4773 = vst [vmem:[#allocation52_spill] sm:$0xff] %v3887_v33  ;;  %v1238_v54 = vmul.f32 0.70710677, %v983_v49  ;;  %v3911_v63 = vmul.f32 0.5, %v1094_v8  ;;  %2778 = verf.f32 %v1237_v58  ;;  %v989_v26 = vadd.f32 %v988_v52, %v3705_v7  ;;  %v1101_v46 = vpop.f32.mrb[36].mxu1 }
 0x25c   :  { %4774 = vst [vmem:[#allocation53_spill] sm:$0xff] %v3891_v10  ;;  %4775 = vst [vmem:[#allocation54_spill] sm:$0xff] %v3895_v47  ;;  %v1240_v27 = vmul.f32 0.70710677, %v1096_v61  ;;  %v1239_v9 = vmul.f32 0.70710677, %v985_v56  ;;  %v1102_v58 = vadd.f32 %v1101_v46, %v3707_v17 }
 0x25d   :  { %4776 = vst [vmem:[#allocation55_spill] sm:$0xff] %v3899_v41  ;;  %v3913_v10 = vmul.f32 0.5, %v983_v49  ;;  %2780 = verf.f32 %v1238_v54  ;;  %v1241_v55 = vmul.f32 0.70710677, %v1098_v53  ;;  %v990_v43 = vpop.f32.mrb[37].mxu0  ;;  %v3919_v6 = vld [vmem:[%s4722_s9] sm:$0xff]  }
 0x25e   :  { %v3921_v31 = vmul.f32 0.5, %v1096_v61  ;;  %2782 = verf.f32 %v1240_v27  ;;  %v991_v8 = vadd.f32 %v990_v43, %v3709_v11  ;;  %v1103_v29 = vpop.f32.mrb[37].mxu1  ;;  %v992_v49 = vpop.f32.mrb[38].mxu0  ;;  %v3925_v54 = vmul.f32 0.5, %v985_v56  ;;  %2552 = vmatprep.subr.bf16.mxu0 %v3919_v6  ;;  %2584 = vmatprep.subr.bf16.mxu1 %v3919_v6 }
 0x25f   :  { %2784 = verf.f32 %v1239_v9  ;;  %v1242_v52 = vmul.f32 0.70710677, %v989_v26  ;;  %v1104_v33 = vadd.f32 %v1103_v29, %v3723_v4  ;;  %v1105_v50 = vpop.f32.mrb[38].mxu1  ;;  %v994_v41 = vpop.f32.mrb[39].mxu0  ;;  %v3930_v61 = vmul.f32 0.5, %v1098_v53 }
 0x260   :  { %2786 = verf.f32 %v1241_v55  ;;  %v3932_v27 = vmul.f32 0.5, %v989_v26  ;;  %v1244_v46 = vmul.f32 0.70710677, %v1102_v58  ;;  %v1107_v43 = vpop.f32.mrb[39].mxu1  ;;  %v3934_v56 = vmul.f32 0.5, %v1102_v58 }
 0x261   :  { %2788 = verf.f32 %v1242_v52  ;;  %v1243_v9 = vmul.f32 0.70710677, %v991_v8  ;;  %v1245_v1 = vmul.f32 0.70710677, %v1104_v33  ;;  %v993_v29 = vadd.f32 %v992_v49, %v3705_v7 }
 0x262   :  { %2790 = verf.f32 %v1244_v46  ;;  %v1106_v47 = vadd.f32 %v1105_v50, %v3707_v17  ;;  %v995_v24 = vadd.f32 %v994_v41, %v3709_v11  ;;  %v2773_v19 = vpop.eup %2772  ;;  %v3939_v53 = vmul.f32 0.5, %v991_v8  ;;  %v998_v44 = vpop.f32.mrb[40].mxu0 }
 0x263   :  { %2792 = verf.f32 %v1243_v9  ;;  %v3941_v55 = vmul.f32 0.5, %v1104_v33  ;;  %v1108_v26 = vadd.f32 %v1107_v43, %v3723_v4  ;;  %v2775_v52 = vpop.eup %2774  ;;  %v1362_v58 = vadd.f32 1.0, %v2773_v19  ;;  %v1111_v49 = vpop.f32.mrb[40].mxu1 }
 0x264   :  { %2794 = verf.f32 %v1245_v1  ;;  %v3944_v39 = vmul.f32 0.5, %v993_v29  ;;  %v1246_v46 = vmul.f32 0.70710677, %v993_v29  ;;  %v2777_v38 = vpop.eup %2776  ;;  %v1364_v50 = vadd.f32 1.0, %v2775_v52  ;;  %v1000_v9 = vpop.f32.mrb[41].mxu0 }
 0x265   :  { %v3946_v34 = vmul.f32 0.5, %v1106_v47  ;;  %v1248_v41 = vmul.f32 0.70710677, %v1106_v47  ;;  %v3948_v8 = vmul.f32 0.5, %v995_v24  ;;  %v2779_v33 = vpop.eup %2778  ;;  %v1426_v20 = vmul.f32 %v1362_v58, %v3903_v48  ;;  %v3951_v1 = vpop.f32.mrb[41].mxu1 }
 0x266   :  { %v1363_v43 = vadd.f32 1.0, %v2777_v38  ;;  %2796 = verf.f32 %v1246_v46  ;;  %v1247_v19 = vmul.f32 0.70710677, %v995_v24  ;;  %v3953_v45 = vpop.f32.mrb[42].mxu0  ;;  %v1428_v40 = vmul.f32 %v1364_v50, %v3907_v59  ;;  %v3958_v47 = vpop.f32.mrb[42].mxu1 }
 0x267   :  { %v2781_v29 = vpop.eup %2780  ;;  %v1365_v52 = vadd.f32 1.0, %v2779_v33  ;;  %2798 = verf.f32 %v1248_v41  ;;  %v3956_v51 = vmul.f32 0.5, %v1108_v26  ;;  %v3960_v5 = vpop.f32.mrb[43].mxu0  ;;  %v3963_v38 = vmul.f32 %v1426_v20, %v3713_v16 }
 0x268   :  { %v2783_v37 = vpop.eup %2782  ;;  %v3966_v24 = vmul.f32 %v1363_v43, %v3909_v62  ;;  %v1366_v48 = vadd.f32 1.0, %v2781_v29  ;;  %2800 = verf.f32 %v1247_v19  ;;  %v3968_v58 = vpop.f32.mrb[43].mxu1  ;;  %v3971_v46 = vmul.f32 %v1428_v40, %v3717_v2 }
 0x269   :  { %v2785_v59 = vpop.eup %2784  ;;  %v3974_v50 = vmul.f32 %v1365_v52, %v3911_v63  ;;  %v1368_v41 = vadd.f32 1.0, %v2783_v37  ;;  %v1249_v33 = vmul.f32 0.70710677, %v1108_v26  ;;  %v999_v62 = vadd.f32 %v998_v44, %v3705_v7 }
 0x26a   :  { %v2787_v21 = vpop.eup %2786  ;;  %v1430_v16 = vmul.f32 %v1366_v48, %v3913_v10  ;;  %v1367_v20 = vadd.f32 1.0, %v2785_v59  ;;  %v1112_v43 = vadd.f32 %v1111_v49, %v3707_v17  ;;  %v1001_v2 = vadd.f32 %v1000_v9, %v3709_v11  ;;  %v1008_v44 = vpop.f32.mrb[44].mxu0 }
 0x26b   :  { %v2789_v19 = vpop.eup %2788  ;;  %v1432_v29 = vmul.f32 %v1368_v41, %v3921_v31  ;;  %v1369_v15 = vadd.f32 1.0, %v2787_v21  ;;  %2802 = verf.f32 %v1249_v33  ;;  %v3987_v26 = vmul.f32 0.5, %v999_v62  ;;  %v1121_v52 = vpop.f32.mrb[44].mxu1 }
 0x26c   :  { %v2791_v40 = vpop.eup %2790  ;;  %v3982_v63 = vmul.f32 %v1430_v16, %v3731_v35  ;;  %v3985_v37 = vmul.f32 %v1367_v20, %v3925_v54  ;;  %v1370_v10 = vadd.f32 1.0, %v2789_v19  ;;  %v1250_v9 = vmul.f32 0.70710677, %v999_v62  ;;  %v1010_v59 = vpop.f32.mrb[45].mxu0 }
 0x26d   :  { %v2793_v49 = vpop.eup %2792  ;;  %v3990_v48 = vmul.f32 %v1432_v29, %v3735_v42  ;;  %v3993_v21 = vmul.f32 %v1369_v15, %v3930_v61  ;;  %v1372_v31 = vadd.f32 1.0, %v2791_v40  ;;  %v3995_v35 = vpop.f32.mrb[45].mxu1  ;;  %v4002_v20 = vmul.f32 0.5, %v1112_v43 }
 0x26e   :  { %v2795_v41 = vpop.eup %2794  ;;  %v4000_v33 = vmul.f32 %v1370_v10, %v3932_v27  ;;  %v1371_v16 = vadd.f32 1.0, %v2793_v49  ;;  %v4004_v42 = vpop.f32.mrb[46].mxu0  ;;  %2804 = verf.f32 %v1250_v9  ;;  %v1252_v49 = vmul.f32 0.70710677, %v1112_v43 }
 0x26f   :  { %v4006_v19 = vpop.f32.mrb[46].mxu1  ;;  %v4011_v61 = vmul.f32 %v1372_v31, %v3934_v56  ;;  %v1373_v62 = vadd.f32 1.0, %v2795_v41  ;;  %v4013_v29 = vpop.f32.mrb[47].mxu0  ;;  %v4020_v54 = vmul.f32 0.5, %v1001_v2  ;;  %v1251_v3 = vmul.f32 0.70710677, %v1001_v2 }
 0x270   :  { %4777 = vst [vmem:[#allocation56_spill] sm:$0xff] %v4000_v33  ;;  %v4015_v40 = vpop.f32.mrb[47].mxu1  ;;  %v2797_v27 = vpop.eup %2796  ;;  %v4018_v10 = vmul.f32 %v1371_v16, %v3939_v53  ;;  %v1114_v31 = vadd.f32 %v3951_v1, %v3723_v4  ;;  %v1003_v9 = vadd.f32 %v3953_v45, %v3705_v7  ;;  %2806 = verf.f32 %v1252_v49 }
 0x271   :  { %4778 = vst [vmem:[#allocation57_spill] sm:$0xff] %v4011_v61  ;;  %v2799_v14 = vpop.eup %2798  ;;  %v4023_v15 = vmul.f32 %v1373_v62, %v3941_v55  ;;  %v1374_v56 = vadd.f32 1.0, %v2797_v27  ;;  %v1116_v53 = vadd.f32 %v3958_v47, %v3707_v17  ;;  %v1005_v43 = vadd.f32 %v3960_v5, %v3709_v11 }
 0x272   :  { %v2801_v41 = vpop.eup %2800  ;;  %v1376_v36 = vadd.f32 1.0, %v2799_v14  ;;  %2808 = verf.f32 %v1251_v3  ;;  %v4036_v16 = vmul.f32 0.5, %v1114_v31  ;;  %v1253_v45 = vmul.f32 0.70710677, %v1114_v31  ;;  %v4043_v27 = vpop.f32.mrb[48].mxu0 }
 0x273   :  { %v4034_v2 = vmul.f32 %v1374_v56, %v3944_v39  ;;  %v1375_v55 = vadd.f32 1.0, %v2801_v41  ;;  %v4041_v62 = vmul.f32 0.5, %v1003_v9  ;;  %v1254_v14 = vmul.f32 0.70710677, %v1003_v9  ;;  %v4052_v3 = vpop.f32.mrb[48].mxu1  ;;  %v4054_v41 = vpop.f32.mrb[49].mxu0 }
 0x274   :  { %v4039_v1 = vmul.f32 %v1376_v36, %v3946_v34  ;;  %v4048_v5 = vmul.f32 0.5, %v1116_v53  ;;  %v1256_v39 = vmul.f32 0.70710677, %v1116_v53  ;;  %v4050_v56 = vmul.f32 0.5, %v1005_v43  ;;  %v4058_v9 = vpop.f32.mrb[49].mxu1 }
 0x275   :  { %4779 = vst [vmem:[#allocation58_spill] sm:$0xff] %v4034_v2  ;;  %v2803_v47 = vpop.eup %2802  ;;  %v4046_v49 = vmul.f32 %v1375_v55, %v3948_v8  ;;  %2810 = verf.f32 %v1253_v45  ;;  %v1255_v34 = vmul.f32 0.70710677, %v1005_v43  ;;  %v1118_v31 = vadd.f32 %v3968_v58, %v3723_v4  ;;  %v4065_v32 = vpop.f32.mrb[50].mxu1 }
 0x276   :  { %4780 = vst [vmem:[#allocation59_spill] sm:$0xff] %v4039_v1  ;;  %v1377_v36 = vadd.f32 1.0, %v2803_v47  ;;  %v4060_v1 = vpop.f32.mrb[50].mxu0  ;;  %2812 = verf.f32 %v1254_v14  ;;  %v1009_v8 = vadd.f32 %v1008_v44, %v3705_v7  ;;  %v1122_v53 = vadd.f32 %v1121_v52, %v3707_v17  ;;  %v4074_v47 = vpop.f32.mrb[51].mxu1 }
 0x277   :  { %v1011_v55 = vadd.f32 %v1010_v59, %v3709_v11  ;;  %v4067_v61 = vpop.f32.mrb[51].mxu0  ;;  %2814 = verf.f32 %v1256_v39  ;;  %v4072_v58 = vmul.f32 0.5, %v1118_v31  ;;  %v1257_v45 = vmul.f32 0.70710677, %v1118_v31 }
 0x278   :  { %v4070_v43 = vmul.f32 %v1377_v36, %v3956_v51  ;;  %v2805_v14 = vpop.eup %2804  ;;  %2816 = verf.f32 %v1255_v34  ;;  %v4076_v44 = vmul.f32 0.5, %v1009_v8  ;;  %v1258_v52 = vmul.f32 0.70710677, %v1009_v8 }
 0x279   :  { %v4078_v25 = vmul.f32 0.5, %v1122_v53  ;;  %v1378_v59 = vadd.f32 1.0, %v2805_v14  ;;  %2818 = verf.f32 %v1257_v45  ;;  %v1260_v2 = vmul.f32 0.70710677, %v1122_v53 }
 0x27a   :  { %v4080_v13 = vmul.f32 0.5, %v1011_v55  ;;  %2820 = verf.f32 %v1258_v52  ;;  %v1259_v51 = vmul.f32 0.70710677, %v1011_v55  ;;  %v1124_v39 = vadd.f32 %v3995_v35, %v3723_v4  ;;  %v2807_v31 = vpop.eup %2806  ;;  %v4093_v45 = vpop.f32.mrb[52].mxu0 }
 0x27b   :  { %v1013_v36 = vadd.f32 %v4004_v42, %v3705_v7  ;;  %v4087_v34 = vmul.f32 %v1378_v59, %v3987_v26  ;;  %2822 = verf.f32 %v1260_v2  ;;  %v1126_v8 = vadd.f32 %v4006_v19, %v3707_v17  ;;  %4782 = vst [vmem:[#allocation61_spill] sm:$0xff] %v4093_v45  ;;  %v4095_v55 = vpop.f32.mrb[52].mxu1  ;;  %v4099_v33 = vpop.f32.mrb[53].mxu0 }
 0x27c   :  { %v1015_v53 = vadd.f32 %v4013_v29, %v3709_v11  ;;  %4783 = vst [vmem:[#allocation62_spill] sm:$0xff] %v4095_v55  ;;  %v2809_v14 = vpop.eup %2808  ;;  %v1380_v35 = vadd.f32 1.0, %v2807_v31  ;;  %2824 = verf.f32 %v1259_v51  ;;  %v4097_v52 = vmul.f32 0.5, %v1124_v39  ;;  %4784 = vst [vmem:[#allocation63_spill] sm:$0xff] %v4099_v33  ;;  %v4101_v26 = vpop.f32.mrb[53].mxu1 }
 0x27d   :  { %4781 = vst [vmem:[#allocation60_spill] sm:$0xff] %v4087_v34  ;;  %v1261_v42 = vmul.f32 0.70710677, %v1124_v39  ;;  %4785 = vst [vmem:[#allocation64_spill] sm:$0xff] %v4101_v26  ;;  %v1379_v2 = vadd.f32 1.0, %v2809_v14  ;;  %v4103_v59 = vmul.f32 0.5, %v1013_v36 }
 0x27e   :  { %v1262_v19 = vmul.f32 0.70710677, %v1013_v36  ;;  %v4105_v34 = vmul.f32 0.5, %v1126_v8  ;;  %v4107_v29 = vpop.f32.mrb[54].mxu0  ;;  %v4110_v55 = vmul.f32 %v1380_v35, %v4002_v20  ;;  %v1264_v51 = vmul.f32 0.70710677, %v1126_v8 }
 0x27f   :  { %4786 = vst [vmem:[#allocation65_spill] sm:$0xff] %v4107_v29  ;;  %2826 = verf.f32 %v1261_v42  ;;  %v4112_v31 = vmul.f32 0.5, %v1015_v53  ;;  %v4114_v39 = vpop.f32.mrb[54].mxu1  ;;  %v4116_v33 = vpop.f32.mrb[55].mxu0  ;;  %v4119_v14 = vmul.f32 %v1379_v2, %v4020_v54  ;;  %v1263_v36 = vmul.f32 0.70710677, %v1015_v53 }
 0x280   :  { %4787 = vst [vmem:[#allocation66_spill] sm:$0xff] %v4110_v55  ;;  %4788 = vst [vmem:[#allocation67_spill] sm:$0xff] %v4116_v33  ;;  %v2811_v26 = vpop.eup %2810  ;;  %2828 = verf.f32 %v1262_v19  ;;  %v1128_v29 = vadd.f32 %v4015_v40, %v3723_v4  ;;  %v4123_v45 = vpop.f32.mrb[55].mxu1  ;;  %v1491_v8 = vmul.f32 %v3966_v24, %v3721_v0  ;;  %v1495_v42 = vmul.f32 %v3985_v37, %v3739_v18 }
 0x281   :  { %4789 = vst [vmem:[#allocation68_spill] sm:$0xff] %v4119_v14  ;;  %v2813_v20 = vpop.eup %2812  ;;  %v1381_v35 = vadd.f32 1.0, %v2811_v26  ;;  %2830 = verf.f32 %v1264_v51  ;;  %v1493_v26 = vmul.f32 %v3974_v50, %v3727_v28  ;;  %v1497_v24 = vmul.f32 %v3993_v21, %v3743_v60 }
 0x282   :  { %v2815_v55 = vpop.eup %2814  ;;  %v1382_v33 = vadd.f32 1.0, %v2813_v20  ;;  %2832 = verf.f32 %v1263_v36  ;;  %v4129_v54 = vmul.f32 0.5, %v1128_v29  ;;  %v1265_v53 = vmul.f32 0.70710677, %v1128_v29  ;;  %v4141_v37 = vpop.f32.mrb[56].mxu0 }
 0x283   :  { %v2817_v2 = vpop.eup %2816  ;;  %v4132_v40 = vmul.f32 %v1381_v35, %v4036_v16  ;;  %v1384_v19 = vadd.f32 1.0, %v2815_v55  ;;  %v1555_v14 = vpack.c.bf16 %v1495_v42, %v1491_v8  ;;  %v4143_v29 = vpop.f32.mrb[56].mxu1  ;;  %v4148_v16 = vld [vmem:[%s4722_s9 + $0x8] sm:$0xff]   ;;  %v1132_v60 = vadd.f32 %v4052_v3, %v3707_v17 }
 0x284   :  { %v2819_v51 = vpop.eup %2818  ;;  %v4137_v0 = vmul.f32 %v1382_v33, %v4041_v62  ;;  %v1383_v18 = vadd.f32 1.0, %v2817_v2  ;;  %2834 = verf.f32 %v1265_v53  ;;  %v1019_v33 = vadd.f32 %v4043_v27, %v3705_v7  ;;  %v4157_v21 = vpop.f32.mrb[57].mxu0 }
 0x285   :  { %v2821_v55 = vpop.eup %2820  ;;  %v4151_v28 = vmul.f32 %v1384_v19, %v4048_v5  ;;  %v1385_v50 = vadd.f32 1.0, %v2819_v51  ;;  %1881 = vmatprep.mubr.bf16.mxu0 %v1555_v14  ;;  %v4159_v62 = vpop.f32.mrb[57].mxu1  ;;  %v1557_v8 = vpack.c.bf16 %v1497_v24, %v1493_v26  ;;  %v4790_v5 = vpack.c.bf16 %v3982_v63, %v3963_v38 }
 0x286   :  { %v2823_v36 = vpop.eup %2822  ;;  %v4162_v20 = vmul.f32 %v1383_v18, %v4050_v56  ;;  %v1386_v35 = vadd.f32 1.0, %v2821_v55  ;;  %v1021_v27 = vadd.f32 %v4054_v41, %v3709_v11  ;;  %v4169_v14 = vpop.f32.mrb[58].mxu0  ;;  %v4176_v56 = vmul.f32 0.5, %v1019_v33 }
 0x287   :  { %1882 = vmatmul.mubr.bf16.vlgmr.msra.gmra.mrb[64].mxu0 %v4790_v5  ;;  %v4171_v3 = vpop.f32.mrb[58].mxu1  ;;  %v2825_v42 = vpop.eup %2824  ;;  %v4174_v53 = vmul.f32 %v1385_v50, %v4072_v58  ;;  %v1388_v2 = vadd.f32 1.0, %v2823_v36  ;;  %v1266_v19 = vmul.f32 0.70710677, %v1019_v33  ;;  %1978 = vmatprep.mubr.bf16.mxu1 %v1557_v8  ;;  %v4186_v41 = vmul.f32 0.5, %v1132_v60  ;;  %v2734_v58 = vld [vmem:[%s4722_s9 + $0x10] sm:$0xff]  }
 0x288   :  { %v4178_v26 = vpop.f32.mrb[59].mxu0  ;;  %v4180_v51 = vpop.f32.mrb[59].mxu1  ;;  %2553 = vmatpush3.bf16.msra.mxu0 %v3919_v6  ;;  %v4184_v38 = vmul.f32 %v1386_v35, %v4076_v44  ;;  %v1387_v63 = vadd.f32 1.0, %v2825_v42  ;;  %v1268_v18 = vmul.f32 0.70710677, %v1132_v60  ;;  %v4791_v50 = vpack.c.bf16 %v3990_v48, %v3971_v46 }
 0x289   :  { %2554 = vmatprep.subr.bf16.mxu0 %v4148_v16  ;;  %v2827_v24 = vpop.eup %2826  ;;  %v4193_v55 = vmul.f32 %v1388_v2, %v4078_v25  ;;  %2836 = verf.f32 %v1266_v19  ;;  %v4198_v44 = vmul.f32 0.5, %v1021_v27  ;;  %v1267_v33 = vmul.f32 0.70710677, %v1021_v27 }
 0x28a   :  { %1979 = vmatmul.mubr.bf16.vlgmr.msra.gmra.mrb[64].mxu1 %v4791_v50  ;;  %v2829_v36 = vpop.eup %2828  ;;  %v4201_v60 = vmul.f32 %v1387_v63, %v4080_v13  ;;  %v1389_v35 = vadd.f32 1.0, %v2827_v24  ;;  %2838 = verf.f32 %v1268_v18  ;;  %v1134_v8 = vadd.f32 %v4058_v9, %v3723_v4  ;;  %v4217_v2 = vpop.f32.mrb[60].mxu0 }
 0x28b   :  { %2592 = vmatpush3.bf16.msra.mxu1 %v3919_v6  ;;  %v2831_v25 = vpop.eup %2830  ;;  %v1390_v5 = vadd.f32 1.0, %v2829_v36  ;;  %2840 = verf.f32 %v1267_v33  ;;  %v1023_v46 = vadd.f32 %v4060_v1, %v3705_v7  ;;  %v1136_v48 = vadd.f32 %v4065_v32, %v3707_v17  ;;  %v4219_v19 = vpop.f32.mrb[60].mxu1 }
 0x28c   :  { %2555 = vmatpush3.bf16.msra.mxu0 %v4148_v16  ;;  %2585 = vmatprep.subr.bf16.mxu1 %v4148_v16  ;;  %v2833_v13 = vpop.eup %2832  ;;  %v4213_v27 = vmul.f32 %v1389_v35, %v4097_v52  ;;  %v1392_v9 = vadd.f32 1.0, %v2831_v25  ;;  %v4215_v42 = vmul.f32 0.5, %v1134_v8  ;;  %v1269_v6 = vmul.f32 0.70710677, %v1134_v8  ;;  %v4226_v24 = vpop.f32.mrb[61].mxu0 }
 0x28d   :  { %2556 = vmatprep.subr.bf16.mxu0 %v2734_v58  ;;  %v4222_v1 = vmul.f32 %v1390_v5, %v4103_v59  ;;  %v1391_v32 = vadd.f32 1.0, %v2833_v13  ;;  %v4224_v63 = vmul.f32 0.5, %v1023_v46  ;;  %v1270_v18 = vmul.f32 0.70710677, %v1023_v46  ;;  %v4228_v52 = vpop.f32.mrb[61].mxu1  ;;  %v4235_v8 = vpop.f32.mrb[62].mxu0 }
 0x28e   :  { %v2835_v50 = vpop.eup %2834  ;;  %v4231_v33 = vmul.f32 %v1392_v9, %v4105_v34  ;;  %2842 = verf.f32 %v1269_v6  ;;  %v4233_v36 = vmul.f32 0.5, %v1136_v48  ;;  %v1272_v35 = vmul.f32 0.70710677, %v1136_v48  ;;  %v4237_v59 = vpop.f32.mrb[62].mxu1 }
 0x28f   :  { %4792 = vst [vmem:[#allocation69_spill] sm:$0xff] %v4237_v59  ;;  %2593 = vmatpush3.bf16.msra.mxu1 %v4148_v16  ;;  %v4241_v25 = vmul.f32 %v1391_v32, %v4112_v31  ;;  %v1393_v5 = vadd.f32 1.0, %v2835_v50  ;;  %2844 = verf.f32 %v1270_v18  ;;  %v1025_v46 = vadd.f32 %v4067_v61, %v3709_v11  ;;  %v4245_v34 = vpop.f32.mrb[63].mxu0  ;;  %v4247_v13 = vpop.f32.mrb[63].mxu1  ;;  %v4802_v59 = vld [vmem:[#allocation61_spill] sm:$0xff] }
 0x290   :  { %4793 = vst [vmem:[#allocation70_spill] sm:$0xff] %v4245_v34  ;;  %4794 = vst [vmem:[#allocation71_spill] sm:$0xff] %v4247_v13  ;;  %2557 = vmatpush3.bf16.msra.mxu0 %v2734_v58  ;;  %2586 = vmatprep.subr.bf16.mxu1 %v2734_v58  ;;  %2846 = verf.f32 %v1272_v35  ;;  %v1138_v48 = vadd.f32 %v4074_v47, %v3723_v4  ;;  %v1499_v16 = vmul.f32 %v4018_v10, %v3761_v12  ;;  %v4799_v13 = vld [vmem:[#allocation57_spill] sm:$0xff] }
 0x291   :  { %v1503_v31 = vmul.f32 %v4046_v49, %v3789_v30  ;;  %v4256_v9 = vmul.f32 %v1393_v5, %v4129_v54  ;;  %v4258_v61 = vmul.f32 0.5, %v1025_v46  ;;  %v1271_v6 = vmul.f32 0.70710677, %v1025_v46  ;;  %v4795_v30 = vld [vmem:[#allocation56_spill] sm:$0xff]  ;;  %v4796_v49 = vld [vmem:[#allocation26_spill] sm:$0xff]  ;;  %v4798_v46 = vld [vmem:[#allocation23_spill] sm:$0xff] }
 0x292   :  { %v1501_v32 = vmul.f32 %v4023_v15, %v3771_v57  ;;  %v4262_v18 = vmul.f32 0.5, %v1138_v48  ;;  %v1273_v50 = vmul.f32 0.70710677, %v1138_v48  ;;  %v1505_v47 = vmul.f32 %v4070_v43, %v3799_v23  ;;  %v4797_v54 = vld [vmem:[#allocation58_spill] sm:$0xff] }
 0x293   :  { %v1559_v35 = vpack.c.bf16 %v1503_v31, %v1499_v16  ;;  %2594 = vmatpush3.bf16.msra.mxu1 %v2734_v58  ;;  %v2837_v12 = vpop.eup %2836  ;;  %2848 = verf.f32 %v1271_v6  ;;  %v1498_v10 = vmul.f32 %v4795_v30, %v3747_v22  ;;  %v1502_v5 = vmul.f32 %v4797_v54, %v4796_v49  ;;  %v4800_v16 = vld [vmem:[#allocation29_spill] sm:$0xff]  ;;  %v4801_v31 = vld [vmem:[#allocation59_spill] sm:$0xff]  ;;  %v4803_v30 = vld [vmem:[#allocation62_spill] sm:$0xff] }
 0x294   :  { %v1500_v34 = vmul.f32 %v4799_v13, %v4798_v46  ;;  %v2839_v57 = vpop.eup %2838  ;;  %v1394_v15 = vadd.f32 1.0, %v2837_v12  ;;  %2850 = verf.f32 %v1273_v50  ;;  %v1561_v48 = vpack.c.bf16 %v1505_v47, %v1501_v32  ;;  %v4804_v32 = vld [vmem:[#allocation63_spill] sm:$0xff] }
 0x295   :  { %1889 = vmatprep.mubr.bf16.mxu0 %v1559_v35  ;;  %v1504_v23 = vmul.f32 %v4801_v31, %v4800_v16  ;;  %v2841_v43 = vpop.eup %2840  ;;  %v1396_v58 = vadd.f32 1.0, %v2839_v57  ;;  %v1558_v6 = vpack.c.bf16 %v1502_v5, %v1498_v10  ;;  %v1029_v22 = vadd.f32 %v4802_v59, %v3705_v7  ;;  %v4806_v31 = vld [vmem:[#allocation65_spill] sm:$0xff] }
 0x296   :  { %v1142_v49 = vadd.f32 %v4803_v30, %v3707_v17  ;;  %v4279_v54 = vmul.f32 %v1394_v15, %v4176_v56  ;;  %v1395_v13 = vadd.f32 1.0, %v2841_v43  ;;  %1986 = vmatprep.mubr.bf16.mxu1 %v1561_v48  ;;  %v1031_v35 = vadd.f32 %v4804_v32, %v3709_v11 }
 0x297   :  { %v1560_v50 = vpack.c.bf16 %v1504_v23, %v1500_v34  ;;  %v4284_v47 = vmul.f32 %v1396_v58, %v4186_v41  ;;  %1890 = vmatmul.mubr.bf16.gmra.mrb[68].mxu0 %v1558_v6  ;;  %v4286_v12 = vmul.f32 0.5, %v1029_v22  ;;  %v1274_v10 = vmul.f32 0.70710677, %v1029_v22  ;;  %v4805_v41 = vld [vmem:[#allocation64_spill] sm:$0xff]  ;;  %v4807_v6 = vld [vmem:[#allocation67_spill] sm:$0xff] }
 0x298   :  { %v4288_v59 = vmul.f32 0.5, %v1142_v49  ;;  %v2843_v5 = vpop.eup %2842  ;;  %v4291_v46 = vmul.f32 %v1395_v13, %v4198_v44  ;;  %v1276_v56 = vmul.f32 0.70710677, %v1142_v49  ;;  %v4293_v57 = vmul.f32 0.5, %v1031_v35 }
 0x299   :  { %1987 = vmatmul.mubr.bf16.gmra.mrb[68].mxu1 %v1560_v50  ;;  %v1275_v34 = vmul.f32 0.70710677, %v1031_v35  ;;  %v2845_v15 = vpop.eup %2844  ;;  %v1397_v48 = vadd.f32 1.0, %v2843_v5  ;;  %2852 = verf.f32 %v1274_v10  ;;  %v1144_v16 = vadd.f32 %v4805_v41, %v3723_v4 }
 0x29a   :  { %v1033_v23 = vadd.f32 %v4806_v31, %v3705_v7  ;;  %v2847_v43 = vpop.eup %2846  ;;  %v1398_v58 = vadd.f32 1.0, %v2845_v15  ;;  %2854 = verf.f32 %v1276_v56  ;;  %v1146_v44 = vadd.f32 %v4114_v39, %v3707_v17  ;;  %v4808_v31 = vld [vmem:[#allocation34_spill] sm:$0xff] }
 0x29b   :  { %v1035_v22 = vadd.f32 %v4807_v6, %v3709_v11  ;;  %v4304_v30 = vmul.f32 %v1397_v48, %v4215_v42  ;;  %v1400_v49 = vadd.f32 1.0, %v2847_v43  ;;  %2856 = verf.f32 %v1275_v34 }
 0x29c   :  { %v4306_v13 = vmul.f32 0.5, %v1144_v16  ;;  %v4309_v50 = vmul.f32 %v1398_v58, %v4224_v63  ;;  %v1277_v32 = vmul.f32 0.70710677, %v1144_v16  ;;  %v4311_v35 = vmul.f32 0.5, %v1033_v23  ;;  %v4810_v58 = vld [vmem:[#allocation38_spill] sm:$0xff] }
 0x29d   :  { %v1278_v10 = vmul.f32 0.70710677, %v1033_v23  ;;  %v2849_v5 = vpop.eup %2848  ;;  %v4314_v39 = vmul.f32 %v1400_v49, %v4233_v36  ;;  %v4316_v56 = vmul.f32 0.5, %v1146_v44  ;;  %v1280_v15 = vmul.f32 0.70710677, %v1146_v44  ;;  %v4809_v23 = vld [vmem:[#allocation68_spill] sm:$0xff] }
 0x29e   :  { %v4318_v42 = vmul.f32 0.5, %v1035_v22  ;;  %v2851_v48 = vpop.eup %2850  ;;  %v1399_v34 = vadd.f32 1.0, %v2849_v5  ;;  %2858 = verf.f32 %v1277_v32  ;;  %v1279_v41 = vmul.f32 0.70710677, %v1035_v22  ;;  %v4811_v32 = vld [vmem:[#allocation35_spill] sm:$0xff] }
 0x29f   :  { %v1148_v63 = vadd.f32 %v4123_v45, %v3723_v4  ;;  %v1401_v16 = vadd.f32 1.0, %v2851_v48  ;;  %2860 = verf.f32 %v1278_v10  ;;  %v1507_v43 = vmul.f32 %v4809_v23, %v4808_v31  ;;  %v4812_v5 = vld [vmem:[#allocation39_spill] sm:$0xff]  ;;  %v4814_v31 = vld [vmem:[#allocation60_spill] sm:$0xff] }
 0x2a0   :  { %v1511_v36 = vmul.f32 %v4162_v20, %v4810_v58  ;;  %v4327_v6 = vmul.f32 %v1399_v34, %v4258_v61  ;;  %2862 = verf.f32 %v1280_v15  ;;  %v1509_v10 = vmul.f32 %v4132_v40, %v4811_v32  ;;  %v4813_v20 = vld [vmem:[#allocation32_spill] sm:$0xff] }
 0x2a1   :  { %v4329_v44 = vmul.f32 0.5, %v1148_v63  ;;  %v1281_v49 = vmul.f32 0.70710677, %v1148_v63  ;;  %v4332_v22 = vmul.f32 %v1401_v16, %v4262_v18  ;;  %2864 = verf.f32 %v1279_v41  ;;  %v4815_v34 = vld [vmem:[#allocation36_spill] sm:$0xff]  ;;  %v4816_v63 = vld [vmem:[#allocation33_spill] sm:$0xff]  ;;  %v4817_v18 = vld [vmem:[#allocation66_spill] sm:$0xff] }
 0x2a2   :  { %v1563_v45 = vpack.c.bf16 %v1511_v36, %v1507_v43  ;;  %v1513_v48 = vmul.f32 %v4174_v53, %v4812_v5  ;;  %v1506_v61 = vmul.f32 %v4814_v31, %v4813_v20  ;;  %v1510_v15 = vmul.f32 %v4137_v0, %v4815_v34  ;;  %v4818_v41 = vld [vmem:[#allocation37_spill] sm:$0xff] }
 0x2a3   :  { %2866 = verf.f32 %v1281_v49  ;;  %v2853_v23 = vpop.eup %2852  ;;  %v1508_v16 = vmul.f32 %v4817_v18, %v4816_v63  ;;  %v1512_v43 = vmul.f32 %v4151_v28, %v4818_v41  ;;  %v1039_v40 = vadd.f32 %v4141_v37, %v3705_v7 }
 0x2a4   :  { %1897 = vmatprep.mubr.bf16.mxu0 %v1563_v45  ;;  %v1152_v53 = vadd.f32 %v4143_v29, %v3707_v17  ;;  %v2855_v58 = vpop.eup %2854  ;;  %v1402_v36 = vadd.f32 1.0, %v2853_v23  ;;  %v1565_v49 = vpack.c.bf16 %v1513_v48, %v1509_v10  ;;  %v1562_v32 = vpack.c.bf16 %v1510_v15, %v1506_v61 }
 0x2a5   :  { %v1041_v0 = vadd.f32 %v4157_v21, %v3709_v11  ;;  %v2857_v45 = vpop.eup %2856  ;;  %v1404_v5 = vadd.f32 1.0, %v2855_v58  ;;  %v1564_v20 = vpack.c.bf16 %v1512_v43, %v1508_v16  ;;  %v4352_v31 = vmul.f32 0.5, %v1039_v40 }
 0x2a6   :  { %v1282_v34 = vmul.f32 0.70710677, %v1039_v40  ;;  %v4355_v28 = vmul.f32 %v1402_v36, %v4286_v12  ;;  %v1403_v37 = vadd.f32 1.0, %v2857_v45  ;;  %1994 = vmatprep.mubr.bf16.mxu1 %v1565_v49  ;;  %1898 = vmatmul.mubr.bf16.gmra.mrb[72].mxu0 %v1562_v32  ;;  %v4357_v29 = vmul.f32 0.5, %v1152_v53 }
 0x2a7   :  { %v1284_v23 = vmul.f32 0.70710677, %v1152_v53  ;;  %v4360_v10 = vmul.f32 %v1404_v5, %v4288_v59  ;;  %1995 = vmatmul.mubr.bf16.gmra.mrb[72].mxu1 %v1564_v20  ;;  %v4362_v21 = vmul.f32 0.5, %v1041_v0  ;;  %v1283_v48 = vmul.f32 0.70710677, %v1041_v0 }
 0x2a8   :  { %2868 = verf.f32 %v1282_v34  ;;  %v2859_v61 = vpop.eup %2858  ;;  %v4365_v15 = vmul.f32 %v1403_v37, %v4293_v57  ;;  %v1154_v12 = vadd.f32 %v4159_v62, %v3723_v4  ;;  %v1043_v63 = vadd.f32 %v4169_v14, %v3705_v7 }
 0x2a9   :  { %2870 = verf.f32 %v1284_v23  ;;  %v2861_v18 = vpop.eup %2860  ;;  %v1405_v16 = vadd.f32 1.0, %v2859_v61  ;;  %v1156_v59 = vadd.f32 %v4171_v3, %v3707_v17  ;;  %v1045_v41 = vadd.f32 %v4178_v26, %v3709_v11 }
 0x2aa   :  { %2872 = verf.f32 %v1283_v48  ;;  %v2863_v43 = vpop.eup %2862  ;;  %v1406_v40 = vadd.f32 1.0, %v2861_v18  ;;  %v4375_v57 = vmul.f32 0.5, %v1154_v12  ;;  %v1285_v53 = vmul.f32 0.70710677, %v1154_v12  ;;  %v4819_v48 = vld [vmem:[#allocation42_spill] sm:$0xff] }
 0x2ab   :  { %v4377_v58 = vmul.f32 0.5, %v1043_v63  ;;  %v2865_v62 = vpop.eup %2864  ;;  %v4380_v36 = vmul.f32 %v1405_v16, %v4306_v13  ;;  %v1408_v14 = vadd.f32 1.0, %v2863_v43  ;;  %v1286_v49 = vmul.f32 0.70710677, %v1043_v63  ;;  %v4821_v63 = vld [vmem:[#allocation43_spill] sm:$0xff] }
 0x2ac   :  { %v4382_v32 = vmul.f32 0.5, %v1156_v59  ;;  %v4385_v3 = vmul.f32 %v1406_v40, %v4311_v35  ;;  %v1407_v26 = vadd.f32 1.0, %v2865_v62  ;;  %2874 = verf.f32 %v1285_v53  ;;  %v4824_v53 = vld [vmem:[#allocation44_spill] sm:$0xff]  ;;  %v4825_v62 = vld [vmem:[#allocation41_spill] sm:$0xff] }
 0x2ad   :  { %v2867_v0 = vpop.eup %2866  ;;  %v1288_v45 = vmul.f32 0.70710677, %v1156_v59  ;;  %v4388_v5 = vmul.f32 %v1408_v14, %v4316_v56  ;;  %2876 = verf.f32 %v1286_v49  ;;  %v4390_v34 = vmul.f32 0.5, %v1045_v41  ;;  %v4820_v56 = vld [vmem:[#allocation46_spill] sm:$0xff]  ;;  %v4822_v59 = vld [vmem:[#allocation47_spill] sm:$0xff] }
 0x2ae   :  { %v1409_v20 = vadd.f32 1.0, %v2867_v0  ;;  %v4393_v13 = vmul.f32 %v1407_v26, %v4318_v42  ;;  %v1287_v37 = vmul.f32 0.70710677, %v1045_v41  ;;  %v1158_v23 = vadd.f32 %v4180_v51, %v3723_v4  ;;  %v4826_v0 = vld [vmem:[#allocation45_spill] sm:$0xff] }
 0x2af   :  { %2878 = verf.f32 %v1288_v45  ;;  %v1515_v61 = vmul.f32 %v4201_v60, %v4819_v48  ;;  %v1519_v12 = vmul.f32 %v4241_v25, %v4820_v56  ;;  %v1517_v18 = vmul.f32 %v4213_v27, %v4821_v63 }
 0x2b0   :  { %v4398_v35 = vmul.f32 %v1409_v20, %v4329_v44  ;;  %2880 = verf.f32 %v1287_v37  ;;  %v4406_v42 = vmul.f32 0.5, %v1158_v23  ;;  %v1289_v16 = vmul.f32 0.70710677, %v1158_v23  ;;  %v4823_v44 = vld [vmem:[#allocation40_spill] sm:$0xff] }
 0x2b1   :  { %v1521_v41 = vmul.f32 %v4256_v9, %v4822_v59  ;;  %v1567_v43 = vpack.c.bf16 %v1519_v12, %v1515_v61  ;;  %v1514_v40 = vmul.f32 %v4184_v38, %v4823_v44  ;;  %v1518_v60 = vmul.f32 %v4222_v1, %v4824_v53  ;;  %v4828_v44 = vld [vmem:[#allocation70_spill] sm:$0xff] }
 0x2b2   :  { %v2869_v51 = vpop.eup %2868  ;;  %v1516_v25 = vmul.f32 %v4193_v55, %v4825_v62  ;;  %2882 = verf.f32 %v1289_v16  ;;  %v1520_v26 = vmul.f32 %v4231_v33, %v4826_v0  ;;  %v1049_v38 = vadd.f32 %v4217_v2, %v3705_v7 }
 0x2b3   :  { %v2871_v14 = vpop.eup %2870  ;;  %v1410_v27 = vadd.f32 1.0, %v2869_v51  ;;  %v1569_v49 = vpack.c.bf16 %v1521_v41, %v1517_v18  ;;  %1905 = vmatprep.mubr.bf16.mxu0 %v1567_v43  ;;  %v1566_v20 = vpack.c.bf16 %v1518_v60, %v1514_v40  ;;  %v1162_v1 = vadd.f32 %v4219_v19, %v3707_v17 }
 0x2b4   :  { %v2873_v45 = vpop.eup %2872  ;;  %v1412_v9 = vadd.f32 1.0, %v2871_v14  ;;  %v1568_v23 = vpack.c.bf16 %v1520_v26, %v1516_v25  ;;  %v1051_v48 = vadd.f32 %v4226_v24, %v3709_v11  ;;  %v4430_v61 = vmul.f32 0.5, %v1049_v38 }
 0x2b5   :  { %v4423_v37 = vmul.f32 %v1410_v27, %v4352_v31  ;;  %v1411_v55 = vadd.f32 1.0, %v2873_v45  ;;  %2002 = vmatprep.mubr.bf16.mxu1 %v1569_v49  ;;  %1906 = vmatmul.mubr.bf16.gmra.mrb[76].mxu0 %v1566_v20  ;;  %v1290_v56 = vmul.f32 0.70710677, %v1049_v38  ;;  %v4432_v2 = vmul.f32 0.5, %v1162_v1  ;;  %v4829_v45 = vld [vmem:[#allocation71_spill] sm:$0xff]  ;;  %v4830_v38 = vld [vmem:[#allocation50_spill] sm:$0xff] }
 0x2b6   :  { %v4428_v33 = vmul.f32 %v1412_v9, %v4357_v29  ;;  %v2875_v12 = vpop.eup %2874  ;;  %2003 = vmatmul.mubr.bf16.gmra.mrb[76].mxu1 %v1568_v23  ;;  %v1292_v31 = vmul.f32 0.70710677, %v1162_v1  ;;  %v4437_v63 = vmul.f32 0.5, %v1051_v48  ;;  %v1291_v18 = vmul.f32 0.70710677, %v1051_v48  ;;  %v4831_v23 = vld [vmem:[#allocation54_spill] sm:$0xff] }
 0x2b7   :  { %v4435_v19 = vmul.f32 %v1411_v55, %v4362_v21  ;;  %v2877_v16 = vpop.eup %2876  ;;  %v1413_v24 = vadd.f32 1.0, %v2875_v12  ;;  %2884 = verf.f32 %v1290_v56  ;;  %v1164_v29 = vadd.f32 %v4228_v52, %v3723_v4  ;;  %v4827_v21 = vld [vmem:[#allocation69_spill] sm:$0xff]  ;;  %v4832_v12 = vld [vmem:[#allocation51_spill] sm:$0xff] }
 0x2b8   :  { %v1053_v59 = vadd.f32 %v4235_v8, %v3705_v7  ;;  %v1414_v51 = vadd.f32 1.0, %v2877_v16  ;;  %2886 = verf.f32 %v1292_v31  ;;  %v1166_v43 = vadd.f32 %v4827_v21, %v3707_v17  ;;  %v4833_v31 = vld [vmem:[#allocation55_spill] sm:$0xff]  ;;  %v4834_v16 = vld [vmem:[#allocation48_spill] sm:$0xff] }
 0x2b9   :  { %v2879_v41 = vpop.eup %2878  ;;  %v1055_v40 = vadd.f32 %v4828_v44, %v3709_v11  ;;  %v4448_v53 = vmul.f32 %v1413_v24, %v4375_v57  ;;  %2888 = verf.f32 %v1291_v18  ;;  %v4450_v62 = vmul.f32 0.5, %v1164_v29  ;;  %v4835_v24 = vld [vmem:[#allocation52_spill] sm:$0xff] }
 0x2ba   :  { %v1416_v60 = vadd.f32 1.0, %v2879_v41  ;;  %v2881_v52 = vpop.eup %2880  ;;  %v4453_v25 = vmul.f32 %v1414_v51, %v4377_v58  ;;  %v1293_v7 = vmul.f32 0.70710677, %v1164_v29  ;;  %v4455_v8 = vmul.f32 0.5, %v1053_v59  ;;  %v4837_v51 = vld [vmem:[#allocation53_spill] sm:$0xff] }
 0x2bb   :  { %v1294_v14 = vmul.f32 0.70710677, %v1053_v59  ;;  %v1415_v27 = vadd.f32 1.0, %v2881_v52  ;;  %v4460_v11 = vmul.f32 0.5, %v1166_v43  ;;  %v1296_v57 = vmul.f32 0.70710677, %v1166_v43 }
 0x2bc   :  { %v4458_v17 = vmul.f32 %v1416_v60, %v4382_v32  ;;  %v2883_v49 = vpop.eup %2882  ;;  %2890 = verf.f32 %v1293_v7  ;;  %v4462_v0 = vmul.f32 0.5, %v1055_v40  ;;  %v1295_v26 = vmul.f32 0.70710677, %v1055_v40  ;;  %v4839_v60 = vld [vmem:[#allocation11_spill] sm:$0xff]  ;;  %v4840_v52 = vld [vmem:[#allocation8_spill] sm:$0xff] }
 0x2bd   :  { %v1168_v58 = vadd.f32 %v4829_v45, %v3723_v4  ;;  %v1479_v9 = vmul.f32 %v1415_v27, %v4390_v34  ;;  %v1417_v20 = vadd.f32 1.0, %v2883_v49  ;;  %2892 = verf.f32 %v1294_v14  ;;  %v4841_v27 = vld [vmem:[#allocation12_spill] sm:$0xff] }
 0x2be   :  { %v1523_v32 = vmul.f32 %v4291_v46, %v4830_v38  ;;  %2894 = verf.f32 %v1296_v57  ;;  %v1527_v48 = vmul.f32 %v4327_v6, %v4831_v23  ;;  %v1525_v4 = vmul.f32 %v4304_v30, %v4832_v12  ;;  %v4836_v6 = vld [vmem:[#allocation49_spill] sm:$0xff]  ;;  %v4838_v30 = vld [vmem:[#allocation7_spill] sm:$0xff]  ;;  %v4844_v38 = vld [vmem:[#allocation6_spill] sm:$0xff] }
 0x2bf   :  { %v4469_v1 = vmul.f32 0.5, %v1168_v58  ;;  %v1297_v55 = vmul.f32 0.70710677, %v1168_v58  ;;  %v1481_v56 = vmul.f32 %v1417_v20, %v4406_v42  ;;  %2896 = verf.f32 %v1295_v26  ;;  %v4842_v57 = vld [vmem:[#allocation5_spill] sm:$0xff] }
 0x2c0   :  { %v1529_v34 = vmul.f32 %v4332_v22, %v4833_v31  ;;  %v1571_v18 = vpack.c.bf16 %v1527_v48, %v1523_v32  ;;  %v1522_v46 = vmul.f32 %v4279_v54, %v4834_v16  ;;  %v1526_v29 = vmul.f32 %v4309_v50, %v4835_v24  ;;  %v4843_v58 = vld [vmem:[#allocation9_spill] sm:$0xff]  ;;  %v4846_v48 = vld [vmem:[#allocation15_spill] sm:$0xff]  ;;  %v4849_v16 = vld [vmem:[#allocation20_spill] sm:$0xff] }
 0x2c1   :  { %2898 = verf.f32 %v1297_v55  ;;  %v2885_v59 = vpop.eup %2884  ;;  %v1524_v42 = vmul.f32 %v4284_v47, %v4836_v6  ;;  %v1528_v21 = vmul.f32 %v4314_v39, %v4837_v51  ;;  %v1531_v43 = vmul.f32 %v4365_v15, %v4838_v30  ;;  %v4845_v55 = vld [vmem:[#allocation10_spill] sm:$0xff] }
 0x2c2   :  { %v1573_v41 = vpack.c.bf16 %v1529_v34, %v1525_v4  ;;  %v2887_v22 = vpop.eup %2886  ;;  %v1418_v44 = vadd.f32 1.0, %v2885_v59  ;;  %1913 = vmatprep.mubr.bf16.mxu0 %v1571_v18  ;;  %v1570_v40 = vpack.c.bf16 %v1526_v29, %v1522_v46  ;;  %v1535_v54 = vmul.f32 %v4393_v13, %v4839_v60  ;;  %v4847_v4 = vld [vmem:[#allocation19_spill] sm:$0xff]  ;;  %v4848_v18 = vld [vmem:[#allocation16_spill] sm:$0xff] }
 0x2c3   :  { %v1533_v50 = vmul.f32 %v4380_v36, %v4840_v52  ;;  %v2889_v7 = vpop.eup %2888  ;;  %v1420_v14 = vadd.f32 1.0, %v2887_v22  ;;  %v1572_v47 = vpack.c.bf16 %v1528_v21, %v1524_v42  ;;  %v1537_v39 = vmul.f32 %v4398_v35, %v4841_v27  ;;  %v4852_v21 = vld [vmem:[#allocation14_spill] sm:$0xff]  ;;  %v4855_v52 = vld [vmem:[#allocation25_spill] sm:$0xff] }
 0x2c4   :  { %2010 = vmatprep.mubr.bf16.mxu1 %v1573_v41  ;;  %v1530_v15 = vmul.f32 %v4355_v28, %v4842_v57  ;;  %v1482_v49 = vmul.f32 %v1418_v44, %v4430_v61  ;;  %v1419_v26 = vadd.f32 1.0, %v2889_v7  ;;  %1914 = vmatmul.mubr.bf16.gmra.mrb[80].mxu0 %v1570_v40  ;;  %v1575_v45 = vpack.c.bf16 %v1535_v54, %v1531_v43  ;;  %v4851_v41 = vld [vmem:[#allocation17_spill] sm:$0xff]  ;;  %v4853_v44 = vld [vmem:[#allocation18_spill] sm:$0xff] }
 0x2c5   :  { %v1534_v13 = vmul.f32 %v4385_v3, %v4843_v58  ;;  %v1484_v36 = vmul.f32 %v1420_v14, %v4432_v2  ;;  %2011 = vmatmul.mubr.bf16.gmra.mrb[80].mxu1 %v1572_v47  ;;  %v1577_v20 = vpack.c.bf16 %v1537_v39, %v1533_v50  ;;  %v1532_v32 = vmul.f32 %v4360_v10, %v4844_v38  ;;  %v4857_v47 = vld [vmem:[#allocation27_spill] sm:$0xff] }
 0x2c6   :  { %v1536_v35 = vmul.f32 %v4388_v5, %v4845_v55  ;;  %v2891_v23 = vpop.eup %2890  ;;  %v1483_v28 = vmul.f32 %v1419_v26, %v4437_v63  ;;  %1921 = vmatprep.mubr.bf16.mxu0 %v1575_v45  ;;  %v1539_v12 = vmul.f32 %v4435_v19, %v4846_v48  ;;  %v1543_v3 = vmul.f32 %v1479_v9, %v4847_v4  ;;  %v4850_v63 = vld [vmem:[#allocation13_spill] sm:$0xff]  ;;  %v4861_v58 = vld [vmem:[#allocation31_spill] sm:$0xff]  ;;  %v2739_v55 = vld [vmem:[%s4722_s9 + $0x38] sm:$0xff]  }
 0x2c7   :  { %v1574_v61 = vpack.c.bf16 %v1534_v13, %v1530_v15  ;;  %v2893_v31 = vpop.eup %2892  ;;  %v1421_v2 = vadd.f32 1.0, %v2891_v23  ;;  %2018 = vmatprep.mubr.bf16.mxu1 %v1577_v20  ;;  %v1541_v10 = vmul.f32 %v4448_v53, %v4848_v18  ;;  %v1545_v46 = vmul.f32 %v1481_v56, %v4849_v16  ;;  %v4860_v15 = vld [vmem:[#allocation30_spill] sm:$0xff]  ;;  %v4550_v23 = vld [vmem:[%s4721_s8] ss:$0 sm:$0xff] }
 0x2c8   :  { %v1576_v34 = vpack.c.bf16 %v1536_v35, %v1532_v32  ;;  %v2895_v5 = vpop.eup %2894  ;;  %v1422_v24 = vadd.f32 1.0, %v2893_v31  ;;  %v1579_v29 = vpack.c.bf16 %v1543_v3, %v1539_v12  ;;  %v1538_v59 = vmul.f32 %v4423_v37, %v4850_v63  ;;  %v2738_v32 = vld [vmem:[%s4722_s9 + $0x30] sm:$0xff]  }
 0x2c9   :  { %v1542_v19 = vmul.f32 %v4453_v25, %v4851_v41  ;;  %v2897_v6 = vpop.eup %2896  ;;  %v1485_v9 = vmul.f32 %v1421_v2, %v4450_v62  ;;  %v1424_v42 = vadd.f32 1.0, %v2895_v5  ;;  %v1581_v51 = vpack.c.bf16 %v1545_v46, %v1541_v10  ;;  %v4854_v25 = vld [vmem:[#allocation24_spill] sm:$0xff] }
 0x2ca   :  { %v1540_v30 = vmul.f32 %v4428_v33, %v4852_v21  ;;  %v1486_v56 = vmul.f32 %v1422_v24, %v4455_v8  ;;  %v1423_v43 = vadd.f32 1.0, %v2897_v6  ;;  %v1544_v40 = vmul.f32 %v4458_v17, %v4853_v44  ;;  %v4856_v33 = vld [vmem:[#allocation21_spill] sm:$0xff]  ;;  %v4858_v17 = vld [vmem:[#allocation22_spill] sm:$0xff] }
 0x2cb   :  { %v2899_v53 = vpop.eup %2898  ;;  %v1578_v22 = vpack.c.bf16 %v1542_v19, %v1538_v59  ;;  %v1488_v37 = vmul.f32 %v1424_v42, %v4460_v11  ;;  %v1547_v54 = vmul.f32 %v1483_v28, %v4854_v25  ;;  %v1549_v62 = vmul.f32 %v1485_v9, %v4855_v52  ;;  %v4859_v11 = vld [vmem:[#allocation28_spill] sm:$0xff]  ;;  %v2901_v59 = vld [vmem:[%s4713_s0 + $0x8] sm:$0xff]  ;;  %v2902_v52 = vld [vmem:[%s4713_s0 + $0x10] sm:$0xff] }
 0x2cc   :  { %v1425_v60 = vadd.f32 1.0, %v2899_v53  ;;  %v1487_v50 = vmul.f32 %v1423_v43, %v4462_v0  ;;  %1922 = vmatmul.mubr.bf16.gmra.mrb[84].mxu0 %v1574_v61  ;;  %v1580_v7 = vpack.c.bf16 %v1544_v40, %v1540_v30  ;;  %v1546_v14 = vmul.f32 %v1482_v49, %v4856_v33  ;;  %v2736_v49 = vld [vmem:[%s4722_s9 + $0x20] sm:$0xff]  }
 0x2cd   :  { %v1550_v8 = vmul.f32 %v1486_v56, %v4857_v47  ;;  %2019 = vmatmul.mubr.bf16.gmra.mrb[84].mxu1 %v1576_v34  ;;  %1929 = vmatprep.mubr.bf16.mxu0 %v1579_v29  ;;  %v1548_v39 = vmul.f32 %v1484_v36, %v4858_v17  ;;  %v1552_v57 = vmul.f32 %v1488_v37, %v4859_v11  ;;  %v2737_v36 = vld [vmem:[%s4722_s9 + $0x28] sm:$0xff]   ;;  %v2900_v29 = vld [vmem:[%s4713_s0] sm:$0xff] }
 0x2ce   :  { %v1489_v27 = vmul.f32 %v1425_v60, %v4469_v1  ;;  %2026 = vmatprep.mubr.bf16.mxu1 %v1581_v51  ;;  %v1551_v26 = vmul.f32 %v1487_v50, %v4860_v15  ;;  %v2735_v1 = vld [vmem:[%s4722_s9 + $0x18] sm:$0xff]  }
 0x2cf   :  { %v1582_v45 = vpack.c.bf16 %v1550_v8, %v1546_v14  ;;  %v1584_v13 = vpack.c.bf16 %v1552_v57, %v1548_v39  ;;  %2558 = vmatprep.subr.bf16.mxu0 %v2735_v1  ;;  %2587 = vmatprep.subr.bf16.mxu1 %v2735_v1  ;;  %v2903_v50 = vld [vmem:[%s4713_s0 + $0x18] sm:$0xff] }
 0x2d0   :  { %v1553_v0 = vmul.f32 %v1489_v27, %v4861_v58  ;;  %v1583_v20 = vpack.c.bf16 %v1551_v26, %v1547_v54  ;;  %2559 = vmatpush3.bf16.msra.mxu0 %v2735_v1  ;;  %2595 = vmatpush3.bf16.msra.mxu1 %v2735_v1  ;;  %v2904_v1 = vld [vmem:[%s4713_s0 + $0x20] sm:$0xff] }
 0x2d1   :  { %2560 = vmatprep.subr.bf16.mxu0 %v2736_v49  ;;  %2588 = vmatprep.subr.bf16.mxu1 %v2736_v49 }
 0x2d2   :  { %v1585_v38 = vpack.c.bf16 %v1553_v0, %v1549_v62 }
 0x2d4   :  { %1930 = vmatmul.mubr.bf16.gmra.mrb[88].mxu0 %v1578_v22  ;;  %2596 = vmatpush3.bf16.msra.mxu1 %v2736_v49 }
 0x2d5   :  { %2027 = vmatmul.mubr.bf16.gmra.mrb[88].mxu1 %v1580_v7  ;;  %1937 = vmatprep.mubr.bf16.mxu0 %v1583_v20 }
 0x2d6   :  { %2034 = vmatprep.mubr.bf16.mxu1 %v1585_v38  ;;  %2561 = vmatpush3.bf16.msra.mxu0 %v2736_v49 }
 0x2d7   :  { %2562 = vmatprep.subr.bf16.mxu0 %v2737_v36  ;;  %2589 = vmatprep.subr.bf16.mxu1 %v2737_v36 }
 0x2d8   :  { %2597 = vmatpush3.bf16.msra.mxu1 %v2737_v36 }
 0x2d9   :  { %2590 = vmatprep.subr.bf16.mxu1 %v2738_v32 }
 0x2da   :  { %2563 = vmatpush3.bf16.msra.mxu0 %v2737_v36  ;;  %v2905_v36 = vld [vmem:[%s4713_s0 + $0x28] sm:$0xff] }
 0x2db   :  { %2564 = vmatprep.subr.bf16.mxu0 %v2738_v32 }
 0x2dc   :  { %1938 = vmatmul.mubr.bf16.gmra.mrb[92].mxu0 %v1582_v45  ;;  %2598 = vmatpush3.bf16.msra.mxu1 %v2738_v32 }
 0x2dd   :  { %2035 = vmatmul.mubr.bf16.gmra.mrb[92].mxu1 %v1584_v13  ;;  %2591 = vmatprep.subr.bf16.mxu1 %v2739_v55 }
 0x2de   :  { %2565 = vmatpush3.bf16.msra.mxu0 %v2738_v32 }
 0x2df   :  { %2566 = vmatprep.subr.bf16.mxu0 %v2739_v55 }
 0x2e0   :  { %2599 = vmatpush3.bf16.msra.mxu1 %v2739_v55 }
 0x2e2   :  { %2567 = vmatpush3.bf16.msra.mxu0 %v2739_v55 }
 0x35a   :  { %v2424_v35 = vpop.f32.mrb[64].mxu0 }
 0x35b   :  { %v2425_v28 = vpop.f32.mrb[65].mxu0 }
 0x35c   :  { %v2426_v61 = vadd.f32 %v2425_v28, %v2424_v35  ;;  %v2427_v48 = vpop.f32.mrb[66].mxu0 }
 0x35d   :  { %v2488_v12 = vpop.f32.mrb[64].mxu1  ;;  %v2428_v4 = vpop.f32.mrb[67].mxu0 }
 0x35e   :  { %v1884_v3 = vadd.f32 %v2426_v61, %v4550_v23  ;;  %v2489_v31 = vpop.f32.mrb[65].mxu1  ;;  %v2429_v2 = vadd.f32 %v2428_v4, %v2427_v48 }
 0x35f   :  { %v2490_v34 = vadd.f32 %v2489_v31, %v2488_v12  ;;  %v2491_v18 = vpop.f32.mrb[66].mxu1 }
 0x360   :  { %v1887_v10 = vadd.f32 %v2429_v2, %v4550_v23  ;;  %v2492_v16 = vpop.f32.mrb[67].mxu1 }
 0x361   :  { %v1981_v46 = vadd.f32 %v2490_v34, %v1884_v3  ;;  %v2493_v5 = vadd.f32 %v2492_v16, %v2491_v18 }
 0x363   :  { %v1984_v24 = vadd.f32 %v2493_v5, %v1887_v10  ;;  %v2043_v63 = vadd.f32 %v2900_v29, %v1981_v46  ;;  %v2906_v29 = vld [vmem:[%s4713_s0 + $0x30] sm:$0xff] }
 0x365   :  { %v2044_v41 = vadd.f32 %v2901_v59, %v1984_v24  ;;  %v2907_v59 = vld [vmem:[%s4713_s0 + $0x38] sm:$0xff] }
 0x367   :  { %v2059_v19 = vpack.c.bf16 %v2044_v41, %v2043_v63 }
 0x369   :  { %2568 = vmatprep.mubr.bf16.mxu0 %v2059_v19 }
 0x36a   :  { %v2430_v6 = vpop.f32.mrb[68].mxu0 }
 0x36b   :  { %v2431_v42 = vpop.f32.mrb[69].mxu0 }
 0x36c   :  { %v2494_v9 = vpop.f32.mrb[68].mxu1  ;;  %v2432_v51 = vadd.f32 %v2431_v42, %v2430_v6  ;;  %v2433_v30 = vpop.f32.mrb[70].mxu0 }
 0x36d   :  { %v2495_v21 = vpop.f32.mrb[69].mxu1  ;;  %v2434_v43 = vpop.f32.mrb[71].mxu0 }
 0x36e   :  { %v2496_v53 = vadd.f32 %v2495_v21, %v2494_v9  ;;  %v2497_v56 = vpop.f32.mrb[70].mxu1  ;;  %v1892_v22 = vadd.f32 %v2432_v51, %v4550_v23  ;;  %v2435_v44 = vadd.f32 %v2434_v43, %v2433_v30 }
 0x36f   :  { %v2498_v40 = vpop.f32.mrb[71].mxu1 }
 0x370   :  { %v2499_v37 = vadd.f32 %v2498_v40, %v2497_v56  ;;  %v1989_v60 = vadd.f32 %v2496_v53, %v1892_v22  ;;  %v1895_v25 = vadd.f32 %v2435_v44, %v4550_v23 }
 0x372   :  { %v1992_v54 = vadd.f32 %v2499_v37, %v1895_v25  ;;  %v2045_v62 = vadd.f32 %v2902_v52, %v1989_v60 }
 0x374   :  { %v2046_v7 = vadd.f32 %v2903_v50, %v1992_v54 }
 0x376   :  { %v2060_v33 = vpack.c.bf16 %v2046_v7, %v2045_v62  ;;  %v2908_v7 = vld [vmem:[%s4713_s0 + $0x40] sm:$0xff] }
 0x378   :  { %2569 = vmatmul.mubr.bf16.vlgmr.msra.gmra.mrb[96].mxu0 %v2060_v33 }
 0x379   :  { %v2436_v14 = vpop.f32.mrb[72].mxu0 }
 0x37a   :  { %v2500_v47 = vpop.f32.mrb[72].mxu1  ;;  %v2437_v8 = vpop.f32.mrb[73].mxu0 }
 0x37b   :  { %v2438_v27 = vadd.f32 %v2437_v8, %v2436_v14  ;;  %v2501_v17 = vpop.f32.mrb[73].mxu1  ;;  %v2439_v39 = vpop.f32.mrb[74].mxu0  ;;  %v2909_v14 = vld [vmem:[%s4713_s0 + $0x48] sm:$0xff] }
 0x37c   :  { %v2502_v11 = vadd.f32 %v2501_v17, %v2500_v47  ;;  %v2503_v57 = vpop.f32.mrb[74].mxu1  ;;  %v2440_v15 = vpop.f32.mrb[75].mxu0 }
 0x37d   :  { %v1900_v26 = vadd.f32 %v2438_v27, %v4550_v23  ;;  %v2441_v45 = vadd.f32 %v2440_v15, %v2439_v39  ;;  %v2504_v58 = vpop.f32.mrb[75].mxu1 }
 0x37e   :  { %v2505_v0 = vadd.f32 %v2504_v58, %v2503_v57 }
 0x37f   :  { %v1997_v13 = vadd.f32 %v2502_v11, %v1900_v26  ;;  %v1903_v20 = vadd.f32 %v2441_v45, %v4550_v23 }
 0x381   :  { %v2000_v38 = vadd.f32 %v2505_v0, %v1903_v20  ;;  %v2047_v49 = vadd.f32 %v2904_v1, %v1997_v13 }
 0x383   :  { %v2048_v32 = vadd.f32 %v2905_v36, %v2000_v38 }
 0x385   :  { %v2061_v55 = vpack.c.bf16 %v2048_v32, %v2047_v49  ;;  %v2910_v32 = vld [vmem:[%s4713_s0 + $0x50] sm:$0xff] }
 0x387   :  { %2572 = vmatprep.mubr.bf16.mxu0 %v2061_v55 }
 0x388   :  { %v2442_v35 = vpop.f32.mrb[76].mxu0 }
 0x389   :  { %v2506_v28 = vpop.f32.mrb[76].mxu1  ;;  %v2443_v61 = vpop.f32.mrb[77].mxu0 }
 0x38a   :  { %v2444_v48 = vadd.f32 %v2443_v61, %v2442_v35  ;;  %v2507_v12 = vpop.f32.mrb[77].mxu1  ;;  %v2445_v4 = vpop.f32.mrb[78].mxu0  ;;  %v2911_v35 = vld [vmem:[%s4713_s0 + $0x58] sm:$0xff] }
 0x38b   :  { %v2508_v3 = vadd.f32 %v2507_v12, %v2506_v28  ;;  %v2509_v31 = vpop.f32.mrb[78].mxu1  ;;  %v2446_v2 = vpop.f32.mrb[79].mxu0 }
 0x38c   :  { %v1908_v34 = vadd.f32 %v2444_v48, %v4550_v23  ;;  %v2447_v18 = vadd.f32 %v2446_v2, %v2445_v4  ;;  %v2510_v10 = vpop.f32.mrb[79].mxu1 }
 0x38d   :  { %v2511_v16 = vadd.f32 %v2510_v10, %v2509_v31 }
 0x38e   :  { %v2005_v46 = vadd.f32 %v2508_v3, %v1908_v34  ;;  %v1911_v5 = vadd.f32 %v2447_v18, %v4550_v23 }
 0x390   :  { %v2008_v24 = vadd.f32 %v2511_v16, %v1911_v5  ;;  %v2049_v63 = vadd.f32 %v2906_v29, %v2005_v46 }
 0x392   :  { %v2050_v41 = vadd.f32 %v2907_v59, %v2008_v24 }
 0x394   :  { %v2062_v19 = vpack.c.bf16 %v2050_v41, %v2049_v63  ;;  %v2912_v41 = vld [vmem:[%s4713_s0 + $0x60] sm:$0xff] }
 0x396   :  { %2573 = vmatmul.mubr.bf16.gmra.mrb[100].mxu0 %v2062_v19 }
 0x397   :  { %v2448_v6 = vpop.f32.mrb[80].mxu0 }
 0x398   :  { %v2512_v9 = vpop.f32.mrb[80].mxu1  ;;  %v2449_v42 = vpop.f32.mrb[81].mxu0 }
 0x399   :  { %v2450_v51 = vadd.f32 %v2449_v42, %v2448_v6  ;;  %v2513_v21 = vpop.f32.mrb[81].mxu1  ;;  %v2451_v30 = vpop.f32.mrb[82].mxu0  ;;  %v2913_v6 = vld [vmem:[%s4713_s0 + $0x68] sm:$0xff] }
 0x39a   :  { %v2514_v53 = vadd.f32 %v2513_v21, %v2512_v9  ;;  %v2515_v56 = vpop.f32.mrb[82].mxu1  ;;  %v2452_v43 = vpop.f32.mrb[83].mxu0 }
 0x39b   :  { %v1916_v22 = vadd.f32 %v2450_v51, %v4550_v23  ;;  %v2453_v44 = vadd.f32 %v2452_v43, %v2451_v30  ;;  %v2516_v40 = vpop.f32.mrb[83].mxu1 }
 0x39c   :  { %v2517_v37 = vadd.f32 %v2516_v40, %v2515_v56 }
 0x39d   :  { %v2013_v60 = vadd.f32 %v2514_v53, %v1916_v22  ;;  %v1919_v25 = vadd.f32 %v2453_v44, %v4550_v23 }
 0x39f   :  { %v2016_v54 = vadd.f32 %v2517_v37, %v1919_v25  ;;  %v2454_v52 = vpop.f32.mrb[84].mxu0  ;;  %v2051_v33 = vadd.f32 %v2908_v7, %v2013_v60 }
 0x3a0   :  { %v2518_v62 = vpop.f32.mrb[84].mxu1  ;;  %v2455_v50 = vpop.f32.mrb[85].mxu0 }
 0x3a1   :  { %v2052_v47 = vadd.f32 %v2909_v14, %v2016_v54  ;;  %v2456_v8 = vadd.f32 %v2455_v50, %v2454_v52  ;;  %v2519_v27 = vpop.f32.mrb[85].mxu1  ;;  %v2457_v17 = vpop.f32.mrb[86].mxu0  ;;  %v2914_v52 = vld [vmem:[%s4713_s0 + $0x70] sm:$0xff]  ;;  %v2915_v50 = vld [vmem:[%s4713_s0 + $0x78] sm:$0xff]  ;;  %v4619_v14 = vld [vmem:[%s4723_s10] ss:$0 sm:$0xff] }
 0x3a2   :  { %v2520_v39 = vadd.f32 %v2519_v27, %v2518_v62  ;;  %v2521_v11 = vpop.f32.mrb[86].mxu1  ;;  %v2458_v57 = vpop.f32.mrb[87].mxu0  ;;  %s2289_s0 = sshll.u32 %s2941_s5, 4  ;;  %s2290_s0 = int_to_ptr.vmem [resolvable:$true] %s2289_s0 }
 0x3a3   :  { %v1924_v15 = vadd.f32 %v2456_v8, %v4550_v23  ;;  %v2459_v26 = vadd.f32 %v2458_v57, %v2457_v17  ;;  %v2522_v45 = vpop.f32.mrb[87].mxu1  ;;  %v2063_v58 = vpack.c.bf16 %v2052_v47, %v2051_v33  ;;  %v2237_v47 = vld [vmem:[%s4724_s11 + $0x10] sm:$0xff]  ;;  %v2235_v17 = vld [vmem:[%s4724_s11] sm:$0xff]  ;;  %v2238_v57 = vld [vmem:[%s4724_s11 + $0x18] sm:$0xff]  ;;  %s2916_s13 = scalar_lea.vmem %s2290_s0, 2048  ;;  %p2921_p1 = scmp.lt.s32.totalorder %s2290_s0, %s2290_s0 }
 0x3a4   :  { %v2523_v0 = vadd.f32 %v2522_v45, %v2521_v11  ;;  %p2917_p0 = scmp.ne.s32.totalorder %s2290_s0, %s2916_s13  ;;  %p2922_p2 = scmp.lt.s32.totalorder %s2916_s13, %s2916_s13 }
 0x3a5   :  { %v2021_v13 = vadd.f32 %v2520_v39, %v1924_v15  ;;  %v1927_v20 = vadd.f32 %v2459_v26, %v4550_v23  ;;  %2576 = vmatprep.mubr.bf16.mxu1 %v2063_v58  ;;  %v2236_v58 = vld [vmem:[%s4724_s11 + $0x8] sm:$0xff] }
 0x3a6   :  { %p2923_p3 = por %p2922_p2, %p2921_p1 }
 0x3a7   :  { %v2024_v38 = vadd.f32 %v2523_v0, %v1927_v20  ;;  %v2460_v1 = vpop.f32.mrb[88].mxu0  ;;  %v2053_v55 = vadd.f32 %v2910_v32, %v2021_v13 }
 0x3a8   :  { %v2524_v49 = vpop.f32.mrb[88].mxu1  ;;  %v2461_v36 = vpop.f32.mrb[89].mxu0  ;;  %p2924_p4 = pnand %p2923_p3, %p2917_p0 }
 0x3a9   :  { %v2054_v28 = vadd.f32 %v2911_v35, %v2024_v38  ;;  %v2462_v61 = vadd.f32 %v2461_v36, %v2460_v1  ;;  %v2525_v48 = vpop.f32.mrb[89].mxu1  ;;  %v2463_v12 = vpop.f32.mrb[90].mxu0 }
 0x3aa   :  { %v2526_v4 = vadd.f32 %v2525_v48, %v2524_v49  ;;  %v2527_v3 = vpop.f32.mrb[90].mxu1  ;;  %v2464_v31 = vpop.f32.mrb[91].mxu0  ;;  %v2241_v49 = vld [vmem:[%s4724_s11 + $0x30] sm:$0xff] }
 0x3ab   :  { %v2064_v2 = vpack.c.bf16 %v2054_v28, %v2053_v55  ;;  %v1932_v34 = vadd.f32 %v2462_v61, %v4550_v23  ;;  %v2465_v18 = vadd.f32 %v2464_v31, %v2463_v12  ;;  %v2528_v10 = vpop.f32.mrb[91].mxu1  ;;  %v2239_v55 = vld [vmem:[%s4724_s11 + $0x20] sm:$0xff]  ;;  %v2242_v61 = vld [vmem:[%s4724_s11 + $0x38] sm:$0xff] }
 0x3ac   :  { %v2529_v16 = vadd.f32 %v2528_v10, %v2527_v3  ;;  %v2240_v3 = vld [vmem:[%s4724_s11 + $0x28] sm:$0xff] }
 0x3ad   :  { %v2029_v46 = vadd.f32 %v2526_v4, %v1932_v34  ;;  %v1935_v5 = vadd.f32 %v2465_v18, %v4550_v23  ;;  %2577 = vmatmul.mubr.bf16.vlgmr.msra.gmra.mrb[96].mxu1 %v2064_v2 }
 0x3af   :  { %v2032_v24 = vadd.f32 %v2529_v16, %v1935_v5  ;;  %v2466_v29 = vpop.f32.mrb[92].mxu0  ;;  %v2055_v19 = vadd.f32 %v2912_v41, %v2029_v46  ;;  %v2245_v16 = vld [vmem:[%s4724_s11 + $0x50] sm:$0xff] }
 0x3b0   :  { %v2530_v63 = vpop.f32.mrb[92].mxu1  ;;  %v2467_v59 = vpop.f32.mrb[93].mxu0 }
 0x3b1   :  { %v2056_v9 = vadd.f32 %v2913_v6, %v2032_v24  ;;  %v2468_v42 = vadd.f32 %v2467_v59, %v2466_v29  ;;  %v2531_v51 = vpop.f32.mrb[93].mxu1  ;;  %v2469_v21 = vpop.f32.mrb[94].mxu0  ;;  %v2243_v24 = vld [vmem:[%s4724_s11 + $0x40] sm:$0xff]  ;;  %v2246_v59 = vld [vmem:[%s4724_s11 + $0x58] sm:$0xff] }
 0x3b2   :  { %v2532_v30 = vadd.f32 %v2531_v51, %v2530_v63  ;;  %v2533_v53 = vpop.f32.mrb[94].mxu1  ;;  %v2470_v56 = vpop.f32.mrb[95].mxu0 }
 0x3b3   :  { %v1940_v43 = vadd.f32 %v2468_v42, %v4550_v23  ;;  %v2471_v22 = vadd.f32 %v2470_v56, %v2469_v21  ;;  %v2534_v44 = vpop.f32.mrb[95].mxu1  ;;  %v2065_v40 = vpack.c.bf16 %v2056_v9, %v2055_v19  ;;  %v2244_v9 = vld [vmem:[%s4724_s11 + $0x48] sm:$0xff]  ;;  %v2249_v56 = vld [vmem:[%s4724_s11 + $0x70] sm:$0xff] }
 0x3b4   :  { %v2535_v37 = vadd.f32 %v2534_v44, %v2533_v53  ;;  %v2247_v44 = vld [vmem:[%s4724_s11 + $0x60] sm:$0xff] }
 0x3b5   :  { %v2037_v60 = vadd.f32 %v2532_v30, %v1940_v43  ;;  %v1943_v25 = vadd.f32 %v2471_v22, %v4550_v23  ;;  %2580 = vmatprep.mubr.bf16.mxu1 %v2065_v40 }
 0x3b7   :  { %v2040_v54 = vadd.f32 %v2535_v37, %v1943_v25  ;;  %v2057_v62 = vadd.f32 %v2914_v52, %v2037_v60  ;;  %v2250_v60 = vld [vmem:[%s4724_s11 + $0x78] sm:$0xff] }
 0x3b9   :  { %v2058_v7 = vadd.f32 %v2915_v50, %v2040_v54 }
 0x3bb   :  { %v2066_v33 = vpack.c.bf16 %v2058_v7, %v2057_v62  ;;  %v2248_v62 = vld [vmem:[%s4724_s11 + $0x68] sm:$0xff] }
 0x3bd   :  { %2581 = vmatmul.mubr.bf16.gmra.mrb[100].mxu1 %v2066_v33 }
 0x44b   :  { %v2570_v23 = vpop.f32.mrb[96].mxu0 }
 0x44c   :  { %v2181_v8 = vadd.f32 %v2570_v23, %v4619_v14  ;;  %v2172_v27 = vpop.f32.mrb[97].mxu0 }
 0x44d   :  { %v2173_v39 = vadd.f32 %v4619_v14, %v2172_v27  ;;  %v2571_v11 = vpop.f32.mrb[98].mxu0 }
 0x44e   :  { %v2253_v15 = vadd.f32 %v2237_v47, %v2181_v8  ;;  %v2184_v26 = vadd.f32 %v2571_v11, %v4619_v14  ;;  %v2175_v45 = vpop.f32.mrb[99].mxu0 }
 0x44f   :  { %v2251_v0 = vadd.f32 %v2235_v17, %v2173_v39  ;;  %v2176_v13 = vadd.f32 %v4619_v14, %v2175_v45 }
 0x450   :  { %2270 = vst.msk [vmem:[#allocation2 + $0x10] sm:$0xff] %vm2267_vm0, %v2253_v15  ;;  %v2254_v20 = vadd.f32 %v2238_v57, %v2184_v26 }
 0x451   :  { %2268 = vst.msk [vmem:[#allocation2] sm:$0xff] %vm2267_vm0, %v2251_v0  ;;  %v2252_v38 = vadd.f32 %v2236_v58, %v2176_v13 }
 0x452   :  { %2271 = vst.msk [vmem:[#allocation2 + $0x18] sm:$0xff] %vm2267_vm0, %v2254_v20 }
 0x453   :  { %2269 = vst.msk [vmem:[#allocation2 + $0x8] sm:$0xff] %vm2267_vm0, %v2252_v38 }
 0x469   :  { %v2574_v1 = vpop.f32.mrb[100].mxu0 }
 0x46a   :  { %v2197_v36 = vadd.f32 %v2574_v1, %v4619_v14  ;;  %v2188_v32 = vpop.f32.mrb[101].mxu0 }
 0x46b   :  { %v2189_v35 = vadd.f32 %v4619_v14, %v2188_v32  ;;  %v2575_v28 = vpop.f32.mrb[102].mxu0 }
 0x46c   :  { %v2257_v48 = vadd.f32 %v2241_v49, %v2197_v36  ;;  %v2200_v12 = vadd.f32 %v2575_v28, %v4619_v14  ;;  %v2191_v4 = vpop.f32.mrb[103].mxu0 }
 0x46d   :  { %v2255_v31 = vadd.f32 %v2239_v55, %v2189_v35  ;;  %v2192_v2 = vadd.f32 %v4619_v14, %v2191_v4 }
 0x46e   :  { %2274 = vst.msk [vmem:[#allocation2 + $0x30] sm:$0xff] %vm2267_vm0, %v2257_v48  ;;  %v2258_v34 = vadd.f32 %v2242_v61, %v2200_v12 }
 0x46f   :  { %2272 = vst.msk [vmem:[#allocation2 + $0x20] sm:$0xff] %vm2267_vm0, %v2255_v31  ;;  %v2256_v18 = vadd.f32 %v2240_v3, %v2192_v2 }
 0x470   :  { %2275 = vst.msk [vmem:[#allocation2 + $0x38] sm:$0xff] %vm2267_vm0, %v2258_v34 }
 0x471   :  { %2273 = vst.msk [vmem:[#allocation2 + $0x28] sm:$0xff] %vm2267_vm0, %v2256_v18 }
 0x480   :  { %v2578_v10 = vpop.f32.mrb[96].mxu1 }
 0x481   :  { %v2213_v46 = vadd.f32 %v2578_v10, %v4619_v14  ;;  %v2204_v5 = vpop.f32.mrb[97].mxu1 }
 0x482   :  { %v2205_v29 = vadd.f32 %v4619_v14, %v2204_v5  ;;  %v2579_v63 = vpop.f32.mrb[98].mxu1 }
 0x483   :  { %v2261_v41 = vadd.f32 %v2245_v16, %v2213_v46  ;;  %v2216_v19 = vadd.f32 %v2579_v63, %v4619_v14  ;;  %v2207_v6 = vpop.f32.mrb[99].mxu1 }
 0x484   :  { %v2259_v42 = vadd.f32 %v2243_v24, %v2205_v29  ;;  %v2208_v51 = vadd.f32 %v4619_v14, %v2207_v6 }
 0x485   :  { %2278 = vst.msk [vmem:[#allocation2 + $0x50] sm:$0xff] %vm2267_vm0, %v2261_v41  ;;  %v2262_v21 = vadd.f32 %v2246_v59, %v2216_v19 }
 0x486   :  { %2276 = vst.msk [vmem:[#allocation2 + $0x40] sm:$0xff] %vm2267_vm0, %v2259_v42  ;;  %v2260_v30 = vadd.f32 %v2244_v9, %v2208_v51 }
 0x487   :  { %2279 = vst.msk [vmem:[#allocation2 + $0x58] sm:$0xff] %vm2267_vm0, %v2262_v21 }
 0x488   :  { %2277 = vst.msk [vmem:[#allocation2 + $0x48] sm:$0xff] %vm2267_vm0, %v2260_v30 }
 0x490   :  { %v2582_v53 = vpop.f32.mrb[100].mxu1 }
 0x491   :  { %v2229_v43 = vadd.f32 %v2582_v53, %v4619_v14  ;;  %v2220_v22 = vpop.f32.mrb[101].mxu1 }
 0x492   :  { %v2221_v40 = vadd.f32 %v4619_v14, %v2220_v22  ;;  %v2583_v37 = vpop.f32.mrb[102].mxu1 }
 0x493   :  { %v2265_v25 = vadd.f32 %v2249_v56, %v2229_v43  ;;  %v2232_v54 = vadd.f32 %v2583_v37, %v4619_v14  ;;  %v2223_v52 = vpop.f32.mrb[103].mxu1 }
 0x494   :  { %v2263_v50 = vadd.f32 %v2247_v44, %v2221_v40  ;;  %v2224_v7 = vadd.f32 %v4619_v14, %v2223_v52 }
 0x495   :  { %2282 = vst.msk [vmem:[#allocation2 + $0x70] sm:$0xff] %vm2267_vm0, %v2265_v25  ;;  %v2266_v33 = vadd.f32 %v2250_v60, %v2232_v54 }
 0x496   :  { %2280 = vst.msk [vmem:[#allocation2 + $0x60] sm:$0xff] %vm2267_vm0, %v2263_v50  ;;  %v2264_v23 = vadd.f32 %v2248_v62, %v2224_v7 }
 0x497   :  { %2283 = vst.msk [vmem:[#allocation2 + $0x78] sm:$0xff] %vm2267_vm0, %v2266_v33 }
 0x498   :  { %2281 = vst.msk [vmem:[#allocation2 + $0x68] sm:$0xff] %vm2267_vm0, %v2264_v23 }
 0x499   :  { %2927 = shalt.err (!%p2924_p4)
}
 0x49a   :  { %s2928_s14 = scalar_lea.hbm %s4725_s12, 2048 }
 0x49b   :  { %p2929_p5 = scmp.ne.s32.totalorder %s4725_s12, %s2928_s14  ;;  %p2932_p6 = scmp.lt.u32.totalorder %s2928_s14, %s4725_s12 }
 0x49d   :  { %p2934_p7 = pnand %p2932_p6, %p2929_p5 }
 0x49f   :  { %2937 = shalt.err (!%p2934_p7)
}
 0x4a0   :  { %s2942_s17 = smov 128   ;;  %s2943_s18 = smov 8  }
 0x4a1   :  { %2295 = dma.vmem_to_hbm [thread:$0]  %s2290_s0, 2048, %s4725_s12, [#allocation3], %s2942_s17, %s2942_s17, %s2943_s18  }
 0x4a2   :  { %2938 = dma.done.wait [#allocation3], 2048  }
 0x4a3   :  { %2939 = vsyncadd [#allocation3], 4294965248 }
 0x4a4   :  { %2299 = vsyncpa [#allocation3], 1 }

</bundles_post_ra>
